<compile_context>
chip_gen: v7x
topology: tpu7x:2x2x1
jax: 0.10.0
libtpu: 0.0.40
codegen_flags: <defaults>
</compile_context>

<pallas_src>
import math

import jax
import jax.numpy as jnp
from jax.experimental import pallas as pl
from jax.experimental.pallas import tpu as pltpu

VMEM = pltpu.MemorySpace.VMEM

H = 24            # GRU hidden size
C = 3             # number of classes
IN_FEATS = 6      # x[:, :, :6]
LIN_IN_PAD = 8    # lw0 zero-padded to 8 input rows (driver feature dim)
LIN_HID = 36      # linStack hidden dim (12 * 3)
LIN_OUT = 8       # linStack output dim / GRU input size

SLAB_COLS = 128   # lane-padded parameter slab width


def _align8(n):
    return ((n + 7) // 8) * 8


# ----------------------------------------------------------------------------
# Packed-parameter slab layout (row offsets are 8-sublane aligned, cols <=128)
# ----------------------------------------------------------------------------
_PARAM_SHAPES = [
    ("lw0", (LIN_IN_PAD, LIN_HID)), ("lb0", (1, LIN_HID)),
    ("lw1", (LIN_HID, LIN_HID)),    ("lb1", (1, LIN_HID)),
    ("lw2", (LIN_HID, LIN_OUT)),    ("lb2", (1, LIN_OUT)),
]
for _l in range(3):
    _din = LIN_OUT if _l == 0 else H
    _PARAM_SHAPES += [
        (f"wih{_l}", (_din, 3 * H)), (f"whh{_l}", (H, 3 * H)),
        (f"bih{_l}", (1, 3 * H)),    (f"bhh{_l}", (1, 3 * H)),
    ]
_PARAM_SHAPES += [("fcw", (H, C)), ("fcb", (1, C))]

_OFFSETS = {}
_row = 0
for _name, (_r, _c) in _PARAM_SHAPES:
    _OFFSETS[_name] = (_row, _r, _c)
    _row += _align8(_r)
SLAB_ROWS = _row  # 320


def _vspec():
    # whole-array block resident in VMEM (all shapes here are tiny)
    return pl.BlockSpec(memory_space=VMEM)


def _selu(x):
    alpha = 1.6732632423543772
    scale = 1.0507009873554805
    return scale * jnp.where(x > 0, x, alpha * (jnp.exp(x) - 1.0))


# ----------------------------------------------------------------------------
# Single fused kernel: linStack -> 3-layer GRU -> fc -> loss
#   x_ref      : (T*B, LIN_IN_PAD) f32, flat t-major
#   tgt_ref    : (T*B, 1) int32,  flat t-major
#   wcls_ref   : (1, C) f32 class weights
#   w_ref      : (SLAB_ROWS, 128) f32 packed parameters
#   logits_ref : (T*B, C) f32 out
#   losses_ref : (1, C) f32 out   [loss, loss1, loss2]
#   gi_scr     : (T, B, 3H) f32 scratch (per-layer input projections, t-major)
#   seq_scr    : (T, B, H)  f32 scratch (per-layer hidden states, t-major)
# ----------------------------------------------------------------------------
def fused_forward_kernel(x_ref, tgt_ref, wcls_ref, w_ref,
                         logits_ref, losses_ref,
                         gi_scr, seq_scr):
    T, B, _ = gi_scr.shape
    N = T * B

    def P(name):
        off, rows, cols = _OFFSETS[name]
        return w_ref[off:off + rows, 0:cols]

    def Pb(name):  # bf16 view of a parameter block (non-recurrent matmuls)
        return P(name).astype(jnp.bfloat16)

    # ---- linStack (Linear -> SELU, 3 layers); x[:, :, :6] handled by the
    # ---- zero-padded lw0 rows; dropout (eval) = identity --------------------
    xin = x_ref[...]                                                   # (N, 8)
    h = _selu(jnp.dot(xin.astype(jnp.bfloat16), Pb("lw0"),
                      preferred_element_type=jnp.float32) + P("lb0"))  # (N, 36)
    h = _selu(jnp.dot(h.astype(jnp.bfloat16), Pb("lw1"),
                      preferred_element_type=jnp.float32) + P("lb1"))  # (N, 36)
    h = _selu(jnp.dot(h.astype(jnp.bfloat16), Pb("lw2"),
                      preferred_element_type=jnp.float32) + P("lb2"))  # (N, 8)

    # ---- 3-layer unidirectional GRU, time-major recurrence ------------------
    seq = h                                                            # (N, Din) t-major
    for layer in range(3):
        whh = P(f"whh{layer}")                                         # (H, 3H) f32
        bhh = P(f"bhh{layer}")                                         # (1, 3H)
        # Input projection hoisted out of the recurrence: one matmul per layer.
        gi_flat = (jnp.dot(seq.astype(jnp.bfloat16), Pb(f"wih{layer}"),
                           preferred_element_type=jnp.float32)
                   + P(f"bih{layer}"))                                 # (N, 3H)
        gi_scr[...] = gi_flat.reshape(T, B, 3 * H)                     # t-major tiles

        hstate = jnp.zeros((B, H), jnp.float32)
        for t in range(T):                                             # static unroll (T=8)
            gi = gi_scr[t]                                             # (B, 3H) contiguous tile
            gh = jnp.dot(hstate, whh,
                         preferred_element_type=jnp.float32) + bhh     # (B, 3H)
            r = jax.nn.sigmoid(gi[:, 0:H] + gh[:, 0:H])
            z = jax.nn.sigmoid(gi[:, H:2 * H] + gh[:, H:2 * H])
            n = jnp.tanh(gi[:, 2 * H:3 * H] + r * gh[:, 2 * H:3 * H])
            hstate = (1.0 - z) * n + z * hstate
            seq_scr[t] = hstate                                        # contiguous tile store
        seq = seq_scr[...].reshape(N, H)
        # GRU inter-layer dropout 0.1: eval mode -> identity

    # ---- fc + 1e-5 -----------------------------------------------------------
    logits = (jnp.dot(seq, P("fcw"), preferred_element_type=jnp.float32)
              + P("fcb") + 1e-5)                                       # (N, 3)
    logits_ref[...] = logits

    # ---- loss_giw ~= weighted CE (ignore_index=-1) + generalized soft-dice ---
    tgt = tgt_ref[...]                                                 # (N, 1) int32
    w = wcls_ref[...]                                                  # (1, C)

    # numerically stable log-softmax over the class (lane) dim
    m = jnp.max(logits, axis=-1, keepdims=True)
    zc = logits - m
    lse = jnp.log(jnp.sum(jnp.exp(zc), axis=-1, keepdims=True))
    logp = zc - lse                                                    # (N, C)
    p = jnp.exp(logp)

    classes = jax.lax.broadcasted_iota(jnp.int32, (N, C), 1)
    onehot = (classes == tgt).astype(jnp.float32)                      # ignore -> all zero
    valid = (tgt != -1).astype(jnp.float32)                            # (N, 1)

    # loss1: PyTorch-style weighted CE mean: sum(w_y * nll) / sum(w_y)
    nll = -(onehot * logp)
    num1 = jnp.sum(jnp.sum(nll * w * valid, axis=1, keepdims=True),
                   axis=0, keepdims=True)                              # (1, 1)
    den1 = jnp.sum(jnp.sum(onehot * w * valid, axis=1, keepdims=True),
                   axis=0, keepdims=True)                              # (1, 1)
    loss1 = num1 / jnp.maximum(den1, 1e-12)

    # loss2: generalized soft-dice with the provided class weights
    pv = p * valid
    inter = jnp.sum(pv * onehot, axis=0, keepdims=True)                # (1, C)
    tot = jnp.sum(pv + onehot * valid, axis=0, keepdims=True)          # (1, C)
    num2 = jnp.sum(w * inter, axis=1, keepdims=True)                   # (1, 1)
    den2 = jnp.sum(w * tot, axis=1, keepdims=True)                     # (1, 1)
    loss2 = 1.0 - 2.0 * num2 / jnp.maximum(den2, 1e-12)

    # single (1, 3) row: [loss, loss1, loss2]
    lane = jax.lax.broadcasted_iota(jnp.int32, (1, C), 1)
    losses_ref[...] = jnp.where(lane == 0, loss1 + loss2,
                                jnp.where(lane == 1, loss1, loss2))


def fused_forward_call(x_flat, tgt_flat, weight2d, slab, T, B):
    logits_flat, losses = pl.pallas_call(
        fused_forward_kernel,
        out_shape=(jax.ShapeDtypeStruct((T * B, C), jnp.float32),
                   jax.ShapeDtypeStruct((1, C), jnp.float32)),
        in_specs=[_vspec()] * 4,
        out_specs=(_vspec(), _vspec()),
        scratch_shapes=[pltpu.VMEM((T, B, 3 * H), jnp.float32),
                        pltpu.VMEM((T, B, H), jnp.float32)],
    )(x_flat, tgt_flat, weight2d, slab)
    return logits_flat, losses


# ----------------------------------------------------------------------------
# Parameter init (deterministic, synthetic; shapes from model_4.__init__)
# ----------------------------------------------------------------------------
def _uni(key, shape, fan_in):
    bound = 1.0 / math.sqrt(max(fan_in, 1))
    return jax.random.uniform(key, shape, jnp.float32, -bound, bound)


def init_params(key):
    ks = iter(jax.random.split(key, 64))
    params = {}
    # linStack: Linear(6,36), Linear(36,36), Linear(36,8)
    params["lin"] = (
        _uni(next(ks), (IN_FEATS, LIN_HID), IN_FEATS), _uni(next(ks), (1, LIN_HID), IN_FEATS),
        _uni(next(ks), (LIN_HID, LIN_HID), LIN_HID), _uni(next(ks), (1, LIN_HID), LIN_HID),
        _uni(next(ks), (LIN_HID, LIN_OUT), LIN_HID), _uni(next(ks), (1, LIN_OUT), LIN_HID),
    )
    # GRU: 3 layers, unidirectional; hidden 24, gates 3*24=72 (PyTorch 1/sqrt(H) init)
    gru = []
    for layer in range(3):
        din = LIN_OUT if layer == 0 else H
        wih = _uni(next(ks), (din, 3 * H), H)
        whh = _uni(next(ks), (H, 3 * H), H)
        bih = _uni(next(ks), (1, 3 * H), H)
        bhh = _uni(next(ks), (1, 3 * H), H)
        gru.append((wih, whh, bih, bhh))
    params["gru"] = tuple(gru)
    # fc: Linear(24, 3)
    params["fc_w"] = _uni(next(ks), (H, C), H)
    params["fc_b"] = _uni(next(ks), (1, C), H)
    return params


def pack_params(params):
    """Pack all parameter tensors into one (SLAB_ROWS, 128) f32 slab (built once)."""
    lw0, lb0, lw1, lb1, lw2, lb2 = params["lin"]
    # zero-pad lw0 rows 6..7 -> feeding the full 8-feature input is equivalent
    # to x[:, :, :6] @ lw0.
    lw0p = jnp.pad(jnp.asarray(lw0, jnp.float32),
                   ((0, LIN_IN_PAD - IN_FEATS), (0, 0)))
    tensors = {"lw0": lw0p, "lb0": lb0, "lw1": lw1, "lb1": lb1,
               "lw2": lw2, "lb2": lb2}
    for layer in range(3):
        wih, whh, bih, bhh = params["gru"][layer]
        tensors[f"wih{layer}"] = wih
        tensors[f"whh{layer}"] = whh
        tensors[f"bih{layer}"] = bih
        tensors[f"bhh{layer}"] = bhh
    tensors["fcw"] = params["fc_w"]
    tensors["fcb"] = params["fc_b"]

    blocks = []
    for name, (rows, cols) in _PARAM_SHAPES:
        t = jnp.asarray(tensors[name], jnp.float32)
        assert t.shape == (rows, cols), (name, t.shape, (rows, cols))
        blocks.append(jnp.pad(t, ((0, _align8(rows) - rows),
                                  (0, SLAB_COLS - cols))))
    slab = jnp.concatenate(blocks, axis=0)
    assert slab.shape == (SLAB_ROWS, SLAB_COLS)
    return slab


# ----------------------------------------------------------------------------
# Forward pass: a single fused Pallas kernel launch (jit-compiled wrapper).
# Layout plumbing (feature pad/slice, batch-first <-> time-major transpose,
# logits reshape) stays in XLA; the kernel only sees lane/tile-friendly slabs.
# The torch module's host-side NaN/Inf asserts are omitted: they force
# device->host syncs and break jit (debug-only checks, not forward semantics).
# ----------------------------------------------------------------------------
@jax.jit
def model4_forward(x, target, weight, slab):
    B, T, F = x.shape
    x = x.astype(jnp.float32)
    if F == LIN_IN_PAD:
        x_in = x                                  # lw0 rows 6..7 are zero
    else:
        x_in = jnp.pad(x[..., :IN_FEATS],
                       ((0, 0), (0, 0), (0, LIN_IN_PAD - IN_FEATS)))
    # time-major, flat t-major slabs for the kernel
    x_flat = jnp.transpose(x_in, (1, 0, 2)).reshape(T * B, LIN_IN_PAD)
    tgt_flat = jnp.transpose(target.astype(jnp.int32), (1, 0)).reshape(T * B, 1)
    weight2d = weight.reshape(1, -1).astype(jnp.float32)

    logits_flat, losses = fused_forward_call(x_flat, tgt_flat, weight2d, slab, T, B)

    logits = jnp.transpose(logits_flat.reshape(T, B, C), (1, 0, 2))   # (B, T, C)
    return logits, losses[0, 0], losses[0, 1], losses[0, 2]


if __name__ == "__main__":
    key = jax.random.PRNGKey(0)
    k_par, k_x, k_t, k_w = jax.random.split(key, 4)

    B, T, F = 2, 8, 8                                  # model uses x[:, :, :6]
    x = jax.random.normal(k_x, (B, T, F), jnp.float32)
    target = jax.random.randint(k_t, (B, T), 0, 3, jnp.int32)   # classes {0,1,2}
    weight = jnp.abs(jax.random.normal(k_w, (3,), jnp.float32)) + 0.5

    params = init_params(k_par)
    slab = pack_params(params)                          # built once, single DMA per call

    logits, loss, loss1, loss2 = model4_forward(x, target, weight, slab)
    jax.block_until_ready((logits, loss, loss1, loss2))

    assert logits.shape == (B, T, 3)
    assert not bool(jnp.isnan(logits).any())
    assert not bool(jnp.isnan(loss)) and not bool(jnp.isnan(loss1)) and not bool(jnp.isnan(loss2))
    print("KERNEL_OK")
</pallas_src>

<mosaic_0001>
module attributes {stable_mosaic.version = 11 : i64} {
  func.func @fused_forward_kernel(%arg0: memref<16x8xf32, #tpu.memory_space<vmem>>, %arg1: memref<16x1xi32, #tpu.memory_space<vmem>>, %arg2: memref<1x3xf32, #tpu.memory_space<vmem>>, %arg3: memref<320x128xf32, #tpu.memory_space<vmem>>, %arg4: memref<16x3xf32, #tpu.memory_space<vmem>>, %arg5: memref<1x3xf32, #tpu.memory_space<vmem>>, %arg6: memref<8x2x72xf32, #tpu.memory_space<vmem>>, %arg7: memref<8x2x24xf32, #tpu.memory_space<vmem>>) attributes {dimension_semantics = [], scalar_prefetch = 0 : i64, scratch_operands = 2 : i64, tpu.core_type = #tpu.core_type<tc>} {
    %c0 = arith.constant 0 : index
    %c0_0 = arith.constant 0 : index
    %0 = vector.load %arg0[%c0, %c0_0] : memref<16x8xf32, #tpu.memory_space<vmem>>, vector<16x8xf32>
    %1 = arith.truncf %0 : vector<16x8xf32> to vector<16x8xbf16>
    %c0_1 = arith.constant 0 : index
    %c0_2 = arith.constant 0 : index
    %2 = vector.load %arg3[%c0_1, %c0_2] : memref<320x128xf32, #tpu.memory_space<vmem>>, vector<8x36xf32>
    %3 = arith.truncf %2 : vector<8x36xf32> to vector<8x36xbf16>
    %cst = arith.constant dense<0.000000e+00> : vector<16x36xf32>
    %4 = tpu.matmul %1, %3, %cst {dimension_numbers = #tpu.dot_dimension_numbers<[1], [0], [0], [1], [0, 0, 1, 1], [], []>} : vector<16x8xbf16>, vector<8x36xbf16>, vector<16x36xf32> -> vector<16x36xf32>
    %c8 = arith.constant 8 : index
    %c0_3 = arith.constant 0 : index
    %5 = vector.load %arg3[%c8, %c0_3] : memref<320x128xf32, #tpu.memory_space<vmem>>, vector<1x36xf32>
    %6 = vector.broadcast %5 : vector<1x36xf32> to vector<16x36xf32>
    %7 = arith.addf %4, %6 : vector<16x36xf32>
    %cst_4 = arith.constant 0.000000e+00 : f32
    %8 = vector.broadcast %cst_4 : f32 to vector<16x36xf32>
    %9 = arith.cmpf ogt, %7, %8 : vector<16x36xf32>
    %10 = math.exp %7 : vector<16x36xf32>
    %cst_5 = arith.constant 1.000000e+00 : f32
    %11 = vector.broadcast %cst_5 : f32 to vector<16x36xf32>
    %12 = arith.subf %10, %11 : vector<16x36xf32>
    %cst_6 = arith.constant 1.67326319 : f32
    %13 = vector.broadcast %cst_6 : f32 to vector<16x36xf32>
    %14 = arith.mulf %13, %12 : vector<16x36xf32>
    %15 = arith.select %9, %7, %14 : vector<16x36xi1>, vector<16x36xf32>
    %cst_7 = arith.constant 1.05070102 : f32
    %16 = vector.broadcast %cst_7 : f32 to vector<16x36xf32>
    %17 = arith.mulf %16, %15 : vector<16x36xf32>
    %18 = arith.truncf %17 : vector<16x36xf32> to vector<16x36xbf16>
    %c16 = arith.constant 16 : index
    %c0_8 = arith.constant 0 : index
    %19 = vector.load %arg3[%c16, %c0_8] : memref<320x128xf32, #tpu.memory_space<vmem>>, vector<36x36xf32>
    %20 = arith.truncf %19 : vector<36x36xf32> to vector<36x36xbf16>
    %cst_9 = arith.constant dense<0.000000e+00> : vector<16x36xf32>
    %21 = tpu.matmul %18, %20, %cst_9 {dimension_numbers = #tpu.dot_dimension_numbers<[1], [0], [0], [1], [0, 0, 1, 1], [], []>} : vector<16x36xbf16>, vector<36x36xbf16>, vector<16x36xf32> -> vector<16x36xf32>
    %c56 = arith.constant 56 : index
    %c0_10 = arith.constant 0 : index
    %22 = vector.load %arg3[%c56, %c0_10] : memref<320x128xf32, #tpu.memory_space<vmem>>, vector<1x36xf32>
    %23 = vector.broadcast %22 : vector<1x36xf32> to vector<16x36xf32>
    %24 = arith.addf %21, %23 : vector<16x36xf32>
    %cst_11 = arith.constant 0.000000e+00 : f32
    %25 = vector.broadcast %cst_11 : f32 to vector<16x36xf32>
    %26 = arith.cmpf ogt, %24, %25 : vector<16x36xf32>
    %27 = math.exp %24 : vector<16x36xf32>
    %cst_12 = arith.constant 1.000000e+00 : f32
    %28 = vector.broadcast %cst_12 : f32 to vector<16x36xf32>
    %29 = arith.subf %27, %28 : vector<16x36xf32>
    %cst_13 = arith.constant 1.67326319 : f32
    %30 = vector.broadcast %cst_13 : f32 to vector<16x36xf32>
    %31 = arith.mulf %30, %29 : vector<16x36xf32>
    %32 = arith.select %26, %24, %31 : vector<16x36xi1>, vector<16x36xf32>
    %cst_14 = arith.constant 1.05070102 : f32
    %33 = vector.broadcast %cst_14 : f32 to vector<16x36xf32>
    %34 = arith.mulf %33, %32 : vector<16x36xf32>
    %35 = arith.truncf %34 : vector<16x36xf32> to vector<16x36xbf16>
    %c64 = arith.constant 64 : index
    %c0_15 = arith.constant 0 : index
    %36 = vector.load %arg3[%c64, %c0_15] : memref<320x128xf32, #tpu.memory_space<vmem>>, vector<36x8xf32>
    %37 = arith.truncf %36 : vector<36x8xf32> to vector<36x8xbf16>
    %cst_16 = arith.constant dense<0.000000e+00> : vector<16x8xf32>
    %38 = tpu.matmul %35, %37, %cst_16 {dimension_numbers = #tpu.dot_dimension_numbers<[1], [0], [0], [1], [0, 0, 1, 1], [], []>} : vector<16x36xbf16>, vector<36x8xbf16>, vector<16x8xf32> -> vector<16x8xf32>
    %c104 = arith.constant 104 : index
    %c0_17 = arith.constant 0 : index
    %39 = vector.load %arg3[%c104, %c0_17] : memref<320x128xf32, #tpu.memory_space<vmem>>, vector<1x8xf32>
    %40 = vector.broadcast %39 : vector<1x8xf32> to vector<16x8xf32>
    %41 = arith.addf %38, %40 : vector<16x8xf32>
    %cst_18 = arith.constant 0.000000e+00 : f32
    %42 = vector.broadcast %cst_18 : f32 to vector<16x8xf32>
    %43 = arith.cmpf ogt, %41, %42 : vector<16x8xf32>
    %44 = math.exp %41 : vector<16x8xf32>
    %cst_19 = arith.constant 1.000000e+00 : f32
    %45 = vector.broadcast %cst_19 : f32 to vector<16x8xf32>
    %46 = arith.subf %44, %45 : vector<16x8xf32>
    %cst_20 = arith.constant 1.67326319 : f32
    %47 = vector.broadcast %cst_20 : f32 to vector<16x8xf32>
    %48 = arith.mulf %47, %46 : vector<16x8xf32>
    %49 = arith.select %43, %41, %48 : vector<16x8xi1>, vector<16x8xf32>
    %cst_21 = arith.constant 1.05070102 : f32
    %50 = vector.broadcast %cst_21 : f32 to vector<16x8xf32>
    %51 = arith.mulf %50, %49 : vector<16x8xf32>
    %c120 = arith.constant 120 : index
    %c0_22 = arith.constant 0 : index
    %52 = vector.load %arg3[%c120, %c0_22] : memref<320x128xf32, #tpu.memory_space<vmem>>, vector<24x72xf32>
    %c152 = arith.constant 152 : index
    %c0_23 = arith.constant 0 : index
    %53 = vector.load %arg3[%c152, %c0_23] : memref<320x128xf32, #tpu.memory_space<vmem>>, vector<1x72xf32>
    %54 = arith.truncf %51 : vector<16x8xf32> to vector<16x8xbf16>
    %c112 = arith.constant 112 : index
    %c0_24 = arith.constant 0 : index
    %55 = vector.load %arg3[%c112, %c0_24] : memref<320x128xf32, #tpu.memory_space<vmem>>, vector<8x72xf32>
    %56 = arith.truncf %55 : vector<8x72xf32> to vector<8x72xbf16>
    %cst_25 = arith.constant dense<0.000000e+00> : vector<16x72xf32>
    %57 = tpu.matmul %54, %56, %cst_25 {dimension_numbers = #tpu.dot_dimension_numbers<[1], [0], [0], [1], [0, 0, 1, 1], [], []>} : vector<16x8xbf16>, vector<8x72xbf16>, vector<16x72xf32> -> vector<16x72xf32>
    %c144 = arith.constant 144 : index
    %c0_26 = arith.constant 0 : index
    %58 = vector.load %arg3[%c144, %c0_26] : memref<320x128xf32, #tpu.memory_space<vmem>>, vector<1x72xf32>
    %59 = vector.broadcast %58 : vector<1x72xf32> to vector<16x72xf32>
    %60 = arith.addf %57, %59 : vector<16x72xf32>
    %61 = vector.shape_cast %60 : vector<16x72xf32> to vector<8x2x72xf32>
    %c0_27 = arith.constant 0 : index
    %c0_28 = arith.constant 0 : index
    %c0_29 = arith.constant 0 : index
    %62 = vector.load %arg6[%c0_27, %c0_28, %c0_29] : memref<8x2x72xf32, #tpu.memory_space<vmem>>, vector<8x2x72xf32>
    tpu.vector_store %arg6[%c0_27, %c0_28, %c0_29], %61 {strides = array<i32>} : memref<8x2x72xf32, #tpu.memory_space<vmem>>, vector<8x2x72xf32>,
    %cst_30 = arith.constant 0.000000e+00 : f32
    %63 = vector.broadcast %cst_30 : f32 to vector<2x24xf32>
    %c0_31 = arith.constant 0 : index
    %c0_32 = arith.constant 0 : index
    %c0_33 = arith.constant 0 : index
    %64 = vector.load %arg6[%c0_31, %c0_32, %c0_33] : memref<8x2x72xf32, #tpu.memory_space<vmem>>, vector<1x2x72xf32>
    %65 = vector.shape_cast %64 : vector<1x2x72xf32> to vector<2x72xf32>
    %cst_34 = arith.constant dense<0.000000e+00> : vector<2x72xf32>
    %66 = tpu.matmul %63, %52, %cst_34 {dimension_numbers = #tpu.dot_dimension_numbers<[1], [0], [0], [1], [0, 0, 1, 1], [], []>} : vector<2x24xf32>, vector<24x72xf32>, vector<2x72xf32> -> vector<2x72xf32>
    %67 = vector.broadcast %53 : vector<1x72xf32> to vector<2x72xf32>
    %68 = arith.addf %66, %67 : vector<2x72xf32>
    %69 = vector.extract_strided_slice %65 {offsets = [0, 0], sizes = [2, 24], strides = [1, 1]} : vector<2x72xf32> to vector<2x24xf32>
    %70 = vector.extract_strided_slice %68 {offsets = [0, 0], sizes = [2, 24], strides = [1, 1]} : vector<2x72xf32> to vector<2x24xf32>
    %71 = arith.addf %69, %70 : vector<2x24xf32>
    %72 = arith.negf %71 : vector<2x24xf32>
    %73 = math.exp %72 : vector<2x24xf32>
    %cst_35 = arith.constant 1.000000e+00 : f32
    %74 = vector.broadcast %cst_35 : f32 to vector<2x24xf32>
    %75 = arith.addf %74, %73 : vector<2x24xf32>
    %76 = arith.divf %74, %75 : vector<2x24xf32>
    %77 = vector.extract_strided_slice %65 {offsets = [0, 24], sizes = [2, 24], strides = [1, 1]} : vector<2x72xf32> to vector<2x24xf32>
    %78 = vector.extract_strided_slice %68 {offsets = [0, 24], sizes = [2, 24], strides = [1, 1]} : vector<2x72xf32> to vector<2x24xf32>
    %79 = arith.addf %77, %78 : vector<2x24xf32>
    %80 = arith.negf %79 : vector<2x24xf32>
    %81 = math.exp %80 : vector<2x24xf32>
    %cst_36 = arith.constant 1.000000e+00 : f32
    %82 = vector.broadcast %cst_36 : f32 to vector<2x24xf32>
    %83 = arith.addf %82, %81 : vector<2x24xf32>
    %84 = arith.divf %82, %83 : vector<2x24xf32>
    %85 = vector.extract_strided_slice %65 {offsets = [0, 48], sizes = [2, 24], strides = [1, 1]} : vector<2x72xf32> to vector<2x24xf32>
    %86 = vector.extract_strided_slice %68 {offsets = [0, 48], sizes = [2, 24], strides = [1, 1]} : vector<2x72xf32> to vector<2x24xf32>
    %87 = arith.mulf %76, %86 : vector<2x24xf32>
    %88 = arith.addf %85, %87 : vector<2x24xf32>
    %89 = math.tanh %88 : vector<2x24xf32>
    %cst_37 = arith.constant 1.000000e+00 : f32
    %90 = vector.broadcast %cst_37 : f32 to vector<2x24xf32>
    %91 = arith.subf %90, %84 : vector<2x24xf32>
    %92 = arith.mulf %91, %89 : vector<2x24xf32>
    %93 = arith.mulf %84, %63 : vector<2x24xf32>
    %94 = arith.addf %92, %93 : vector<2x24xf32>
    %c0_38 = arith.constant 0 : index
    %c0_39 = arith.constant 0 : index
    %c0_40 = arith.constant 0 : index
    %95 = vector.load %arg7[%c0_38, %c0_39, %c0_40] : memref<8x2x24xf32, #tpu.memory_space<vmem>>, vector<1x2x24xf32>
    %96 = vector.shape_cast %95 : vector<1x2x24xf32> to vector<2x24xf32>
    %97 = vector.shape_cast %94 : vector<2x24xf32> to vector<1x2x24xf32>
    tpu.vector_store %arg7[%c0_38, %c0_39, %c0_40], %97 {strides = array<i32>} : memref<8x2x24xf32, #tpu.memory_space<vmem>>, vector<1x2x24xf32>,
    %c1 = arith.constant 1 : index
    %c0_41 = arith.constant 0 : index
    %c0_42 = arith.constant 0 : index
    %98 = vector.load %arg6[%c1, %c0_41, %c0_42] : memref<8x2x72xf32, #tpu.memory_space<vmem>>, vector<1x2x72xf32>
    %99 = vector.shape_cast %98 : vector<1x2x72xf32> to vector<2x72xf32>
    %cst_43 = arith.constant dense<0.000000e+00> : vector<2x72xf32>
    %100 = tpu.matmul %94, %52, %cst_43 {dimension_numbers = #tpu.dot_dimension_numbers<[1], [0], [0], [1], [0, 0, 1, 1], [], []>} : vector<2x24xf32>, vector<24x72xf32>, vector<2x72xf32> -> vector<2x72xf32>
    %101 = vector.broadcast %53 : vector<1x72xf32> to vector<2x72xf32>
    %102 = arith.addf %100, %101 : vector<2x72xf32>
    %103 = vector.extract_strided_slice %99 {offsets = [0, 0], sizes = [2, 24], strides = [1, 1]} : vector<2x72xf32> to vector<2x24xf32>
    %104 = vector.extract_strided_slice %102 {offsets = [0, 0], sizes = [2, 24], strides = [1, 1]} : vector<2x72xf32> to vector<2x24xf32>
    %105 = arith.addf %103, %104 : vector<2x24xf32>
    %106 = arith.negf %105 : vector<2x24xf32>
    %107 = math.exp %106 : vector<2x24xf32>
    %cst_44 = arith.constant 1.000000e+00 : f32
    %108 = vector.broadcast %cst_44 : f32 to vector<2x24xf32>
    %109 = arith.addf %108, %107 : vector<2x24xf32>
    %110 = arith.divf %108, %109 : vector<2x24xf32>
    %111 = vector.extract_strided_slice %99 {offsets = [0, 24], sizes = [2, 24], strides = [1, 1]} : vector<2x72xf32> to vector<2x24xf32>
    %112 = vector.extract_strided_slice %102 {offsets = [0, 24], sizes = [2, 24], strides = [1, 1]} : vector<2x72xf32> to vector<2x24xf32>
    %113 = arith.addf %111, %112 : vector<2x24xf32>
    %114 = arith.negf %113 : vector<2x24xf32>
    %115 = math.exp %114 : vector<2x24xf32>
    %cst_45 = arith.constant 1.000000e+00 : f32
    %116 = vector.broadcast %cst_45 : f32 to vector<2x24xf32>
    %117 = arith.addf %116, %115 : vector<2x24xf32>
    %118 = arith.divf %116, %117 : vector<2x24xf32>
    %119 = vector.extract_strided_slice %99 {offsets = [0, 48], sizes = [2, 24], strides = [1, 1]} : vector<2x72xf32> to vector<2x24xf32>
    %120 = vector.extract_strided_slice %102 {offsets = [0, 48], sizes = [2, 24], strides = [1, 1]} : vector<2x72xf32> to vector<2x24xf32>
    %121 = arith.mulf %110, %120 : vector<2x24xf32>
    %122 = arith.addf %119, %121 : vector<2x24xf32>
    %123 = math.tanh %122 : vector<2x24xf32>
    %cst_46 = arith.constant 1.000000e+00 : f32
    %124 = vector.broadcast %cst_46 : f32 to vector<2x24xf32>
    %125 = arith.subf %124, %118 : vector<2x24xf32>
    %126 = arith.mulf %125, %123 : vector<2x24xf32>
    %127 = arith.mulf %118, %94 : vector<2x24xf32>
    %128 = arith.addf %126, %127 : vector<2x24xf32>
    %c1_47 = arith.constant 1 : index
    %c0_48 = arith.constant 0 : index
    %c0_49 = arith.constant 0 : index
    %129 = vector.load %arg7[%c1_47, %c0_48, %c0_49] : memref<8x2x24xf32, #tpu.memory_space<vmem>>, vector<1x2x24xf32>
    %130 = vector.shape_cast %129 : vector<1x2x24xf32> to vector<2x24xf32>
    %131 = vector.shape_cast %128 : vector<2x24xf32> to vector<1x2x24xf32>
    tpu.vector_store %arg7[%c1_47, %c0_48, %c0_49], %131 {strides = array<i32>} : memref<8x2x24xf32, #tpu.memory_space<vmem>>, vector<1x2x24xf32>,
    %c2 = arith.constant 2 : index
    %c0_50 = arith.constant 0 : index
    %c0_51 = arith.constant 0 : index
    %132 = vector.load %arg6[%c2, %c0_50, %c0_51] : memref<8x2x72xf32, #tpu.memory_space<vmem>>, vector<1x2x72xf32>
    %133 = vector.shape_cast %132 : vector<1x2x72xf32> to vector<2x72xf32>
    %cst_52 = arith.constant dense<0.000000e+00> : vector<2x72xf32>
    %134 = tpu.matmul %128, %52, %cst_52 {dimension_numbers = #tpu.dot_dimension_numbers<[1], [0], [0], [1], [0, 0, 1, 1], [], []>} : vector<2x24xf32>, vector<24x72xf32>, vector<2x72xf32> -> vector<2x72xf32>
    %135 = vector.broadcast %53 : vector<1x72xf32> to vector<2x72xf32>
    %136 = arith.addf %134, %135 : vector<2x72xf32>
    %137 = vector.extract_strided_slice %133 {offsets = [0, 0], sizes = [2, 24], strides = [1, 1]} : vector<2x72xf32> to vector<2x24xf32>
    %138 = vector.extract_strided_slice %136 {offsets = [0, 0], sizes = [2, 24], strides = [1, 1]} : vector<2x72xf32> to vector<2x24xf32>
    %139 = arith.addf %137, %138 : vector<2x24xf32>
    %140 = arith.negf %139 : vector<2x24xf32>
    %141 = math.exp %140 : vector<2x24xf32>
    %cst_53 = arith.constant 1.000000e+00 : f32
    %142 = vector.broadcast %cst_53 : f32 to vector<2x24xf32>
    %143 = arith.addf %142, %141 : vector<2x24xf32>
    %144 = arith.divf %142, %143 : vector<2x24xf32>
    %145 = vector.extract_strided_slice %133 {offsets = [0, 24], sizes = [2, 24], strides = [1, 1]} : vector<2x72xf32> to vector<2x24xf32>
    %146 = vector.extract_strided_slice %136 {offsets = [0, 24], sizes = [2, 24], strides = [1, 1]} : vector<2x72xf32> to vector<2x24xf32>
    %147 = arith.addf %145, %146 : vector<2x24xf32>
    %148 = arith.negf %147 : vector<2x24xf32>
    %149 = math.exp %148 : vector<2x24xf32>
    %cst_54 = arith.constant 1.000000e+00 : f32
    %150 = vector.broadcast %cst_54 : f32 to vector<2x24xf32>
    %151 = arith.addf %150, %149 : vector<2x24xf32>
    %152 = arith.divf %150, %151 : vector<2x24xf32>
    %153 = vector.extract_strided_slice %133 {offsets = [0, 48], sizes = [2, 24], strides = [1, 1]} : vector<2x72xf32> to vector<2x24xf32>
    %154 = vector.extract_strided_slice %136 {offsets = [0, 48], sizes = [2, 24], strides = [1, 1]} : vector<2x72xf32> to vector<2x24xf32>
    %155 = arith.mulf %144, %154 : vector<2x24xf32>
    %156 = arith.addf %153, %155 : vector<2x24xf32>
    %157 = math.tanh %156 : vector<2x24xf32>
    %cst_55 = arith.constant 1.000000e+00 : f32
    %158 = vector.broadcast %cst_55 : f32 to vector<2x24xf32>
    %159 = arith.subf %158, %152 : vector<2x24xf32>
    %160 = arith.mulf %159, %157 : vector<2x24xf32>
    %161 = arith.mulf %152, %128 : vector<2x24xf32>
    %162 = arith.addf %160, %161 : vector<2x24xf32>
    %c2_56 = arith.constant 2 : index
    %c0_57 = arith.constant 0 : index
    %c0_58 = arith.constant 0 : index
    %163 = vector.load %arg7[%c2_56, %c0_57, %c0_58] : memref<8x2x24xf32, #tpu.memory_space<vmem>>, vector<1x2x24xf32>
    %164 = vector.shape_cast %163 : vector<1x2x24xf32> to vector<2x24xf32>
    %165 = vector.shape_cast %162 : vector<2x24xf32> to vector<1x2x24xf32>
    tpu.vector_store %arg7[%c2_56, %c0_57, %c0_58], %165 {strides = array<i32>} : memref<8x2x24xf32, #tpu.memory_space<vmem>>, vector<1x2x24xf32>,
    %c3 = arith.constant 3 : index
    %c0_59 = arith.constant 0 : index
    %c0_60 = arith.constant 0 : index
    %166 = vector.load %arg6[%c3, %c0_59, %c0_60] : memref<8x2x72xf32, #tpu.memory_space<vmem>>, vector<1x2x72xf32>
    %167 = vector.shape_cast %166 : vector<1x2x72xf32> to vector<2x72xf32>
    %cst_61 = arith.constant dense<0.000000e+00> : vector<2x72xf32>
    %168 = tpu.matmul %162, %52, %cst_61 {dimension_numbers = #tpu.dot_dimension_numbers<[1], [0], [0], [1], [0, 0, 1, 1], [], []>} : vector<2x24xf32>, vector<24x72xf32>, vector<2x72xf32> -> vector<2x72xf32>
    %169 = vector.broadcast %53 : vector<1x72xf32> to vector<2x72xf32>
    %170 = arith.addf %168, %169 : vector<2x72xf32>
    %171 = vector.extract_strided_slice %167 {offsets = [0, 0], sizes = [2, 24], strides = [1, 1]} : vector<2x72xf32> to vector<2x24xf32>
    %172 = vector.extract_strided_slice %170 {offsets = [0, 0], sizes = [2, 24], strides = [1, 1]} : vector<2x72xf32> to vector<2x24xf32>
    %173 = arith.addf %171, %172 : vector<2x24xf32>
    %174 = arith.negf %173 : vector<2x24xf32>
    %175 = math.exp %174 : vector<2x24xf32>
    %cst_62 = arith.constant 1.000000e+00 : f32
    %176 = vector.broadcast %cst_62 : f32 to vector<2x24xf32>
    %177 = arith.addf %176, %175 : vector<2x24xf32>
    %178 = arith.divf %176, %177 : vector<2x24xf32>
    %179 = vector.extract_strided_slice %167 {offsets = [0, 24], sizes = [2, 24], strides = [1, 1]} : vector<2x72xf32> to vector<2x24xf32>
    %180 = vector.extract_strided_slice %170 {offsets = [0, 24], sizes = [2, 24], strides = [1, 1]} : vector<2x72xf32> to vector<2x24xf32>
    %181 = arith.addf %179, %180 : vector<2x24xf32>
    %182 = arith.negf %181 : vector<2x24xf32>
    %183 = math.exp %182 : vector<2x24xf32>
    %cst_63 = arith.constant 1.000000e+00 : f32
    %184 = vector.broadcast %cst_63 : f32 to vector<2x24xf32>
    %185 = arith.addf %184, %183 : vector<2x24xf32>
    %186 = arith.divf %184, %185 : vector<2x24xf32>
    %187 = vector.extract_strided_slice %167 {offsets = [0, 48], sizes = [2, 24], strides = [1, 1]} : vector<2x72xf32> to vector<2x24xf32>
    %188 = vector.extract_strided_slice %170 {offsets = [0, 48], sizes = [2, 24], strides = [1, 1]} : vector<2x72xf32> to vector<2x24xf32>
    %189 = arith.mulf %178, %188 : vector<2x24xf32>
    %190 = arith.addf %187, %189 : vector<2x24xf32>
    %191 = math.tanh %190 : vector<2x24xf32>
    %cst_64 = arith.constant 1.000000e+00 : f32
    %192 = vector.broadcast %cst_64 : f32 to vector<2x24xf32>
    %193 = arith.subf %192, %186 : vector<2x24xf32>
    %194 = arith.mulf %193, %191 : vector<2x24xf32>
    %195 = arith.mulf %186, %162 : vector<2x24xf32>
    %196 = arith.addf %194, %195 : vector<2x24xf32>
    %c3_65 = arith.constant 3 : index
    %c0_66 = arith.constant 0 : index
    %c0_67 = arith.constant 0 : index
    %197 = vector.load %arg7[%c3_65, %c0_66, %c0_67] : memref<8x2x24xf32, #tpu.memory_space<vmem>>, vector<1x2x24xf32>
    %198 = vector.shape_cast %197 : vector<1x2x24xf32> to vector<2x24xf32>
    %199 = vector.shape_cast %196 : vector<2x24xf32> to vector<1x2x24xf32>
    tpu.vector_store %arg7[%c3_65, %c0_66, %c0_67], %199 {strides = array<i32>} : memref<8x2x24xf32, #tpu.memory_space<vmem>>, vector<1x2x24xf32>,
    %c4 = arith.constant 4 : index
    %c0_68 = arith.constant 0 : index
    %c0_69 = arith.constant 0 : index
    %200 = vector.load %arg6[%c4, %c0_68, %c0_69] : memref<8x2x72xf32, #tpu.memory_space<vmem>>, vector<1x2x72xf32>
    %201 = vector.shape_cast %200 : vector<1x2x72xf32> to vector<2x72xf32>
    %cst_70 = arith.constant dense<0.000000e+00> : vector<2x72xf32>
    %202 = tpu.matmul %196, %52, %cst_70 {dimension_numbers = #tpu.dot_dimension_numbers<[1], [0], [0], [1], [0, 0, 1, 1], [], []>} : vector<2x24xf32>, vector<24x72xf32>, vector<2x72xf32> -> vector<2x72xf32>
    %203 = vector.broadcast %53 : vector<1x72xf32> to vector<2x72xf32>
    %204 = arith.addf %202, %203 : vector<2x72xf32>
    %205 = vector.extract_strided_slice %201 {offsets = [0, 0], sizes = [2, 24], strides = [1, 1]} : vector<2x72xf32> to vector<2x24xf32>
    %206 = vector.extract_strided_slice %204 {offsets = [0, 0], sizes = [2, 24], strides = [1, 1]} : vector<2x72xf32> to vector<2x24xf32>
    %207 = arith.addf %205, %206 : vector<2x24xf32>
    %208 = arith.negf %207 : vector<2x24xf32>
    %209 = math.exp %208 : vector<2x24xf32>
    %cst_71 = arith.constant 1.000000e+00 : f32
    %210 = vector.broadcast %cst_71 : f32 to vector<2x24xf32>
    %211 = arith.addf %210, %209 : vector<2x24xf32>
    %212 = arith.divf %210, %211 : vector<2x24xf32>
    %213 = vector.extract_strided_slice %201 {offsets = [0, 24], sizes = [2, 24], strides = [1, 1]} : vector<2x72xf32> to vector<2x24xf32>
    %214 = vector.extract_strided_slice %204 {offsets = [0, 24], sizes = [2, 24], strides = [1, 1]} : vector<2x72xf32> to vector<2x24xf32>
    %215 = arith.addf %213, %214 : vector<2x24xf32>
    %216 = arith.negf %215 : vector<2x24xf32>
    %217 = math.exp %216 : vector<2x24xf32>
    %cst_72 = arith.constant 1.000000e+00 : f32
    %218 = vector.broadcast %cst_72 : f32 to vector<2x24xf32>
    %219 = arith.addf %218, %217 : vector<2x24xf32>
    %220 = arith.divf %218, %219 : vector<2x24xf32>
    %221 = vector.extract_strided_slice %201 {offsets = [0, 48], sizes = [2, 24], strides = [1, 1]} : vector<2x72xf32> to vector<2x24xf32>
    %222 = vector.extract_strided_slice %204 {offsets = [0, 48], sizes = [2, 24], strides = [1, 1]} : vector<2x72xf32> to vector<2x24xf32>
    %223 = arith.mulf %212, %222 : vector<2x24xf32>
    %224 = arith.addf %221, %223 : vector<2x24xf32>
    %225 = math.tanh %224 : vector<2x24xf32>
    %cst_73 = arith.constant 1.000000e+00 : f32
    %226 = vector.broadcast %cst_73 : f32 to vector<2x24xf32>
    %227 = arith.subf %226, %220 : vector<2x24xf32>
    %228 = arith.mulf %227, %225 : vector<2x24xf32>
    %229 = arith.mulf %220, %196 : vector<2x24xf32>
    %230 = arith.addf %228, %229 : vector<2x24xf32>
    %c4_74 = arith.constant 4 : index
    %c0_75 = arith.constant 0 : index
    %c0_76 = arith.constant 0 : index
    %231 = vector.load %arg7[%c4_74, %c0_75, %c0_76] : memref<8x2x24xf32, #tpu.memory_space<vmem>>, vector<1x2x24xf32>
    %232 = vector.shape_cast %231 : vector<1x2x24xf32> to vector<2x24xf32>
    %233 = vector.shape_cast %230 : vector<2x24xf32> to vector<1x2x24xf32>
    tpu.vector_store %arg7[%c4_74, %c0_75, %c0_76], %233 {strides = array<i32>} : memref<8x2x24xf32, #tpu.memory_space<vmem>>, vector<1x2x24xf32>,
    %c5 = arith.constant 5 : index
    %c0_77 = arith.constant 0 : index
    %c0_78 = arith.constant 0 : index
    %234 = vector.load %arg6[%c5, %c0_77, %c0_78] : memref<8x2x72xf32, #tpu.memory_space<vmem>>, vector<1x2x72xf32>
    %235 = vector.shape_cast %234 : vector<1x2x72xf32> to vector<2x72xf32>
    %cst_79 = arith.constant dense<0.000000e+00> : vector<2x72xf32>
    %236 = tpu.matmul %230, %52, %cst_79 {dimension_numbers = #tpu.dot_dimension_numbers<[1], [0], [0], [1], [0, 0, 1, 1], [], []>} : vector<2x24xf32>, vector<24x72xf32>, vector<2x72xf32> -> vector<2x72xf32>
    %237 = vector.broadcast %53 : vector<1x72xf32> to vector<2x72xf32>
    %238 = arith.addf %236, %237 : vector<2x72xf32>
    %239 = vector.extract_strided_slice %235 {offsets = [0, 0], sizes = [2, 24], strides = [1, 1]} : vector<2x72xf32> to vector<2x24xf32>
    %240 = vector.extract_strided_slice %238 {offsets = [0, 0], sizes = [2, 24], strides = [1, 1]} : vector<2x72xf32> to vector<2x24xf32>
    %241 = arith.addf %239, %240 : vector<2x24xf32>
    %242 = arith.negf %241 : vector<2x24xf32>
    %243 = math.exp %242 : vector<2x24xf32>
    %cst_80 = arith.constant 1.000000e+00 : f32
    %244 = vector.broadcast %cst_80 : f32 to vector<2x24xf32>
    %245 = arith.addf %244, %243 : vector<2x24xf32>
    %246 = arith.divf %244, %245 : vector<2x24xf32>
    %247 = vector.extract_strided_slice %235 {offsets = [0, 24], sizes = [2, 24], strides = [1, 1]} : vector<2x72xf32> to vector<2x24xf32>
    %248 = vector.extract_strided_slice %238 {offsets = [0, 24], sizes = [2, 24], strides = [1, 1]} : vector<2x72xf32> to vector<2x24xf32>
    %249 = arith.addf %247, %248 : vector<2x24xf32>
    %250 = arith.negf %249 : vector<2x24xf32>
    %251 = math.exp %250 : vector<2x24xf32>
    %cst_81 = arith.constant 1.000000e+00 : f32
    %252 = vector.broadcast %cst_81 : f32 to vector<2x24xf32>
    %253 = arith.addf %252, %251 : vector<2x24xf32>
    %254 = arith.divf %252, %253 : vector<2x24xf32>
    %255 = vector.extract_strided_slice %235 {offsets = [0, 48], sizes = [2, 24], strides = [1, 1]} : vector<2x72xf32> to vector<2x24xf32>
    %256 = vector.extract_strided_slice %238 {offsets = [0, 48], sizes = [2, 24], strides = [1, 1]} : vector<2x72xf32> to vector<2x24xf32>
    %257 = arith.mulf %246, %256 : vector<2x24xf32>
    %258 = arith.addf %255, %257 : vector<2x24xf32>
    %259 = math.tanh %258 : vector<2x24xf32>
    %cst_82 = arith.constant 1.000000e+00 : f32
    %260 = vector.broadcast %cst_82 : f32 to vector<2x24xf32>
    %261 = arith.subf %260, %254 : vector<2x24xf32>
    %262 = arith.mulf %261, %259 : vector<2x24xf32>
    %263 = arith.mulf %254, %230 : vector<2x24xf32>
    %264 = arith.addf %262, %263 : vector<2x24xf32>
    %c5_83 = arith.constant 5 : index
    %c0_84 = arith.constant 0 : index
    %c0_85 = arith.constant 0 : index
    %265 = vector.load %arg7[%c5_83, %c0_84, %c0_85] : memref<8x2x24xf32, #tpu.memory_space<vmem>>, vector<1x2x24xf32>
    %266 = vector.shape_cast %265 : vector<1x2x24xf32> to vector<2x24xf32>
    %267 = vector.shape_cast %264 : vector<2x24xf32> to vector<1x2x24xf32>
    tpu.vector_store %arg7[%c5_83, %c0_84, %c0_85], %267 {strides = array<i32>} : memref<8x2x24xf32, #tpu.memory_space<vmem>>, vector<1x2x24xf32>,
    %c6 = arith.constant 6 : index
    %c0_86 = arith.constant 0 : index
    %c0_87 = arith.constant 0 : index
    %268 = vector.load %arg6[%c6, %c0_86, %c0_87] : memref<8x2x72xf32, #tpu.memory_space<vmem>>, vector<1x2x72xf32>
    %269 = vector.shape_cast %268 : vector<1x2x72xf32> to vector<2x72xf32>
    %cst_88 = arith.constant dense<0.000000e+00> : vector<2x72xf32>
    %270 = tpu.matmul %264, %52, %cst_88 {dimension_numbers = #tpu.dot_dimension_numbers<[1], [0], [0], [1], [0, 0, 1, 1], [], []>} : vector<2x24xf32>, vector<24x72xf32>, vector<2x72xf32> -> vector<2x72xf32>
    %271 = vector.broadcast %53 : vector<1x72xf32> to vector<2x72xf32>
    %272 = arith.addf %270, %271 : vector<2x72xf32>
    %273 = vector.extract_strided_slice %269 {offsets = [0, 0], sizes = [2, 24], strides = [1, 1]} : vector<2x72xf32> to vector<2x24xf32>
    %274 = vector.extract_strided_slice %272 {offsets = [0, 0], sizes = [2, 24], strides = [1, 1]} : vector<2x72xf32> to vector<2x24xf32>
    %275 = arith.addf %273, %274 : vector<2x24xf32>
    %276 = arith.negf %275 : vector<2x24xf32>
    %277 = math.exp %276 : vector<2x24xf32>
    %cst_89 = arith.constant 1.000000e+00 : f32
    %278 = vector.broadcast %cst_89 : f32 to vector<2x24xf32>
    %279 = arith.addf %278, %277 : vector<2x24xf32>
    %280 = arith.divf %278, %279 : vector<2x24xf32>
    %281 = vector.extract_strided_slice %269 {offsets = [0, 24], sizes = [2, 24], strides = [1, 1]} : vector<2x72xf32> to vector<2x24xf32>
    %282 = vector.extract_strided_slice %272 {offsets = [0, 24], sizes = [2, 24], strides = [1, 1]} : vector<2x72xf32> to vector<2x24xf32>
    %283 = arith.addf %281, %282 : vector<2x24xf32>
    %284 = arith.negf %283 : vector<2x24xf32>
    %285 = math.exp %284 : vector<2x24xf32>
    %cst_90 = arith.constant 1.000000e+00 : f32
    %286 = vector.broadcast %cst_90 : f32 to vector<2x24xf32>
    %287 = arith.addf %286, %285 : vector<2x24xf32>
    %288 = arith.divf %286, %287 : vector<2x24xf32>
    %289 = vector.extract_strided_slice %269 {offsets = [0, 48], sizes = [2, 24], strides = [1, 1]} : vector<2x72xf32> to vector<2x24xf32>
    %290 = vector.extract_strided_slice %272 {offsets = [0, 48], sizes = [2, 24], strides = [1, 1]} : vector<2x72xf32> to vector<2x24xf32>
    %291 = arith.mulf %280, %290 : vector<2x24xf32>
    %292 = arith.addf %289, %291 : vector<2x24xf32>
    %293 = math.tanh %292 : vector<2x24xf32>
    %cst_91 = arith.constant 1.000000e+00 : f32
    %294 = vector.broadcast %cst_91 : f32 to vector<2x24xf32>
    %295 = arith.subf %294, %288 : vector<2x24xf32>
    %296 = arith.mulf %295, %293 : vector<2x24xf32>
    %297 = arith.mulf %288, %264 : vector<2x24xf32>
    %298 = arith.addf %296, %297 : vector<2x24xf32>
    %c6_92 = arith.constant 6 : index
    %c0_93 = arith.constant 0 : index
    %c0_94 = arith.constant 0 : index
    %299 = vector.load %arg7[%c6_92, %c0_93, %c0_94] : memref<8x2x24xf32, #tpu.memory_space<vmem>>, vector<1x2x24xf32>
    %300 = vector.shape_cast %299 : vector<1x2x24xf32> to vector<2x24xf32>
    %301 = vector.shape_cast %298 : vector<2x24xf32> to vector<1x2x24xf32>
    tpu.vector_store %arg7[%c6_92, %c0_93, %c0_94], %301 {strides = array<i32>} : memref<8x2x24xf32, #tpu.memory_space<vmem>>, vector<1x2x24xf32>,
    %c7 = arith.constant 7 : index
    %c0_95 = arith.constant 0 : index
    %c0_96 = arith.constant 0 : index
    %302 = vector.load %arg6[%c7, %c0_95, %c0_96] : memref<8x2x72xf32, #tpu.memory_space<vmem>>, vector<1x2x72xf32>
    %303 = vector.shape_cast %302 : vector<1x2x72xf32> to vector<2x72xf32>
    %cst_97 = arith.constant dense<0.000000e+00> : vector<2x72xf32>
    %304 = tpu.matmul %298, %52, %cst_97 {dimension_numbers = #tpu.dot_dimension_numbers<[1], [0], [0], [1], [0, 0, 1, 1], [], []>} : vector<2x24xf32>, vector<24x72xf32>, vector<2x72xf32> -> vector<2x72xf32>
    %305 = vector.broadcast %53 : vector<1x72xf32> to vector<2x72xf32>
    %306 = arith.addf %304, %305 : vector<2x72xf32>
    %307 = vector.extract_strided_slice %303 {offsets = [0, 0], sizes = [2, 24], strides = [1, 1]} : vector<2x72xf32> to vector<2x24xf32>
    %308 = vector.extract_strided_slice %306 {offsets = [0, 0], sizes = [2, 24], strides = [1, 1]} : vector<2x72xf32> to vector<2x24xf32>
    %309 = arith.addf %307, %308 : vector<2x24xf32>
    %310 = arith.negf %309 : vector<2x24xf32>
    %311 = math.exp %310 : vector<2x24xf32>
    %cst_98 = arith.constant 1.000000e+00 : f32
    %312 = vector.broadcast %cst_98 : f32 to vector<2x24xf32>
    %313 = arith.addf %312, %311 : vector<2x24xf32>
    %314 = arith.divf %312, %313 : vector<2x24xf32>
    %315 = vector.extract_strided_slice %303 {offsets = [0, 24], sizes = [2, 24], strides = [1, 1]} : vector<2x72xf32> to vector<2x24xf32>
    %316 = vector.extract_strided_slice %306 {offsets = [0, 24], sizes = [2, 24], strides = [1, 1]} : vector<2x72xf32> to vector<2x24xf32>
    %317 = arith.addf %315, %316 : vector<2x24xf32>
    %318 = arith.negf %317 : vector<2x24xf32>
    %319 = math.exp %318 : vector<2x24xf32>
    %cst_99 = arith.constant 1.000000e+00 : f32
    %320 = vector.broadcast %cst_99 : f32 to vector<2x24xf32>
    %321 = arith.addf %320, %319 : vector<2x24xf32>
    %322 = arith.divf %320, %321 : vector<2x24xf32>
    %323 = vector.extract_strided_slice %303 {offsets = [0, 48], sizes = [2, 24], strides = [1, 1]} : vector<2x72xf32> to vector<2x24xf32>
    %324 = vector.extract_strided_slice %306 {offsets = [0, 48], sizes = [2, 24], strides = [1, 1]} : vector<2x72xf32> to vector<2x24xf32>
    %325 = arith.mulf %314, %324 : vector<2x24xf32>
    %326 = arith.addf %323, %325 : vector<2x24xf32>
    %327 = math.tanh %326 : vector<2x24xf32>
    %cst_100 = arith.constant 1.000000e+00 : f32
    %328 = vector.broadcast %cst_100 : f32 to vector<2x24xf32>
    %329 = arith.subf %328, %322 : vector<2x24xf32>
    %330 = arith.mulf %329, %327 : vector<2x24xf32>
    %331 = arith.mulf %322, %298 : vector<2x24xf32>
    %332 = arith.addf %330, %331 : vector<2x24xf32>
    %c7_101 = arith.constant 7 : index
    %c0_102 = arith.constant 0 : index
    %c0_103 = arith.constant 0 : index
    %333 = vector.load %arg7[%c7_101, %c0_102, %c0_103] : memref<8x2x24xf32, #tpu.memory_space<vmem>>, vector<1x2x24xf32>
    %334 = vector.shape_cast %333 : vector<1x2x24xf32> to vector<2x24xf32>
    %335 = vector.shape_cast %332 : vector<2x24xf32> to vector<1x2x24xf32>
    tpu.vector_store %arg7[%c7_101, %c0_102, %c0_103], %335 {strides = array<i32>} : memref<8x2x24xf32, #tpu.memory_space<vmem>>, vector<1x2x24xf32>,
    %c0_104 = arith.constant 0 : index
    %c0_105 = arith.constant 0 : index
    %c0_106 = arith.constant 0 : index
    %336 = vector.load %arg7[%c0_104, %c0_105, %c0_106] : memref<8x2x24xf32, #tpu.memory_space<vmem>>, vector<8x2x24xf32>
    %337 = vector.shape_cast %336 : vector<8x2x24xf32> to vector<16x24xf32>
    %c184 = arith.constant 184 : index
    %c0_107 = arith.constant 0 : index
    %338 = vector.load %arg3[%c184, %c0_107] : memref<320x128xf32, #tpu.memory_space<vmem>>, vector<24x72xf32>
    %c216 = arith.constant 216 : index
    %c0_108 = arith.constant 0 : index
    %339 = vector.load %arg3[%c216, %c0_108] : memref<320x128xf32, #tpu.memory_space<vmem>>, vector<1x72xf32>
    %340 = arith.truncf %337 : vector<16x24xf32> to vector<16x24xbf16>
    %c160 = arith.constant 160 : index
    %c0_109 = arith.constant 0 : index
    %341 = vector.load %arg3[%c160, %c0_109] : memref<320x128xf32, #tpu.memory_space<vmem>>, vector<24x72xf32>
    %342 = arith.truncf %341 : vector<24x72xf32> to vector<24x72xbf16>
    %cst_110 = arith.constant dense<0.000000e+00> : vector<16x72xf32>
    %343 = tpu.matmul %340, %342, %cst_110 {dimension_numbers = #tpu.dot_dimension_numbers<[1], [0], [0], [1], [0, 0, 1, 1], [], []>} : vector<16x24xbf16>, vector<24x72xbf16>, vector<16x72xf32> -> vector<16x72xf32>
    %c208 = arith.constant 208 : index
    %c0_111 = arith.constant 0 : index
    %344 = vector.load %arg3[%c208, %c0_111] : memref<320x128xf32, #tpu.memory_space<vmem>>, vector<1x72xf32>
    %345 = vector.broadcast %344 : vector<1x72xf32> to vector<16x72xf32>
    %346 = arith.addf %343, %345 : vector<16x72xf32>
    %347 = vector.shape_cast %346 : vector<16x72xf32> to vector<8x2x72xf32>
    %c0_112 = arith.constant 0 : index
    %c0_113 = arith.constant 0 : index
    %c0_114 = arith.constant 0 : index
    %348 = vector.load %arg6[%c0_112, %c0_113, %c0_114] : memref<8x2x72xf32, #tpu.memory_space<vmem>>, vector<8x2x72xf32>
    tpu.vector_store %arg6[%c0_112, %c0_113, %c0_114], %347 {strides = array<i32>} : memref<8x2x72xf32, #tpu.memory_space<vmem>>, vector<8x2x72xf32>,
    %cst_115 = arith.constant 0.000000e+00 : f32
    %349 = vector.broadcast %cst_115 : f32 to vector<2x24xf32>
    %c0_116 = arith.constant 0 : index
    %c0_117 = arith.constant 0 : index
    %c0_118 = arith.constant 0 : index
    %350 = vector.load %arg6[%c0_116, %c0_117, %c0_118] : memref<8x2x72xf32, #tpu.memory_space<vmem>>, vector<1x2x72xf32>
    %351 = vector.shape_cast %350 : vector<1x2x72xf32> to vector<2x72xf32>
    %cst_119 = arith.constant dense<0.000000e+00> : vector<2x72xf32>
    %352 = tpu.matmul %349, %338, %cst_119 {dimension_numbers = #tpu.dot_dimension_numbers<[1], [0], [0], [1], [0, 0, 1, 1], [], []>} : vector<2x24xf32>, vector<24x72xf32>, vector<2x72xf32> -> vector<2x72xf32>
    %353 = vector.broadcast %339 : vector<1x72xf32> to vector<2x72xf32>
    %354 = arith.addf %352, %353 : vector<2x72xf32>
    %355 = vector.extract_strided_slice %351 {offsets = [0, 0], sizes = [2, 24], strides = [1, 1]} : vector<2x72xf32> to vector<2x24xf32>
    %356 = vector.extract_strided_slice %354 {offsets = [0, 0], sizes = [2, 24], strides = [1, 1]} : vector<2x72xf32> to vector<2x24xf32>
    %357 = arith.addf %355, %356 : vector<2x24xf32>
    %358 = arith.negf %357 : vector<2x24xf32>
    %359 = math.exp %358 : vector<2x24xf32>
    %cst_120 = arith.constant 1.000000e+00 : f32
    %360 = vector.broadcast %cst_120 : f32 to vector<2x24xf32>
    %361 = arith.addf %360, %359 : vector<2x24xf32>
    %362 = arith.divf %360, %361 : vector<2x24xf32>
    %363 = vector.extract_strided_slice %351 {offsets = [0, 24], sizes = [2, 24], strides = [1, 1]} : vector<2x72xf32> to vector<2x24xf32>
    %364 = vector.extract_strided_slice %354 {offsets = [0, 24], sizes = [2, 24], strides = [1, 1]} : vector<2x72xf32> to vector<2x24xf32>
    %365 = arith.addf %363, %364 : vector<2x24xf32>
    %366 = arith.negf %365 : vector<2x24xf32>
    %367 = math.exp %366 : vector<2x24xf32>
    %cst_121 = arith.constant 1.000000e+00 : f32
    %368 = vector.broadcast %cst_121 : f32 to vector<2x24xf32>
    %369 = arith.addf %368, %367 : vector<2x24xf32>
    %370 = arith.divf %368, %369 : vector<2x24xf32>
    %371 = vector.extract_strided_slice %351 {offsets = [0, 48], sizes = [2, 24], strides = [1, 1]} : vector<2x72xf32> to vector<2x24xf32>
    %372 = vector.extract_strided_slice %354 {offsets = [0, 48], sizes = [2, 24], strides = [1, 1]} : vector<2x72xf32> to vector<2x24xf32>
    %373 = arith.mulf %362, %372 : vector<2x24xf32>
    %374 = arith.addf %371, %373 : vector<2x24xf32>
    %375 = math.tanh %374 : vector<2x24xf32>
    %cst_122 = arith.constant 1.000000e+00 : f32
    %376 = vector.broadcast %cst_122 : f32 to vector<2x24xf32>
    %377 = arith.subf %376, %370 : vector<2x24xf32>
    %378 = arith.mulf %377, %375 : vector<2x24xf32>
    %379 = arith.mulf %370, %349 : vector<2x24xf32>
    %380 = arith.addf %378, %379 : vector<2x24xf32>
    %c0_123 = arith.constant 0 : index
    %c0_124 = arith.constant 0 : index
    %c0_125 = arith.constant 0 : index
    %381 = vector.load %arg7[%c0_123, %c0_124, %c0_125] : memref<8x2x24xf32, #tpu.memory_space<vmem>>, vector<1x2x24xf32>
    %382 = vector.shape_cast %381 : vector<1x2x24xf32> to vector<2x24xf32>
    %383 = vector.shape_cast %380 : vector<2x24xf32> to vector<1x2x24xf32>
    tpu.vector_store %arg7[%c0_123, %c0_124, %c0_125], %383 {strides = array<i32>} : memref<8x2x24xf32, #tpu.memory_space<vmem>>, vector<1x2x24xf32>,
    %c1_126 = arith.constant 1 : index
    %c0_127 = arith.constant 0 : index
    %c0_128 = arith.constant 0 : index
    %384 = vector.load %arg6[%c1_126, %c0_127, %c0_128] : memref<8x2x72xf32, #tpu.memory_space<vmem>>, vector<1x2x72xf32>
    %385 = vector.shape_cast %384 : vector<1x2x72xf32> to vector<2x72xf32>
    %cst_129 = arith.constant dense<0.000000e+00> : vector<2x72xf32>
    %386 = tpu.matmul %380, %338, %cst_129 {dimension_numbers = #tpu.dot_dimension_numbers<[1], [0], [0], [1], [0, 0, 1, 1], [], []>} : vector<2x24xf32>, vector<24x72xf32>, vector<2x72xf32> -> vector<2x72xf32>
    %387 = vector.broadcast %339 : vector<1x72xf32> to vector<2x72xf32>
    %388 = arith.addf %386, %387 : vector<2x72xf32>
    %389 = vector.extract_strided_slice %385 {offsets = [0, 0], sizes = [2, 24], strides = [1, 1]} : vector<2x72xf32> to vector<2x24xf32>
    %390 = vector.extract_strided_slice %388 {offsets = [0, 0], sizes = [2, 24], strides = [1, 1]} : vector<2x72xf32> to vector<2x24xf32>
    %391 = arith.addf %389, %390 : vector<2x24xf32>
    %392 = arith.negf %391 : vector<2x24xf32>
    %393 = math.exp %392 : vector<2x24xf32>
    %cst_130 = arith.constant 1.000000e+00 : f32
    %394 = vector.broadcast %cst_130 : f32 to vector<2x24xf32>
    %395 = arith.addf %394, %393 : vector<2x24xf32>
    %396 = arith.divf %394, %395 : vector<2x24xf32>
    %397 = vector.extract_strided_slice %385 {offsets = [0, 24], sizes = [2, 24], strides = [1, 1]} : vector<2x72xf32> to vector<2x24xf32>
    %398 = vector.extract_strided_slice %388 {offsets = [0, 24], sizes = [2, 24], strides = [1, 1]} : vector<2x72xf32> to vector<2x24xf32>
    %399 = arith.addf %397, %398 : vector<2x24xf32>
    %400 = arith.negf %399 : vector<2x24xf32>
    %401 = math.exp %400 : vector<2x24xf32>
    %cst_131 = arith.constant 1.000000e+00 : f32
    %402 = vector.broadcast %cst_131 : f32 to vector<2x24xf32>
    %403 = arith.addf %402, %401 : vector<2x24xf32>
    %404 = arith.divf %402, %403 : vector<2x24xf32>
    %405 = vector.extract_strided_slice %385 {offsets = [0, 48], sizes = [2, 24], strides = [1, 1]} : vector<2x72xf32> to vector<2x24xf32>
    %406 = vector.extract_strided_slice %388 {offsets = [0, 48], sizes = [2, 24], strides = [1, 1]} : vector<2x72xf32> to vector<2x24xf32>
    %407 = arith.mulf %396, %406 : vector<2x24xf32>
    %408 = arith.addf %405, %407 : vector<2x24xf32>
    %409 = math.tanh %408 : vector<2x24xf32>
    %cst_132 = arith.constant 1.000000e+00 : f32
    %410 = vector.broadcast %cst_132 : f32 to vector<2x24xf32>
    %411 = arith.subf %410, %404 : vector<2x24xf32>
    %412 = arith.mulf %411, %409 : vector<2x24xf32>
    %413 = arith.mulf %404, %380 : vector<2x24xf32>
    %414 = arith.addf %412, %413 : vector<2x24xf32>
    %c1_133 = arith.constant 1 : index
    %c0_134 = arith.constant 0 : index
    %c0_135 = arith.constant 0 : index
    %415 = vector.load %arg7[%c1_133, %c0_134, %c0_135] : memref<8x2x24xf32, #tpu.memory_space<vmem>>, vector<1x2x24xf32>
    %416 = vector.shape_cast %415 : vector<1x2x24xf32> to vector<2x24xf32>
    %417 = vector.shape_cast %414 : vector<2x24xf32> to vector<1x2x24xf32>
    tpu.vector_store %arg7[%c1_133, %c0_134, %c0_135], %417 {strides = array<i32>} : memref<8x2x24xf32, #tpu.memory_space<vmem>>, vector<1x2x24xf32>,
    %c2_136 = arith.constant 2 : index
    %c0_137 = arith.constant 0 : index
    %c0_138 = arith.constant 0 : index
    %418 = vector.load %arg6[%c2_136, %c0_137, %c0_138] : memref<8x2x72xf32, #tpu.memory_space<vmem>>, vector<1x2x72xf32>
    %419 = vector.shape_cast %418 : vector<1x2x72xf32> to vector<2x72xf32>
    %cst_139 = arith.constant dense<0.000000e+00> : vector<2x72xf32>
    %420 = tpu.matmul %414, %338, %cst_139 {dimension_numbers = #tpu.dot_dimension_numbers<[1], [0], [0], [1], [0, 0, 1, 1], [], []>} : vector<2x24xf32>, vector<24x72xf32>, vector<2x72xf32> -> vector<2x72xf32>
    %421 = vector.broadcast %339 : vector<1x72xf32> to vector<2x72xf32>
    %422 = arith.addf %420, %421 : vector<2x72xf32>
    %423 = vector.extract_strided_slice %419 {offsets = [0, 0], sizes = [2, 24], strides = [1, 1]} : vector<2x72xf32> to vector<2x24xf32>
    %424 = vector.extract_strided_slice %422 {offsets = [0, 0], sizes = [2, 24], strides = [1, 1]} : vector<2x72xf32> to vector<2x24xf32>
    %425 = arith.addf %423, %424 : vector<2x24xf32>
    %426 = arith.negf %425 : vector<2x24xf32>
    %427 = math.exp %426 : vector<2x24xf32>
    %cst_140 = arith.constant 1.000000e+00 : f32
    %428 = vector.broadcast %cst_140 : f32 to vector<2x24xf32>
    %429 = arith.addf %428, %427 : vector<2x24xf32>
    %430 = arith.divf %428, %429 : vector<2x24xf32>
    %431 = vector.extract_strided_slice %419 {offsets = [0, 24], sizes = [2, 24], strides = [1, 1]} : vector<2x72xf32> to vector<2x24xf32>
    %432 = vector.extract_strided_slice %422 {offsets = [0, 24], sizes = [2, 24], strides = [1, 1]} : vector<2x72xf32> to vector<2x24xf32>
    %433 = arith.addf %431, %432 : vector<2x24xf32>
    %434 = arith.negf %433 : vector<2x24xf32>
    %435 = math.exp %434 : vector<2x24xf32>
    %cst_141 = arith.constant 1.000000e+00 : f32
    %436 = vector.broadcast %cst_141 : f32 to vector<2x24xf32>
    %437 = arith.addf %436, %435 : vector<2x24xf32>
    %438 = arith.divf %436, %437 : vector<2x24xf32>
    %439 = vector.extract_strided_slice %419 {offsets = [0, 48], sizes = [2, 24], strides = [1, 1]} : vector<2x72xf32> to vector<2x24xf32>
    %440 = vector.extract_strided_slice %422 {offsets = [0, 48], sizes = [2, 24], strides = [1, 1]} : vector<2x72xf32> to vector<2x24xf32>
    %441 = arith.mulf %430, %440 : vector<2x24xf32>
    %442 = arith.addf %439, %441 : vector<2x24xf32>
    %443 = math.tanh %442 : vector<2x24xf32>
    %cst_142 = arith.constant 1.000000e+00 : f32
    %444 = vector.broadcast %cst_142 : f32 to vector<2x24xf32>
    %445 = arith.subf %444, %438 : vector<2x24xf32>
    %446 = arith.mulf %445, %443 : vector<2x24xf32>
    %447 = arith.mulf %438, %414 : vector<2x24xf32>
    %448 = arith.addf %446, %447 : vector<2x24xf32>
    %c2_143 = arith.constant 2 : index
    %c0_144 = arith.constant 0 : index
    %c0_145 = arith.constant 0 : index
    %449 = vector.load %arg7[%c2_143, %c0_144, %c0_145] : memref<8x2x24xf32, #tpu.memory_space<vmem>>, vector<1x2x24xf32>
    %450 = vector.shape_cast %449 : vector<1x2x24xf32> to vector<2x24xf32>
    %451 = vector.shape_cast %448 : vector<2x24xf32> to vector<1x2x24xf32>
    tpu.vector_store %arg7[%c2_143, %c0_144, %c0_145], %451 {strides = array<i32>} : memref<8x2x24xf32, #tpu.memory_space<vmem>>, vector<1x2x24xf32>,
    %c3_146 = arith.constant 3 : index
    %c0_147 = arith.constant 0 : index
    %c0_148 = arith.constant 0 : index
    %452 = vector.load %arg6[%c3_146, %c0_147, %c0_148] : memref<8x2x72xf32, #tpu.memory_space<vmem>>, vector<1x2x72xf32>
    %453 = vector.shape_cast %452 : vector<1x2x72xf32> to vector<2x72xf32>
    %cst_149 = arith.constant dense<0.000000e+00> : vector<2x72xf32>
    %454 = tpu.matmul %448, %338, %cst_149 {dimension_numbers = #tpu.dot_dimension_numbers<[1], [0], [0], [1], [0, 0, 1, 1], [], []>} : vector<2x24xf32>, vector<24x72xf32>, vector<2x72xf32> -> vector<2x72xf32>
    %455 = vector.broadcast %339 : vector<1x72xf32> to vector<2x72xf32>
    %456 = arith.addf %454, %455 : vector<2x72xf32>
    %457 = vector.extract_strided_slice %453 {offsets = [0, 0], sizes = [2, 24], strides = [1, 1]} : vector<2x72xf32> to vector<2x24xf32>
    %458 = vector.extract_strided_slice %456 {offsets = [0, 0], sizes = [2, 24], strides = [1, 1]} : vector<2x72xf32> to vector<2x24xf32>
    %459 = arith.addf %457, %458 : vector<2x24xf32>
    %460 = arith.negf %459 : vector<2x24xf32>
    %461 = math.exp %460 : vector<2x24xf32>
    %cst_150 = arith.constant 1.000000e+00 : f32
    %462 = vector.broadcast %cst_150 : f32 to vector<2x24xf32>
    %463 = arith.addf %462, %461 : vector<2x24xf32>
    %464 = arith.divf %462, %463 : vector<2x24xf32>
    %465 = vector.extract_strided_slice %453 {offsets = [0, 24], sizes = [2, 24], strides = [1, 1]} : vector<2x72xf32> to vector<2x24xf32>
    %466 = vector.extract_strided_slice %456 {offsets = [0, 24], sizes = [2, 24], strides = [1, 1]} : vector<2x72xf32> to vector<2x24xf32>
    %467 = arith.addf %465, %466 : vector<2x24xf32>
    %468 = arith.negf %467 : vector<2x24xf32>
    %469 = math.exp %468 : vector<2x24xf32>
    %cst_151 = arith.constant 1.000000e+00 : f32
    %470 = vector.broadcast %cst_151 : f32 to vector<2x24xf32>
    %471 = arith.addf %470, %469 : vector<2x24xf32>
    %472 = arith.divf %470, %471 : vector<2x24xf32>
    %473 = vector.extract_strided_slice %453 {offsets = [0, 48], sizes = [2, 24], strides = [1, 1]} : vector<2x72xf32> to vector<2x24xf32>
    %474 = vector.extract_strided_slice %456 {offsets = [0, 48], sizes = [2, 24], strides = [1, 1]} : vector<2x72xf32> to vector<2x24xf32>
    %475 = arith.mulf %464, %474 : vector<2x24xf32>
    %476 = arith.addf %473, %475 : vector<2x24xf32>
    %477 = math.tanh %476 : vector<2x24xf32>
    %cst_152 = arith.constant 1.000000e+00 : f32
    %478 = vector.broadcast %cst_152 : f32 to vector<2x24xf32>
    %479 = arith.subf %478, %472 : vector<2x24xf32>
    %480 = arith.mulf %479, %477 : vector<2x24xf32>
    %481 = arith.mulf %472, %448 : vector<2x24xf32>
    %482 = arith.addf %480, %481 : vector<2x24xf32>
    %c3_153 = arith.constant 3 : index
    %c0_154 = arith.constant 0 : index
    %c0_155 = arith.constant 0 : index
    %483 = vector.load %arg7[%c3_153, %c0_154, %c0_155] : memref<8x2x24xf32, #tpu.memory_space<vmem>>, vector<1x2x24xf32>
    %484 = vector.shape_cast %483 : vector<1x2x24xf32> to vector<2x24xf32>
    %485 = vector.shape_cast %482 : vector<2x24xf32> to vector<1x2x24xf32>
    tpu.vector_store %arg7[%c3_153, %c0_154, %c0_155], %485 {strides = array<i32>} : memref<8x2x24xf32, #tpu.memory_space<vmem>>, vector<1x2x24xf32>,
    %c4_156 = arith.constant 4 : index
    %c0_157 = arith.constant 0 : index
    %c0_158 = arith.constant 0 : index
    %486 = vector.load %arg6[%c4_156, %c0_157, %c0_158] : memref<8x2x72xf32, #tpu.memory_space<vmem>>, vector<1x2x72xf32>
    %487 = vector.shape_cast %486 : vector<1x2x72xf32> to vector<2x72xf32>
    %cst_159 = arith.constant dense<0.000000e+00> : vector<2x72xf32>
    %488 = tpu.matmul %482, %338, %cst_159 {dimension_numbers = #tpu.dot_dimension_numbers<[1], [0], [0], [1], [0, 0, 1, 1], [], []>} : vector<2x24xf32>, vector<24x72xf32>, vector<2x72xf32> -> vector<2x72xf32>
    %489 = vector.broadcast %339 : vector<1x72xf32> to vector<2x72xf32>
    %490 = arith.addf %488, %489 : vector<2x72xf32>
    %491 = vector.extract_strided_slice %487 {offsets = [0, 0], sizes = [2, 24], strides = [1, 1]} : vector<2x72xf32> to vector<2x24xf32>
    %492 = vector.extract_strided_slice %490 {offsets = [0, 0], sizes = [2, 24], strides = [1, 1]} : vector<2x72xf32> to vector<2x24xf32>
    %493 = arith.addf %491, %492 : vector<2x24xf32>
    %494 = arith.negf %493 : vector<2x24xf32>
    %495 = math.exp %494 : vector<2x24xf32>
    %cst_160 = arith.constant 1.000000e+00 : f32
    %496 = vector.broadcast %cst_160 : f32 to vector<2x24xf32>
    %497 = arith.addf %496, %495 : vector<2x24xf32>
    %498 = arith.divf %496, %497 : vector<2x24xf32>
    %499 = vector.extract_strided_slice %487 {offsets = [0, 24], sizes = [2, 24], strides = [1, 1]} : vector<2x72xf32> to vector<2x24xf32>
    %500 = vector.extract_strided_slice %490 {offsets = [0, 24], sizes = [2, 24], strides = [1, 1]} : vector<2x72xf32> to vector<2x24xf32>
    %501 = arith.addf %499, %500 : vector<2x24xf32>
    %502 = arith.negf %501 : vector<2x24xf32>
    %503 = math.exp %502 : vector<2x24xf32>
    %cst_161 = arith.constant 1.000000e+00 : f32
    %504 = vector.broadcast %cst_161 : f32 to vector<2x24xf32>
    %505 = arith.addf %504, %503 : vector<2x24xf32>
    %506 = arith.divf %504, %505 : vector<2x24xf32>
    %507 = vector.extract_strided_slice %487 {offsets = [0, 48], sizes = [2, 24], strides = [1, 1]} : vector<2x72xf32> to vector<2x24xf32>
    %508 = vector.extract_strided_slice %490 {offsets = [0, 48], sizes = [2, 24], strides = [1, 1]} : vector<2x72xf32> to vector<2x24xf32>
    %509 = arith.mulf %498, %508 : vector<2x24xf32>
    %510 = arith.addf %507, %509 : vector<2x24xf32>
    %511 = math.tanh %510 : vector<2x24xf32>
    %cst_162 = arith.constant 1.000000e+00 : f32
    %512 = vector.broadcast %cst_162 : f32 to vector<2x24xf32>
    %513 = arith.subf %512, %506 : vector<2x24xf32>
    %514 = arith.mulf %513, %511 : vector<2x24xf32>
    %515 = arith.mulf %506, %482 : vector<2x24xf32>
    %516 = arith.addf %514, %515 : vector<2x24xf32>
    %c4_163 = arith.constant 4 : index
    %c0_164 = arith.constant 0 : index
    %c0_165 = arith.constant 0 : index
    %517 = vector.load %arg7[%c4_163, %c0_164, %c0_165] : memref<8x2x24xf32, #tpu.memory_space<vmem>>, vector<1x2x24xf32>
    %518 = vector.shape_cast %517 : vector<1x2x24xf32> to vector<2x24xf32>
    %519 = vector.shape_cast %516 : vector<2x24xf32> to vector<1x2x24xf32>
    tpu.vector_store %arg7[%c4_163, %c0_164, %c0_165], %519 {strides = array<i32>} : memref<8x2x24xf32, #tpu.memory_space<vmem>>, vector<1x2x24xf32>,
    %c5_166 = arith.constant 5 : index
    %c0_167 = arith.constant 0 : index
    %c0_168 = arith.constant 0 : index
    %520 = vector.load %arg6[%c5_166, %c0_167, %c0_168] : memref<8x2x72xf32, #tpu.memory_space<vmem>>, vector<1x2x72xf32>
    %521 = vector.shape_cast %520 : vector<1x2x72xf32> to vector<2x72xf32>
    %cst_169 = arith.constant dense<0.000000e+00> : vector<2x72xf32>
    %522 = tpu.matmul %516, %338, %cst_169 {dimension_numbers = #tpu.dot_dimension_numbers<[1], [0], [0], [1], [0, 0, 1, 1], [], []>} : vector<2x24xf32>, vector<24x72xf32>, vector<2x72xf32> -> vector<2x72xf32>
    %523 = vector.broadcast %339 : vector<1x72xf32> to vector<2x72xf32>
    %524 = arith.addf %522, %523 : vector<2x72xf32>
    %525 = vector.extract_strided_slice %521 {offsets = [0, 0], sizes = [2, 24], strides = [1, 1]} : vector<2x72xf32> to vector<2x24xf32>
    %526 = vector.extract_strided_slice %524 {offsets = [0, 0], sizes = [2, 24], strides = [1, 1]} : vector<2x72xf32> to vector<2x24xf32>
    %527 = arith.addf %525, %526 : vector<2x24xf32>
    %528 = arith.negf %527 : vector<2x24xf32>
    %529 = math.exp %528 : vector<2x24xf32>
    %cst_170 = arith.constant 1.000000e+00 : f32
    %530 = vector.broadcast %cst_170 : f32 to vector<2x24xf32>
    %531 = arith.addf %530, %529 : vector<2x24xf32>
    %532 = arith.divf %530, %531 : vector<2x24xf32>
    %533 = vector.extract_strided_slice %521 {offsets = [0, 24], sizes = [2, 24], strides = [1, 1]} : vector<2x72xf32> to vector<2x24xf32>
    %534 = vector.extract_strided_slice %524 {offsets = [0, 24], sizes = [2, 24], strides = [1, 1]} : vector<2x72xf32> to vector<2x24xf32>
    %535 = arith.addf %533, %534 : vector<2x24xf32>
    %536 = arith.negf %535 : vector<2x24xf32>
    %537 = math.exp %536 : vector<2x24xf32>
    %cst_171 = arith.constant 1.000000e+00 : f32
    %538 = vector.broadcast %cst_171 : f32 to vector<2x24xf32>
    %539 = arith.addf %538, %537 : vector<2x24xf32>
    %540 = arith.divf %538, %539 : vector<2x24xf32>
    %541 = vector.extract_strided_slice %521 {offsets = [0, 48], sizes = [2, 24], strides = [1, 1]} : vector<2x72xf32> to vector<2x24xf32>
    %542 = vector.extract_strided_slice %524 {offsets = [0, 48], sizes = [2, 24], strides = [1, 1]} : vector<2x72xf32> to vector<2x24xf32>
    %543 = arith.mulf %532, %542 : vector<2x24xf32>
    %544 = arith.addf %541, %543 : vector<2x24xf32>
    %545 = math.tanh %544 : vector<2x24xf32>
    %cst_172 = arith.constant 1.000000e+00 : f32
    %546 = vector.broadcast %cst_172 : f32 to vector<2x24xf32>
    %547 = arith.subf %546, %540 : vector<2x24xf32>
    %548 = arith.mulf %547, %545 : vector<2x24xf32>
    %549 = arith.mulf %540, %516 : vector<2x24xf32>
    %550 = arith.addf %548, %549 : vector<2x24xf32>
    %c5_173 = arith.constant 5 : index
    %c0_174 = arith.constant 0 : index
    %c0_175 = arith.constant 0 : index
    %551 = vector.load %arg7[%c5_173, %c0_174, %c0_175] : memref<8x2x24xf32, #tpu.memory_space<vmem>>, vector<1x2x24xf32>
    %552 = vector.shape_cast %551 : vector<1x2x24xf32> to vector<2x24xf32>
    %553 = vector.shape_cast %550 : vector<2x24xf32> to vector<1x2x24xf32>
    tpu.vector_store %arg7[%c5_173, %c0_174, %c0_175], %553 {strides = array<i32>} : memref<8x2x24xf32, #tpu.memory_space<vmem>>, vector<1x2x24xf32>,
    %c6_176 = arith.constant 6 : index
    %c0_177 = arith.constant 0 : index
    %c0_178 = arith.constant 0 : index
    %554 = vector.load %arg6[%c6_176, %c0_177, %c0_178] : memref<8x2x72xf32, #tpu.memory_space<vmem>>, vector<1x2x72xf32>
    %555 = vector.shape_cast %554 : vector<1x2x72xf32> to vector<2x72xf32>
    %cst_179 = arith.constant dense<0.000000e+00> : vector<2x72xf32>
    %556 = tpu.matmul %550, %338, %cst_179 {dimension_numbers = #tpu.dot_dimension_numbers<[1], [0], [0], [1], [0, 0, 1, 1], [], []>} : vector<2x24xf32>, vector<24x72xf32>, vector<2x72xf32> -> vector<2x72xf32>
    %557 = vector.broadcast %339 : vector<1x72xf32> to vector<2x72xf32>
    %558 = arith.addf %556, %557 : vector<2x72xf32>
    %559 = vector.extract_strided_slice %555 {offsets = [0, 0], sizes = [2, 24], strides = [1, 1]} : vector<2x72xf32> to vector<2x24xf32>
    %560 = vector.extract_strided_slice %558 {offsets = [0, 0], sizes = [2, 24], strides = [1, 1]} : vector<2x72xf32> to vector<2x24xf32>
    %561 = arith.addf %559, %560 : vector<2x24xf32>
    %562 = arith.negf %561 : vector<2x24xf32>
    %563 = math.exp %562 : vector<2x24xf32>
    %cst_180 = arith.constant 1.000000e+00 : f32
    %564 = vector.broadcast %cst_180 : f32 to vector<2x24xf32>
    %565 = arith.addf %564, %563 : vector<2x24xf32>
    %566 = arith.divf %564, %565 : vector<2x24xf32>
    %567 = vector.extract_strided_slice %555 {offsets = [0, 24], sizes = [2, 24], strides = [1, 1]} : vector<2x72xf32> to vector<2x24xf32>
    %568 = vector.extract_strided_slice %558 {offsets = [0, 24], sizes = [2, 24], strides = [1, 1]} : vector<2x72xf32> to vector<2x24xf32>
    %569 = arith.addf %567, %568 : vector<2x24xf32>
    %570 = arith.negf %569 : vector<2x24xf32>
    %571 = math.exp %570 : vector<2x24xf32>
    %cst_181 = arith.constant 1.000000e+00 : f32
    %572 = vector.broadcast %cst_181 : f32 to vector<2x24xf32>
    %573 = arith.addf %572, %571 : vector<2x24xf32>
    %574 = arith.divf %572, %573 : vector<2x24xf32>
    %575 = vector.extract_strided_slice %555 {offsets = [0, 48], sizes = [2, 24], strides = [1, 1]} : vector<2x72xf32> to vector<2x24xf32>
    %576 = vector.extract_strided_slice %558 {offsets = [0, 48], sizes = [2, 24], strides = [1, 1]} : vector<2x72xf32> to vector<2x24xf32>
    %577 = arith.mulf %566, %576 : vector<2x24xf32>
    %578 = arith.addf %575, %577 : vector<2x24xf32>
    %579 = math.tanh %578 : vector<2x24xf32>
    %cst_182 = arith.constant 1.000000e+00 : f32
    %580 = vector.broadcast %cst_182 : f32 to vector<2x24xf32>
    %581 = arith.subf %580, %574 : vector<2x24xf32>
    %582 = arith.mulf %581, %579 : vector<2x24xf32>
    %583 = arith.mulf %574, %550 : vector<2x24xf32>
    %584 = arith.addf %582, %583 : vector<2x24xf32>
    %c6_183 = arith.constant 6 : index
    %c0_184 = arith.constant 0 : index
    %c0_185 = arith.constant 0 : index
    %585 = vector.load %arg7[%c6_183, %c0_184, %c0_185] : memref<8x2x24xf32, #tpu.memory_space<vmem>>, vector<1x2x24xf32>
    %586 = vector.shape_cast %585 : vector<1x2x24xf32> to vector<2x24xf32>
    %587 = vector.shape_cast %584 : vector<2x24xf32> to vector<1x2x24xf32>
    tpu.vector_store %arg7[%c6_183, %c0_184, %c0_185], %587 {strides = array<i32>} : memref<8x2x24xf32, #tpu.memory_space<vmem>>, vector<1x2x24xf32>,
    %c7_186 = arith.constant 7 : index
    %c0_187 = arith.constant 0 : index
    %c0_188 = arith.constant 0 : index
    %588 = vector.load %arg6[%c7_186, %c0_187, %c0_188] : memref<8x2x72xf32, #tpu.memory_space<vmem>>, vector<1x2x72xf32>
    %589 = vector.shape_cast %588 : vector<1x2x72xf32> to vector<2x72xf32>
    %cst_189 = arith.constant dense<0.000000e+00> : vector<2x72xf32>
    %590 = tpu.matmul %584, %338, %cst_189 {dimension_numbers = #tpu.dot_dimension_numbers<[1], [0], [0], [1], [0, 0, 1, 1], [], []>} : vector<2x24xf32>, vector<24x72xf32>, vector<2x72xf32> -> vector<2x72xf32>
    %591 = vector.broadcast %339 : vector<1x72xf32> to vector<2x72xf32>
    %592 = arith.addf %590, %591 : vector<2x72xf32>
    %593 = vector.extract_strided_slice %589 {offsets = [0, 0], sizes = [2, 24], strides = [1, 1]} : vector<2x72xf32> to vector<2x24xf32>
    %594 = vector.extract_strided_slice %592 {offsets = [0, 0], sizes = [2, 24], strides = [1, 1]} : vector<2x72xf32> to vector<2x24xf32>
    %595 = arith.addf %593, %594 : vector<2x24xf32>
    %596 = arith.negf %595 : vector<2x24xf32>
    %597 = math.exp %596 : vector<2x24xf32>
    %cst_190 = arith.constant 1.000000e+00 : f32
    %598 = vector.broadcast %cst_190 : f32 to vector<2x24xf32>
    %599 = arith.addf %598, %597 : vector<2x24xf32>
    %600 = arith.divf %598, %599 : vector<2x24xf32>
    %601 = vector.extract_strided_slice %589 {offsets = [0, 24], sizes = [2, 24], strides = [1, 1]} : vector<2x72xf32> to vector<2x24xf32>
    %602 = vector.extract_strided_slice %592 {offsets = [0, 24], sizes = [2, 24], strides = [1, 1]} : vector<2x72xf32> to vector<2x24xf32>
    %603 = arith.addf %601, %602 : vector<2x24xf32>
    %604 = arith.negf %603 : vector<2x24xf32>
    %605 = math.exp %604 : vector<2x24xf32>
    %cst_191 = arith.constant 1.000000e+00 : f32
    %606 = vector.broadcast %cst_191 : f32 to vector<2x24xf32>
    %607 = arith.addf %606, %605 : vector<2x24xf32>
    %608 = arith.divf %606, %607 : vector<2x24xf32>
    %609 = vector.extract_strided_slice %589 {offsets = [0, 48], sizes = [2, 24], strides = [1, 1]} : vector<2x72xf32> to vector<2x24xf32>
    %610 = vector.extract_strided_slice %592 {offsets = [0, 48], sizes = [2, 24], strides = [1, 1]} : vector<2x72xf32> to vector<2x24xf32>
    %611 = arith.mulf %600, %610 : vector<2x24xf32>
    %612 = arith.addf %609, %611 : vector<2x24xf32>
    %613 = math.tanh %612 : vector<2x24xf32>
    %cst_192 = arith.constant 1.000000e+00 : f32
    %614 = vector.broadcast %cst_192 : f32 to vector<2x24xf32>
    %615 = arith.subf %614, %608 : vector<2x24xf32>
    %616 = arith.mulf %615, %613 : vector<2x24xf32>
    %617 = arith.mulf %608, %584 : vector<2x24xf32>
    %618 = arith.addf %616, %617 : vector<2x24xf32>
    %c7_193 = arith.constant 7 : index
    %c0_194 = arith.constant 0 : index
    %c0_195 = arith.constant 0 : index
    %619 = vector.load %arg7[%c7_193, %c0_194, %c0_195] : memref<8x2x24xf32, #tpu.memory_space<vmem>>, vector<1x2x24xf32>
    %620 = vector.shape_cast %619 : vector<1x2x24xf32> to vector<2x24xf32>
    %621 = vector.shape_cast %618 : vector<2x24xf32> to vector<1x2x24xf32>
    tpu.vector_store %arg7[%c7_193, %c0_194, %c0_195], %621 {strides = array<i32>} : memref<8x2x24xf32, #tpu.memory_space<vmem>>, vector<1x2x24xf32>,
    %c0_196 = arith.constant 0 : index
    %c0_197 = arith.constant 0 : index
    %c0_198 = arith.constant 0 : index
    %622 = vector.load %arg7[%c0_196, %c0_197, %c0_198] : memref<8x2x24xf32, #tpu.memory_space<vmem>>, vector<8x2x24xf32>
    %623 = vector.shape_cast %622 : vector<8x2x24xf32> to vector<16x24xf32>
    %c248 = arith.constant 248 : index
    %c0_199 = arith.constant 0 : index
    %624 = vector.load %arg3[%c248, %c0_199] : memref<320x128xf32, #tpu.memory_space<vmem>>, vector<24x72xf32>
    %c280 = arith.constant 280 : index
    %c0_200 = arith.constant 0 : index
    %625 = vector.load %arg3[%c280, %c0_200] : memref<320x128xf32, #tpu.memory_space<vmem>>, vector<1x72xf32>
    %626 = arith.truncf %623 : vector<16x24xf32> to vector<16x24xbf16>
    %c224 = arith.constant 224 : index
    %c0_201 = arith.constant 0 : index
    %627 = vector.load %arg3[%c224, %c0_201] : memref<320x128xf32, #tpu.memory_space<vmem>>, vector<24x72xf32>
    %628 = arith.truncf %627 : vector<24x72xf32> to vector<24x72xbf16>
    %cst_202 = arith.constant dense<0.000000e+00> : vector<16x72xf32>
    %629 = tpu.matmul %626, %628, %cst_202 {dimension_numbers = #tpu.dot_dimension_numbers<[1], [0], [0], [1], [0, 0, 1, 1], [], []>} : vector<16x24xbf16>, vector<24x72xbf16>, vector<16x72xf32> -> vector<16x72xf32>
    %c272 = arith.constant 272 : index
    %c0_203 = arith.constant 0 : index
    %630 = vector.load %arg3[%c272, %c0_203] : memref<320x128xf32, #tpu.memory_space<vmem>>, vector<1x72xf32>
    %631 = vector.broadcast %630 : vector<1x72xf32> to vector<16x72xf32>
    %632 = arith.addf %629, %631 : vector<16x72xf32>
    %633 = vector.shape_cast %632 : vector<16x72xf32> to vector<8x2x72xf32>
    %c0_204 = arith.constant 0 : index
    %c0_205 = arith.constant 0 : index
    %c0_206 = arith.constant 0 : index
    %634 = vector.load %arg6[%c0_204, %c0_205, %c0_206] : memref<8x2x72xf32, #tpu.memory_space<vmem>>, vector<8x2x72xf32>
    tpu.vector_store %arg6[%c0_204, %c0_205, %c0_206], %633 {strides = array<i32>} : memref<8x2x72xf32, #tpu.memory_space<vmem>>, vector<8x2x72xf32>,
    %cst_207 = arith.constant 0.000000e+00 : f32
    %635 = vector.broadcast %cst_207 : f32 to vector<2x24xf32>
    %c0_208 = arith.constant 0 : index
    %c0_209 = arith.constant 0 : index
    %c0_210 = arith.constant 0 : index
    %636 = vector.load %arg6[%c0_208, %c0_209, %c0_210] : memref<8x2x72xf32, #tpu.memory_space<vmem>>, vector<1x2x72xf32>
    %637 = vector.shape_cast %636 : vector<1x2x72xf32> to vector<2x72xf32>
    %cst_211 = arith.constant dense<0.000000e+00> : vector<2x72xf32>
    %638 = tpu.matmul %635, %624, %cst_211 {dimension_numbers = #tpu.dot_dimension_numbers<[1], [0], [0], [1], [0, 0, 1, 1], [], []>} : vector<2x24xf32>, vector<24x72xf32>, vector<2x72xf32> -> vector<2x72xf32>
    %639 = vector.broadcast %625 : vector<1x72xf32> to vector<2x72xf32>
    %640 = arith.addf %638, %639 : vector<2x72xf32>
    %641 = vector.extract_strided_slice %637 {offsets = [0, 0], sizes = [2, 24], strides = [1, 1]} : vector<2x72xf32> to vector<2x24xf32>
    %642 = vector.extract_strided_slice %640 {offsets = [0, 0], sizes = [2, 24], strides = [1, 1]} : vector<2x72xf32> to vector<2x24xf32>
    %643 = arith.addf %641, %642 : vector<2x24xf32>
    %644 = arith.negf %643 : vector<2x24xf32>
    %645 = math.exp %644 : vector<2x24xf32>
    %cst_212 = arith.constant 1.000000e+00 : f32
    %646 = vector.broadcast %cst_212 : f32 to vector<2x24xf32>
    %647 = arith.addf %646, %645 : vector<2x24xf32>
    %648 = arith.divf %646, %647 : vector<2x24xf32>
    %649 = vector.extract_strided_slice %637 {offsets = [0, 24], sizes = [2, 24], strides = [1, 1]} : vector<2x72xf32> to vector<2x24xf32>
    %650 = vector.extract_strided_slice %640 {offsets = [0, 24], sizes = [2, 24], strides = [1, 1]} : vector<2x72xf32> to vector<2x24xf32>
    %651 = arith.addf %649, %650 : vector<2x24xf32>
    %652 = arith.negf %651 : vector<2x24xf32>
    %653 = math.exp %652 : vector<2x24xf32>
    %cst_213 = arith.constant 1.000000e+00 : f32
    %654 = vector.broadcast %cst_213 : f32 to vector<2x24xf32>
    %655 = arith.addf %654, %653 : vector<2x24xf32>
    %656 = arith.divf %654, %655 : vector<2x24xf32>
    %657 = vector.extract_strided_slice %637 {offsets = [0, 48], sizes = [2, 24], strides = [1, 1]} : vector<2x72xf32> to vector<2x24xf32>
    %658 = vector.extract_strided_slice %640 {offsets = [0, 48], sizes = [2, 24], strides = [1, 1]} : vector<2x72xf32> to vector<2x24xf32>
    %659 = arith.mulf %648, %658 : vector<2x24xf32>
    %660 = arith.addf %657, %659 : vector<2x24xf32>
    %661 = math.tanh %660 : vector<2x24xf32>
    %cst_214 = arith.constant 1.000000e+00 : f32
    %662 = vector.broadcast %cst_214 : f32 to vector<2x24xf32>
    %663 = arith.subf %662, %656 : vector<2x24xf32>
    %664 = arith.mulf %663, %661 : vector<2x24xf32>
    %665 = arith.mulf %656, %635 : vector<2x24xf32>
    %666 = arith.addf %664, %665 : vector<2x24xf32>
    %c0_215 = arith.constant 0 : index
    %c0_216 = arith.constant 0 : index
    %c0_217 = arith.constant 0 : index
    %667 = vector.load %arg7[%c0_215, %c0_216, %c0_217] : memref<8x2x24xf32, #tpu.memory_space<vmem>>, vector<1x2x24xf32>
    %668 = vector.shape_cast %667 : vector<1x2x24xf32> to vector<2x24xf32>
    %669 = vector.shape_cast %666 : vector<2x24xf32> to vector<1x2x24xf32>
    tpu.vector_store %arg7[%c0_215, %c0_216, %c0_217], %669 {strides = array<i32>} : memref<8x2x24xf32, #tpu.memory_space<vmem>>, vector<1x2x24xf32>,
    %c1_218 = arith.constant 1 : index
    %c0_219 = arith.constant 0 : index
    %c0_220 = arith.constant 0 : index
    %670 = vector.load %arg6[%c1_218, %c0_219, %c0_220] : memref<8x2x72xf32, #tpu.memory_space<vmem>>, vector<1x2x72xf32>
    %671 = vector.shape_cast %670 : vector<1x2x72xf32> to vector<2x72xf32>
    %cst_221 = arith.constant dense<0.000000e+00> : vector<2x72xf32>
    %672 = tpu.matmul %666, %624, %cst_221 {dimension_numbers = #tpu.dot_dimension_numbers<[1], [0], [0], [1], [0, 0, 1, 1], [], []>} : vector<2x24xf32>, vector<24x72xf32>, vector<2x72xf32> -> vector<2x72xf32>
    %673 = vector.broadcast %625 : vector<1x72xf32> to vector<2x72xf32>
    %674 = arith.addf %672, %673 : vector<2x72xf32>
    %675 = vector.extract_strided_slice %671 {offsets = [0, 0], sizes = [2, 24], strides = [1, 1]} : vector<2x72xf32> to vector<2x24xf32>
    %676 = vector.extract_strided_slice %674 {offsets = [0, 0], sizes = [2, 24], strides = [1, 1]} : vector<2x72xf32> to vector<2x24xf32>
    %677 = arith.addf %675, %676 : vector<2x24xf32>
    %678 = arith.negf %677 : vector<2x24xf32>
    %679 = math.exp %678 : vector<2x24xf32>
    %cst_222 = arith.constant 1.000000e+00 : f32
    %680 = vector.broadcast %cst_222 : f32 to vector<2x24xf32>
    %681 = arith.addf %680, %679 : vector<2x24xf32>
    %682 = arith.divf %680, %681 : vector<2x24xf32>
    %683 = vector.extract_strided_slice %671 {offsets = [0, 24], sizes = [2, 24], strides = [1, 1]} : vector<2x72xf32> to vector<2x24xf32>
    %684 = vector.extract_strided_slice %674 {offsets = [0, 24], sizes = [2, 24], strides = [1, 1]} : vector<2x72xf32> to vector<2x24xf32>
    %685 = arith.addf %683, %684 : vector<2x24xf32>
    %686 = arith.negf %685 : vector<2x24xf32>
    %687 = math.exp %686 : vector<2x24xf32>
    %cst_223 = arith.constant 1.000000e+00 : f32
    %688 = vector.broadcast %cst_223 : f32 to vector<2x24xf32>
    %689 = arith.addf %688, %687 : vector<2x24xf32>
    %690 = arith.divf %688, %689 : vector<2x24xf32>
    %691 = vector.extract_strided_slice %671 {offsets = [0, 48], sizes = [2, 24], strides = [1, 1]} : vector<2x72xf32> to vector<2x24xf32>
    %692 = vector.extract_strided_slice %674 {offsets = [0, 48], sizes = [2, 24], strides = [1, 1]} : vector<2x72xf32> to vector<2x24xf32>
    %693 = arith.mulf %682, %692 : vector<2x24xf32>
    %694 = arith.addf %691, %693 : vector<2x24xf32>
    %695 = math.tanh %694 : vector<2x24xf32>
    %cst_224 = arith.constant 1.000000e+00 : f32
    %696 = vector.broadcast %cst_224 : f32 to vector<2x24xf32>
    %697 = arith.subf %696, %690 : vector<2x24xf32>
    %698 = arith.mulf %697, %695 : vector<2x24xf32>
    %699 = arith.mulf %690, %666 : vector<2x24xf32>
    %700 = arith.addf %698, %699 : vector<2x24xf32>
    %c1_225 = arith.constant 1 : index
    %c0_226 = arith.constant 0 : index
    %c0_227 = arith.constant 0 : index
    %701 = vector.load %arg7[%c1_225, %c0_226, %c0_227] : memref<8x2x24xf32, #tpu.memory_space<vmem>>, vector<1x2x24xf32>
    %702 = vector.shape_cast %701 : vector<1x2x24xf32> to vector<2x24xf32>
    %703 = vector.shape_cast %700 : vector<2x24xf32> to vector<1x2x24xf32>
    tpu.vector_store %arg7[%c1_225, %c0_226, %c0_227], %703 {strides = array<i32>} : memref<8x2x24xf32, #tpu.memory_space<vmem>>, vector<1x2x24xf32>,
    %c2_228 = arith.constant 2 : index
    %c0_229 = arith.constant 0 : index
    %c0_230 = arith.constant 0 : index
    %704 = vector.load %arg6[%c2_228, %c0_229, %c0_230] : memref<8x2x72xf32, #tpu.memory_space<vmem>>, vector<1x2x72xf32>
    %705 = vector.shape_cast %704 : vector<1x2x72xf32> to vector<2x72xf32>
    %cst_231 = arith.constant dense<0.000000e+00> : vector<2x72xf32>
    %706 = tpu.matmul %700, %624, %cst_231 {dimension_numbers = #tpu.dot_dimension_numbers<[1], [0], [0], [1], [0, 0, 1, 1], [], []>} : vector<2x24xf32>, vector<24x72xf32>, vector<2x72xf32> -> vector<2x72xf32>
    %707 = vector.broadcast %625 : vector<1x72xf32> to vector<2x72xf32>
    %708 = arith.addf %706, %707 : vector<2x72xf32>
    %709 = vector.extract_strided_slice %705 {offsets = [0, 0], sizes = [2, 24], strides = [1, 1]} : vector<2x72xf32> to vector<2x24xf32>
    %710 = vector.extract_strided_slice %708 {offsets = [0, 0], sizes = [2, 24], strides = [1, 1]} : vector<2x72xf32> to vector<2x24xf32>
    %711 = arith.addf %709, %710 : vector<2x24xf32>
    %712 = arith.negf %711 : vector<2x24xf32>
    %713 = math.exp %712 : vector<2x24xf32>
    %cst_232 = arith.constant 1.000000e+00 : f32
    %714 = vector.broadcast %cst_232 : f32 to vector<2x24xf32>
    %715 = arith.addf %714, %713 : vector<2x24xf32>
    %716 = arith.divf %714, %715 : vector<2x24xf32>
    %717 = vector.extract_strided_slice %705 {offsets = [0, 24], sizes = [2, 24], strides = [1, 1]} : vector<2x72xf32> to vector<2x24xf32>
    %718 = vector.extract_strided_slice %708 {offsets = [0, 24], sizes = [2, 24], strides = [1, 1]} : vector<2x72xf32> to vector<2x24xf32>
    %719 = arith.addf %717, %718 : vector<2x24xf32>
    %720 = arith.negf %719 : vector<2x24xf32>
    %721 = math.exp %720 : vector<2x24xf32>
    %cst_233 = arith.constant 1.000000e+00 : f32
    %722 = vector.broadcast %cst_233 : f32 to vector<2x24xf32>
    %723 = arith.addf %722, %721 : vector<2x24xf32>
    %724 = arith.divf %722, %723 : vector<2x24xf32>
    %725 = vector.extract_strided_slice %705 {offsets = [0, 48], sizes = [2, 24], strides = [1, 1]} : vector<2x72xf32> to vector<2x24xf32>
    %726 = vector.extract_strided_slice %708 {offsets = [0, 48], sizes = [2, 24], strides = [1, 1]} : vector<2x72xf32> to vector<2x24xf32>
    %727 = arith.mulf %716, %726 : vector<2x24xf32>
    %728 = arith.addf %725, %727 : vector<2x24xf32>
    %729 = math.tanh %728 : vector<2x24xf32>
    %cst_234 = arith.constant 1.000000e+00 : f32
    %730 = vector.broadcast %cst_234 : f32 to vector<2x24xf32>
    %731 = arith.subf %730, %724 : vector<2x24xf32>
    %732 = arith.mulf %731, %729 : vector<2x24xf32>
    %733 = arith.mulf %724, %700 : vector<2x24xf32>
    %734 = arith.addf %732, %733 : vector<2x24xf32>
    %c2_235 = arith.constant 2 : index
    %c0_236 = arith.constant 0 : index
    %c0_237 = arith.constant 0 : index
    %735 = vector.load %arg7[%c2_235, %c0_236, %c0_237] : memref<8x2x24xf32, #tpu.memory_space<vmem>>, vector<1x2x24xf32>
    %736 = vector.shape_cast %735 : vector<1x2x24xf32> to vector<2x24xf32>
    %737 = vector.shape_cast %734 : vector<2x24xf32> to vector<1x2x24xf32>
    tpu.vector_store %arg7[%c2_235, %c0_236, %c0_237], %737 {strides = array<i32>} : memref<8x2x24xf32, #tpu.memory_space<vmem>>, vector<1x2x24xf32>,
    %c3_238 = arith.constant 3 : index
    %c0_239 = arith.constant 0 : index
    %c0_240 = arith.constant 0 : index
    %738 = vector.load %arg6[%c3_238, %c0_239, %c0_240] : memref<8x2x72xf32, #tpu.memory_space<vmem>>, vector<1x2x72xf32>
    %739 = vector.shape_cast %738 : vector<1x2x72xf32> to vector<2x72xf32>
    %cst_241 = arith.constant dense<0.000000e+00> : vector<2x72xf32>
    %740 = tpu.matmul %734, %624, %cst_241 {dimension_numbers = #tpu.dot_dimension_numbers<[1], [0], [0], [1], [0, 0, 1, 1], [], []>} : vector<2x24xf32>, vector<24x72xf32>, vector<2x72xf32> -> vector<2x72xf32>
    %741 = vector.broadcast %625 : vector<1x72xf32> to vector<2x72xf32>
    %742 = arith.addf %740, %741 : vector<2x72xf32>
    %743 = vector.extract_strided_slice %739 {offsets = [0, 0], sizes = [2, 24], strides = [1, 1]} : vector<2x72xf32> to vector<2x24xf32>
    %744 = vector.extract_strided_slice %742 {offsets = [0, 0], sizes = [2, 24], strides = [1, 1]} : vector<2x72xf32> to vector<2x24xf32>
    %745 = arith.addf %743, %744 : vector<2x24xf32>
    %746 = arith.negf %745 : vector<2x24xf32>
    %747 = math.exp %746 : vector<2x24xf32>
    %cst_242 = arith.constant 1.000000e+00 : f32
    %748 = vector.broadcast %cst_242 : f32 to vector<2x24xf32>
    %749 = arith.addf %748, %747 : vector<2x24xf32>
    %750 = arith.divf %748, %749 : vector<2x24xf32>
    %751 = vector.extract_strided_slice %739 {offsets = [0, 24], sizes = [2, 24], strides = [1, 1]} : vector<2x72xf32> to vector<2x24xf32>
    %752 = vector.extract_strided_slice %742 {offsets = [0, 24], sizes = [2, 24], strides = [1, 1]} : vector<2x72xf32> to vector<2x24xf32>
    %753 = arith.addf %751, %752 : vector<2x24xf32>
    %754 = arith.negf %753 : vector<2x24xf32>
    %755 = math.exp %754 : vector<2x24xf32>
    %cst_243 = arith.constant 1.000000e+00 : f32
    %756 = vector.broadcast %cst_243 : f32 to vector<2x24xf32>
    %757 = arith.addf %756, %755 : vector<2x24xf32>
    %758 = arith.divf %756, %757 : vector<2x24xf32>
    %759 = vector.extract_strided_slice %739 {offsets = [0, 48], sizes = [2, 24], strides = [1, 1]} : vector<2x72xf32> to vector<2x24xf32>
    %760 = vector.extract_strided_slice %742 {offsets = [0, 48], sizes = [2, 24], strides = [1, 1]} : vector<2x72xf32> to vector<2x24xf32>
    %761 = arith.mulf %750, %760 : vector<2x24xf32>
    %762 = arith.addf %759, %761 : vector<2x24xf32>
    %763 = math.tanh %762 : vector<2x24xf32>
    %cst_244 = arith.constant 1.000000e+00 : f32
    %764 = vector.broadcast %cst_244 : f32 to vector<2x24xf32>
    %765 = arith.subf %764, %758 : vector<2x24xf32>
    %766 = arith.mulf %765, %763 : vector<2x24xf32>
    %767 = arith.mulf %758, %734 : vector<2x24xf32>
    %768 = arith.addf %766, %767 : vector<2x24xf32>
    %c3_245 = arith.constant 3 : index
    %c0_246 = arith.constant 0 : index
    %c0_247 = arith.constant 0 : index
    %769 = vector.load %arg7[%c3_245, %c0_246, %c0_247] : memref<8x2x24xf32, #tpu.memory_space<vmem>>, vector<1x2x24xf32>
    %770 = vector.shape_cast %769 : vector<1x2x24xf32> to vector<2x24xf32>
    %771 = vector.shape_cast %768 : vector<2x24xf32> to vector<1x2x24xf32>
    tpu.vector_store %arg7[%c3_245, %c0_246, %c0_247], %771 {strides = array<i32>} : memref<8x2x24xf32, #tpu.memory_space<vmem>>, vector<1x2x24xf32>,
    %c4_248 = arith.constant 4 : index
    %c0_249 = arith.constant 0 : index
    %c0_250 = arith.constant 0 : index
    %772 = vector.load %arg6[%c4_248, %c0_249, %c0_250] : memref<8x2x72xf32, #tpu.memory_space<vmem>>, vector<1x2x72xf32>
    %773 = vector.shape_cast %772 : vector<1x2x72xf32> to vector<2x72xf32>
    %cst_251 = arith.constant dense<0.000000e+00> : vector<2x72xf32>
    %774 = tpu.matmul %768, %624, %cst_251 {dimension_numbers = #tpu.dot_dimension_numbers<[1], [0], [0], [1], [0, 0, 1, 1], [], []>} : vector<2x24xf32>, vector<24x72xf32>, vector<2x72xf32> -> vector<2x72xf32>
    %775 = vector.broadcast %625 : vector<1x72xf32> to vector<2x72xf32>
    %776 = arith.addf %774, %775 : vector<2x72xf32>
    %777 = vector.extract_strided_slice %773 {offsets = [0, 0], sizes = [2, 24], strides = [1, 1]} : vector<2x72xf32> to vector<2x24xf32>
    %778 = vector.extract_strided_slice %776 {offsets = [0, 0], sizes = [2, 24], strides = [1, 1]} : vector<2x72xf32> to vector<2x24xf32>
    %779 = arith.addf %777, %778 : vector<2x24xf32>
    %780 = arith.negf %779 : vector<2x24xf32>
    %781 = math.exp %780 : vector<2x24xf32>
    %cst_252 = arith.constant 1.000000e+00 : f32
    %782 = vector.broadcast %cst_252 : f32 to vector<2x24xf32>
    %783 = arith.addf %782, %781 : vector<2x24xf32>
    %784 = arith.divf %782, %783 : vector<2x24xf32>
    %785 = vector.extract_strided_slice %773 {offsets = [0, 24], sizes = [2, 24], strides = [1, 1]} : vector<2x72xf32> to vector<2x24xf32>
    %786 = vector.extract_strided_slice %776 {offsets = [0, 24], sizes = [2, 24], strides = [1, 1]} : vector<2x72xf32> to vector<2x24xf32>
    %787 = arith.addf %785, %786 : vector<2x24xf32>
    %788 = arith.negf %787 : vector<2x24xf32>
    %789 = math.exp %788 : vector<2x24xf32>
    %cst_253 = arith.constant 1.000000e+00 : f32
    %790 = vector.broadcast %cst_253 : f32 to vector<2x24xf32>
    %791 = arith.addf %790, %789 : vector<2x24xf32>
    %792 = arith.divf %790, %791 : vector<2x24xf32>
    %793 = vector.extract_strided_slice %773 {offsets = [0, 48], sizes = [2, 24], strides = [1, 1]} : vector<2x72xf32> to vector<2x24xf32>
    %794 = vector.extract_strided_slice %776 {offsets = [0, 48], sizes = [2, 24], strides = [1, 1]} : vector<2x72xf32> to vector<2x24xf32>
    %795 = arith.mulf %784, %794 : vector<2x24xf32>
    %796 = arith.addf %793, %795 : vector<2x24xf32>
    %797 = math.tanh %796 : vector<2x24xf32>
    %cst_254 = arith.constant 1.000000e+00 : f32
    %798 = vector.broadcast %cst_254 : f32 to vector<2x24xf32>
    %799 = arith.subf %798, %792 : vector<2x24xf32>
    %800 = arith.mulf %799, %797 : vector<2x24xf32>
    %801 = arith.mulf %792, %768 : vector<2x24xf32>
    %802 = arith.addf %800, %801 : vector<2x24xf32>
    %c4_255 = arith.constant 4 : index
    %c0_256 = arith.constant 0 : index
    %c0_257 = arith.constant 0 : index
    %803 = vector.load %arg7[%c4_255, %c0_256, %c0_257] : memref<8x2x24xf32, #tpu.memory_space<vmem>>, vector<1x2x24xf32>
    %804 = vector.shape_cast %803 : vector<1x2x24xf32> to vector<2x24xf32>
    %805 = vector.shape_cast %802 : vector<2x24xf32> to vector<1x2x24xf32>
    tpu.vector_store %arg7[%c4_255, %c0_256, %c0_257], %805 {strides = array<i32>} : memref<8x2x24xf32, #tpu.memory_space<vmem>>, vector<1x2x24xf32>,
    %c5_258 = arith.constant 5 : index
    %c0_259 = arith.constant 0 : index
    %c0_260 = arith.constant 0 : index
    %806 = vector.load %arg6[%c5_258, %c0_259, %c0_260] : memref<8x2x72xf32, #tpu.memory_space<vmem>>, vector<1x2x72xf32>
    %807 = vector.shape_cast %806 : vector<1x2x72xf32> to vector<2x72xf32>
    %cst_261 = arith.constant dense<0.000000e+00> : vector<2x72xf32>
    %808 = tpu.matmul %802, %624, %cst_261 {dimension_numbers = #tpu.dot_dimension_numbers<[1], [0], [0], [1], [0, 0, 1, 1], [], []>} : vector<2x24xf32>, vector<24x72xf32>, vector<2x72xf32> -> vector<2x72xf32>
    %809 = vector.broadcast %625 : vector<1x72xf32> to vector<2x72xf32>
    %810 = arith.addf %808, %809 : vector<2x72xf32>
    %811 = vector.extract_strided_slice %807 {offsets = [0, 0], sizes = [2, 24], strides = [1, 1]} : vector<2x72xf32> to vector<2x24xf32>
    %812 = vector.extract_strided_slice %810 {offsets = [0, 0], sizes = [2, 24], strides = [1, 1]} : vector<2x72xf32> to vector<2x24xf32>
    %813 = arith.addf %811, %812 : vector<2x24xf32>
    %814 = arith.negf %813 : vector<2x24xf32>
    %815 = math.exp %814 : vector<2x24xf32>
    %cst_262 = arith.constant 1.000000e+00 : f32
    %816 = vector.broadcast %cst_262 : f32 to vector<2x24xf32>
    %817 = arith.addf %816, %815 : vector<2x24xf32>
    %818 = arith.divf %816, %817 : vector<2x24xf32>
    %819 = vector.extract_strided_slice %807 {offsets = [0, 24], sizes = [2, 24], strides = [1, 1]} : vector<2x72xf32> to vector<2x24xf32>
    %820 = vector.extract_strided_slice %810 {offsets = [0, 24], sizes = [2, 24], strides = [1, 1]} : vector<2x72xf32> to vector<2x24xf32>
    %821 = arith.addf %819, %820 : vector<2x24xf32>
    %822 = arith.negf %821 : vector<2x24xf32>
    %823 = math.exp %822 : vector<2x24xf32>
    %cst_263 = arith.constant 1.000000e+00 : f32
    %824 = vector.broadcast %cst_263 : f32 to vector<2x24xf32>
    %825 = arith.addf %824, %823 : vector<2x24xf32>
    %826 = arith.divf %824, %825 : vector<2x24xf32>
    %827 = vector.extract_strided_slice %807 {offsets = [0, 48], sizes = [2, 24], strides = [1, 1]} : vector<2x72xf32> to vector<2x24xf32>
    %828 = vector.extract_strided_slice %810 {offsets = [0, 48], sizes = [2, 24], strides = [1, 1]} : vector<2x72xf32> to vector<2x24xf32>
    %829 = arith.mulf %818, %828 : vector<2x24xf32>
    %830 = arith.addf %827, %829 : vector<2x24xf32>
    %831 = math.tanh %830 : vector<2x24xf32>
    %cst_264 = arith.constant 1.000000e+00 : f32
    %832 = vector.broadcast %cst_264 : f32 to vector<2x24xf32>
    %833 = arith.subf %832, %826 : vector<2x24xf32>
    %834 = arith.mulf %833, %831 : vector<2x24xf32>
    %835 = arith.mulf %826, %802 : vector<2x24xf32>
    %836 = arith.addf %834, %835 : vector<2x24xf32>
    %c5_265 = arith.constant 5 : index
    %c0_266 = arith.constant 0 : index
    %c0_267 = arith.constant 0 : index
    %837 = vector.load %arg7[%c5_265, %c0_266, %c0_267] : memref<8x2x24xf32, #tpu.memory_space<vmem>>, vector<1x2x24xf32>
    %838 = vector.shape_cast %837 : vector<1x2x24xf32> to vector<2x24xf32>
    %839 = vector.shape_cast %836 : vector<2x24xf32> to vector<1x2x24xf32>
    tpu.vector_store %arg7[%c5_265, %c0_266, %c0_267], %839 {strides = array<i32>} : memref<8x2x24xf32, #tpu.memory_space<vmem>>, vector<1x2x24xf32>,
    %c6_268 = arith.constant 6 : index
    %c0_269 = arith.constant 0 : index
    %c0_270 = arith.constant 0 : index
    %840 = vector.load %arg6[%c6_268, %c0_269, %c0_270] : memref<8x2x72xf32, #tpu.memory_space<vmem>>, vector<1x2x72xf32>
    %841 = vector.shape_cast %840 : vector<1x2x72xf32> to vector<2x72xf32>
    %cst_271 = arith.constant dense<0.000000e+00> : vector<2x72xf32>
    %842 = tpu.matmul %836, %624, %cst_271 {dimension_numbers = #tpu.dot_dimension_numbers<[1], [0], [0], [1], [0, 0, 1, 1], [], []>} : vector<2x24xf32>, vector<24x72xf32>, vector<2x72xf32> -> vector<2x72xf32>
    %843 = vector.broadcast %625 : vector<1x72xf32> to vector<2x72xf32>
    %844 = arith.addf %842, %843 : vector<2x72xf32>
    %845 = vector.extract_strided_slice %841 {offsets = [0, 0], sizes = [2, 24], strides = [1, 1]} : vector<2x72xf32> to vector<2x24xf32>
    %846 = vector.extract_strided_slice %844 {offsets = [0, 0], sizes = [2, 24], strides = [1, 1]} : vector<2x72xf32> to vector<2x24xf32>
    %847 = arith.addf %845, %846 : vector<2x24xf32>
    %848 = arith.negf %847 : vector<2x24xf32>
    %849 = math.exp %848 : vector<2x24xf32>
    %cst_272 = arith.constant 1.000000e+00 : f32
    %850 = vector.broadcast %cst_272 : f32 to vector<2x24xf32>
    %851 = arith.addf %850, %849 : vector<2x24xf32>
    %852 = arith.divf %850, %851 : vector<2x24xf32>
    %853 = vector.extract_strided_slice %841 {offsets = [0, 24], sizes = [2, 24], strides = [1, 1]} : vector<2x72xf32> to vector<2x24xf32>
    %854 = vector.extract_strided_slice %844 {offsets = [0, 24], sizes = [2, 24], strides = [1, 1]} : vector<2x72xf32> to vector<2x24xf32>
    %855 = arith.addf %853, %854 : vector<2x24xf32>
    %856 = arith.negf %855 : vector<2x24xf32>
    %857 = math.exp %856 : vector<2x24xf32>
    %cst_273 = arith.constant 1.000000e+00 : f32
    %858 = vector.broadcast %cst_273 : f32 to vector<2x24xf32>
    %859 = arith.addf %858, %857 : vector<2x24xf32>
    %860 = arith.divf %858, %859 : vector<2x24xf32>
    %861 = vector.extract_strided_slice %841 {offsets = [0, 48], sizes = [2, 24], strides = [1, 1]} : vector<2x72xf32> to vector<2x24xf32>
    %862 = vector.extract_strided_slice %844 {offsets = [0, 48], sizes = [2, 24], strides = [1, 1]} : vector<2x72xf32> to vector<2x24xf32>
    %863 = arith.mulf %852, %862 : vector<2x24xf32>
    %864 = arith.addf %861, %863 : vector<2x24xf32>
    %865 = math.tanh %864 : vector<2x24xf32>
    %cst_274 = arith.constant 1.000000e+00 : f32
    %866 = vector.broadcast %cst_274 : f32 to vector<2x24xf32>
    %867 = arith.subf %866, %860 : vector<2x24xf32>
    %868 = arith.mulf %867, %865 : vector<2x24xf32>
    %869 = arith.mulf %860, %836 : vector<2x24xf32>
    %870 = arith.addf %868, %869 : vector<2x24xf32>
    %c6_275 = arith.constant 6 : index
    %c0_276 = arith.constant 0 : index
    %c0_277 = arith.constant 0 : index
    %871 = vector.load %arg7[%c6_275, %c0_276, %c0_277] : memref<8x2x24xf32, #tpu.memory_space<vmem>>, vector<1x2x24xf32>
    %872 = vector.shape_cast %871 : vector<1x2x24xf32> to vector<2x24xf32>
    %873 = vector.shape_cast %870 : vector<2x24xf32> to vector<1x2x24xf32>
    tpu.vector_store %arg7[%c6_275, %c0_276, %c0_277], %873 {strides = array<i32>} : memref<8x2x24xf32, #tpu.memory_space<vmem>>, vector<1x2x24xf32>,
    %c7_278 = arith.constant 7 : index
    %c0_279 = arith.constant 0 : index
    %c0_280 = arith.constant 0 : index
    %874 = vector.load %arg6[%c7_278, %c0_279, %c0_280] : memref<8x2x72xf32, #tpu.memory_space<vmem>>, vector<1x2x72xf32>
    %875 = vector.shape_cast %874 : vector<1x2x72xf32> to vector<2x72xf32>
    %cst_281 = arith.constant dense<0.000000e+00> : vector<2x72xf32>
    %876 = tpu.matmul %870, %624, %cst_281 {dimension_numbers = #tpu.dot_dimension_numbers<[1], [0], [0], [1], [0, 0, 1, 1], [], []>} : vector<2x24xf32>, vector<24x72xf32>, vector<2x72xf32> -> vector<2x72xf32>
    %877 = vector.broadcast %625 : vector<1x72xf32> to vector<2x72xf32>
    %878 = arith.addf %876, %877 : vector<2x72xf32>
    %879 = vector.extract_strided_slice %875 {offsets = [0, 0], sizes = [2, 24], strides = [1, 1]} : vector<2x72xf32> to vector<2x24xf32>
    %880 = vector.extract_strided_slice %878 {offsets = [0, 0], sizes = [2, 24], strides = [1, 1]} : vector<2x72xf32> to vector<2x24xf32>
    %881 = arith.addf %879, %880 : vector<2x24xf32>
    %882 = arith.negf %881 : vector<2x24xf32>
    %883 = math.exp %882 : vector<2x24xf32>
    %cst_282 = arith.constant 1.000000e+00 : f32
    %884 = vector.broadcast %cst_282 : f32 to vector<2x24xf32>
    %885 = arith.addf %884, %883 : vector<2x24xf32>
    %886 = arith.divf %884, %885 : vector<2x24xf32>
    %887 = vector.extract_strided_slice %875 {offsets = [0, 24], sizes = [2, 24], strides = [1, 1]} : vector<2x72xf32> to vector<2x24xf32>
    %888 = vector.extract_strided_slice %878 {offsets = [0, 24], sizes = [2, 24], strides = [1, 1]} : vector<2x72xf32> to vector<2x24xf32>
    %889 = arith.addf %887, %888 : vector<2x24xf32>
    %890 = arith.negf %889 : vector<2x24xf32>
    %891 = math.exp %890 : vector<2x24xf32>
    %cst_283 = arith.constant 1.000000e+00 : f32
    %892 = vector.broadcast %cst_283 : f32 to vector<2x24xf32>
    %893 = arith.addf %892, %891 : vector<2x24xf32>
    %894 = arith.divf %892, %893 : vector<2x24xf32>
    %895 = vector.extract_strided_slice %875 {offsets = [0, 48], sizes = [2, 24], strides = [1, 1]} : vector<2x72xf32> to vector<2x24xf32>
    %896 = vector.extract_strided_slice %878 {offsets = [0, 48], sizes = [2, 24], strides = [1, 1]} : vector<2x72xf32> to vector<2x24xf32>
    %897 = arith.mulf %886, %896 : vector<2x24xf32>
    %898 = arith.addf %895, %897 : vector<2x24xf32>
    %899 = math.tanh %898 : vector<2x24xf32>
    %cst_284 = arith.constant 1.000000e+00 : f32
    %900 = vector.broadcast %cst_284 : f32 to vector<2x24xf32>
    %901 = arith.subf %900, %894 : vector<2x24xf32>
    %902 = arith.mulf %901, %899 : vector<2x24xf32>
    %903 = arith.mulf %894, %870 : vector<2x24xf32>
    %904 = arith.addf %902, %903 : vector<2x24xf32>
    %c7_285 = arith.constant 7 : index
    %c0_286 = arith.constant 0 : index
    %c0_287 = arith.constant 0 : index
    %905 = vector.load %arg7[%c7_285, %c0_286, %c0_287] : memref<8x2x24xf32, #tpu.memory_space<vmem>>, vector<1x2x24xf32>
    %906 = vector.shape_cast %905 : vector<1x2x24xf32> to vector<2x24xf32>
    %907 = vector.shape_cast %904 : vector<2x24xf32> to vector<1x2x24xf32>
    tpu.vector_store %arg7[%c7_285, %c0_286, %c0_287], %907 {strides = array<i32>} : memref<8x2x24xf32, #tpu.memory_space<vmem>>, vector<1x2x24xf32>,
    %c0_288 = arith.constant 0 : index
    %c0_289 = arith.constant 0 : index
    %c0_290 = arith.constant 0 : index
    %908 = vector.load %arg7[%c0_288, %c0_289, %c0_290] : memref<8x2x24xf32, #tpu.memory_space<vmem>>, vector<8x2x24xf32>
    %909 = vector.shape_cast %908 : vector<8x2x24xf32> to vector<16x24xf32>
    %c288 = arith.constant 288 : index
    %c0_291 = arith.constant 0 : index
    %910 = vector.load %arg3[%c288, %c0_291] : memref<320x128xf32, #tpu.memory_space<vmem>>, vector<24x3xf32>
    %cst_292 = arith.constant dense<0.000000e+00> : vector<16x3xf32>
    %911 = tpu.matmul %909, %910, %cst_292 {dimension_numbers = #tpu.dot_dimension_numbers<[1], [0], [0], [1], [0, 0, 1, 1], [], []>} : vector<16x24xf32>, vector<24x3xf32>, vector<16x3xf32> -> vector<16x3xf32>
    %c312 = arith.constant 312 : index
    %c0_293 = arith.constant 0 : index
    %912 = vector.load %arg3[%c312, %c0_293] : memref<320x128xf32, #tpu.memory_space<vmem>>, vector<1x3xf32>
    %913 = vector.broadcast %912 : vector<1x3xf32> to vector<16x3xf32>
    %914 = arith.addf %911, %913 : vector<16x3xf32>
    %cst_294 = arith.constant 9.99999974E-6 : f32
    %915 = vector.broadcast %cst_294 : f32 to vector<16x3xf32>
    %916 = arith.addf %914, %915 : vector<16x3xf32>
    %c0_295 = arith.constant 0 : index
    %c0_296 = arith.constant 0 : index
    %917 = vector.load %arg4[%c0_295, %c0_296] : memref<16x3xf32, #tpu.memory_space<vmem>>, vector<16x3xf32>
    tpu.vector_store %arg4[%c0_295, %c0_296], %916 {strides = array<i32>} : memref<16x3xf32, #tpu.memory_space<vmem>>, vector<16x3xf32>,
    %c0_297 = arith.constant 0 : index
    %c0_298 = arith.constant 0 : index
    %918 = vector.load %arg1[%c0_297, %c0_298] : memref<16x1xi32, #tpu.memory_space<vmem>>, vector<16x1xi32>
    %c0_299 = arith.constant 0 : index
    %c0_300 = arith.constant 0 : index
    %919 = vector.load %arg2[%c0_299, %c0_300] : memref<1x3xf32, #tpu.memory_space<vmem>>, vector<1x3xf32>
    %cst_301 = arith.constant dense<0xFF800000> : vector<16xf32>
    %920 = vector.multi_reduction <maximumf>, %916, %cst_301 [1] : vector<16x3xf32> to vector<16xf32>
    %921 = vector.shape_cast %920 : vector<16xf32> to vector<16x1xf32>
    %922 = vector.broadcast %921 : vector<16x1xf32> to vector<16x3xf32>
    %923 = arith.subf %916, %922 : vector<16x3xf32>
    %924 = math.exp %923 : vector<16x3xf32>
    %cst_302 = arith.constant dense<0.000000e+00> : vector<16xf32>
    %925 = vector.multi_reduction <add>, %924, %cst_302 [1] : vector<16x3xf32> to vector<16xf32>
    %926 = vector.shape_cast %925 : vector<16xf32> to vector<16x1xf32>
    %927 = math.log %926 : vector<16x1xf32>
    %928 = vector.broadcast %927 : vector<16x1xf32> to vector<16x3xf32>
    %929 = arith.subf %923, %928 : vector<16x3xf32>
    %930 = math.exp %929 : vector<16x3xf32>
    %931 = tpu.iota {dimensions = array<i32: 1>} : vector<16x3xi32>
    %932 = vector.broadcast %918 : vector<16x1xi32> to vector<16x3xi32>
    %933 = arith.cmpi eq, %931, %932 : vector<16x3xi32>
    %934 = arith.extui %933 : vector<16x3xi1> to vector<16x3xi32>
    %935 = arith.sitofp %934 : vector<16x3xi32> to vector<16x3xf32>
    %c-1_i32 = arith.constant -1 : i32
    %936 = vector.broadcast %c-1_i32 : i32 to vector<16x1xi32>
    %937 = arith.cmpi ne, %918, %936 : vector<16x1xi32>
    %938 = arith.extui %937 : vector<16x1xi1> to vector<16x1xi32>
    %939 = arith.sitofp %938 : vector<16x1xi32> to vector<16x1xf32>
    %940 = arith.mulf %935, %929 : vector<16x3xf32>
    %cst_303 = arith.constant 0.000000e+00 : f32
    %941 = vector.broadcast %cst_303 : f32 to vector<16x3xf32>
    %942 = arith.subf %941, %940 : vector<16x3xf32>
    %943 = vector.broadcast %919 : vector<1x3xf32> to vector<16x3xf32>
    %944 = arith.mulf %942, %943 : vector<16x3xf32>
    %945 = vector.broadcast %939 : vector<16x1xf32> to vector<16x3xf32>
    %946 = arith.mulf %944, %945 : vector<16x3xf32>
    %cst_304 = arith.constant dense<0.000000e+00> : vector<16xf32>
    %947 = vector.multi_reduction <add>, %946, %cst_304 [1] : vector<16x3xf32> to vector<16xf32>
    %948 = vector.shape_cast %947 : vector<16xf32> to vector<16x1xf32>
    %cst_305 = arith.constant dense<0.000000e+00> : vector<1xf32>
    %949 = vector.multi_reduction <add>, %948, %cst_305 [0] : vector<16x1xf32> to vector<1xf32>
    %950 = vector.shape_cast %949 : vector<1xf32> to vector<1x1xf32>
    %951 = vector.broadcast %919 : vector<1x3xf32> to vector<16x3xf32>
    %952 = arith.mulf %935, %951 : vector<16x3xf32>
    %953 = vector.broadcast %939 : vector<16x1xf32> to vector<16x3xf32>
    %954 = arith.mulf %952, %953 : vector<16x3xf32>
    %cst_306 = arith.constant dense<0.000000e+00> : vector<16xf32>
    %955 = vector.multi_reduction <add>, %954, %cst_306 [1] : vector<16x3xf32> to vector<16xf32>
    %956 = vector.shape_cast %955 : vector<16xf32> to vector<16x1xf32>
    %cst_307 = arith.constant dense<0.000000e+00> : vector<1xf32>
    %957 = vector.multi_reduction <add>, %956, %cst_307 [0] : vector<16x1xf32> to vector<1xf32>
    %958 = vector.shape_cast %957 : vector<1xf32> to vector<1x1xf32>
    %cst_308 = arith.constant 9.99999996E-13 : f32
    %959 = vector.broadcast %cst_308 : f32 to vector<1x1xf32>
    %960 = arith.maximumf %958, %959 : vector<1x1xf32>
    %961 = arith.divf %950, %960 : vector<1x1xf32>
    %962 = vector.broadcast %939 : vector<16x1xf32> to vector<16x3xf32>
    %963 = arith.mulf %930, %962 : vector<16x3xf32>
    %964 = arith.mulf %963, %935 : vector<16x3xf32>
    %cst_309 = arith.constant dense<0.000000e+00> : vector<3xf32>
    %965 = vector.multi_reduction <add>, %964, %cst_309 [0] : vector<16x3xf32> to vector<3xf32>
    %966 = vector.shape_cast %965 : vector<3xf32> to vector<1x3xf32>
    %967 = vector.broadcast %939 : vector<16x1xf32> to vector<16x3xf32>
    %968 = arith.mulf %935, %967 : vector<16x3xf32>
    %969 = arith.addf %963, %968 : vector<16x3xf32>
    %cst_310 = arith.constant dense<0.000000e+00> : vector<3xf32>
    %970 = vector.multi_reduction <add>, %969, %cst_310 [0] : vector<16x3xf32> to vector<3xf32>
    %971 = vector.shape_cast %970 : vector<3xf32> to vector<1x3xf32>
    %972 = arith.mulf %919, %966 : vector<1x3xf32>
    %cst_311 = arith.constant dense<0.000000e+00> : vector<1xf32>
    %973 = vector.multi_reduction <add>, %972, %cst_311 [1] : vector<1x3xf32> to vector<1xf32>
    %974 = vector.shape_cast %973 : vector<1xf32> to vector<1x1xf32>
    %975 = arith.mulf %919, %971 : vector<1x3xf32>
    %cst_312 = arith.constant dense<0.000000e+00> : vector<1xf32>
    %976 = vector.multi_reduction <add>, %975, %cst_312 [1] : vector<1x3xf32> to vector<1xf32>
    %977 = vector.shape_cast %976 : vector<1xf32> to vector<1x1xf32>
    %cst_313 = arith.constant 2.000000e+00 : f32
    %978 = vector.broadcast %cst_313 : f32 to vector<1x1xf32>
    %979 = arith.mulf %978, %974 : vector<1x1xf32>
    %cst_314 = arith.constant 9.99999996E-13 : f32
    %980 = vector.broadcast %cst_314 : f32 to vector<1x1xf32>
    %981 = arith.maximumf %977, %980 : vector<1x1xf32>
    %982 = arith.divf %979, %981 : vector<1x1xf32>
    %cst_315 = arith.constant 1.000000e+00 : f32
    %983 = vector.broadcast %cst_315 : f32 to vector<1x1xf32>
    %984 = arith.subf %983, %982 : vector<1x1xf32>
    %985 = tpu.iota {dimensions = array<i32: 1>} : vector<1x3xi32>
    %c0_i32 = arith.constant 0 : i32
    %986 = vector.broadcast %c0_i32 : i32 to vector<1x3xi32>
    %987 = arith.cmpi eq, %985, %986 : vector<1x3xi32>
    %988 = arith.addf %961, %984 : vector<1x1xf32>
    %c1_i32 = arith.constant 1 : i32
    %989 = vector.broadcast %c1_i32 : i32 to vector<1x3xi32>
    %990 = arith.cmpi eq, %985, %989 : vector<1x3xi32>
    %991 = vector.shape_cast %961 : vector<1x1xf32> to vector<1x1xf32>
    %992 = vector.broadcast %991 : vector<1x1xf32> to vector<1x3xf32>
    %993 = vector.shape_cast %984 : vector<1x1xf32> to vector<1x1xf32>
    %994 = vector.broadcast %993 : vector<1x1xf32> to vector<1x3xf32>
    %995 = arith.select %990, %992, %994 : vector<1x3xi1>, vector<1x3xf32>
    %996 = vector.shape_cast %988 : vector<1x1xf32> to vector<1x1xf32>
    %997 = vector.broadcast %996 : vector<1x1xf32> to vector<1x3xf32>
    %998 = arith.select %987, %997, %995 : vector<1x3xi1>, vector<1x3xf32>
    %c0_316 = arith.constant 0 : index
    %c0_317 = arith.constant 0 : index
    %999 = vector.load %arg5[%c0_316, %c0_317] : memref<1x3xf32, #tpu.memory_space<vmem>>, vector<1x3xf32>
    tpu.vector_store %arg5[%c0_316, %c0_317], %998 {strides = array<i32>} : memref<1x3xf32, #tpu.memory_space<vmem>>, vector<1x3xf32>,
    return
  }
}

</mosaic_0001>

<bundles_post_ra>
// kernel: model4_forward.1
= control target key start
LH: loop header
LB: loop body
LE: loop exit
PB: predicated region body
PF: predicated region fallthrough
CT: control target
= control target key end

     0   :  { %11 = vsyncpa [#allocation5], 0  ;;  %s4284_s18 = smov [#allocation4]   ;;  %s4823_s0 = inlined_call_operand.vmem [shape: f32[16,8], index: 0, kind: input, shape index: {}]   ;;  %s4824_s1 = inlined_call_operand.vmem [shape: s32[16,1], index: 1, kind: input, shape index: {}]   ;;  %s4825_s2 = inlined_call_operand.vmem [shape: f32[1,3], index: 2, kind: input, shape index: {}]   ;;  %s4826_s3 = inlined_call_operand.hbm [shape: f32[320,128], index: 3, kind: input, shape index: {}]   ;;  %s4827_s4 = inlined_call_operand.vmem [shape: f32[16,3], index: 4, kind: output, shape index: {0}]   ;;  %s4828_s5 = inlined_call_operand.vmem [shape: f32[1,3], index: 5, kind: output, shape index: {1}]  }
   0x1   :  { %s23_s19 = sshll.u32 %s4284_s18, 4  ;;  %s4260_s22 = scalar_lea.hbm %s4826_s3, 5120  ;;  %s24_s19 = int_to_ptr.vmem [resolvable:$true] %s23_s19 }
   0x2   :  { %p4261_p0 = scmp.ne.s32.totalorder %s4826_s3, %s4260_s22  ;;  %p4264_p1 = scmp.lt.u32.totalorder %s4260_s22, %s4826_s3 }
   0x4   :  { %p4266_p2 = pnand %p4264_p1, %p4261_p0 }
   0x6   :  { %4269 = shalt.err (!%p4266_p2)
}
   0x7   :  { %s4270_s27 = scalar_lea.vmem %s24_s19, 5120  ;;  %p4275_p4 = scmp.lt.s32.totalorder %s24_s19, %s24_s19 }
   0x8   :  { %p4271_p3 = scmp.ne.s32.totalorder %s24_s19, %s4270_s27  ;;  %p4276_p5 = scmp.lt.s32.totalorder %s4270_s27, %s4270_s27 }
   0xa   :  { %p4277_p6 = por %p4276_p5, %p4275_p4 }
   0xc   :  { %p4278_p7 = pnand %p4277_p6, %p4271_p3 }
   0xe   :  { %4281 = shalt.err (!%p4278_p7)
}
   0xf   :  { %s4285_s28 = smov 128   ;;  %s4286_s29 = smov 8  }
  0x10   :  { %29 = dma.hbm_to_vmem [thread:$0]  %s4826_s3, 5120, %s24_s19, [#allocation5], %s4285_s28, %s4285_s28, %s4286_s29  }
  0x11   :  { %4282 = dma.done.wait [#allocation5], 5120  }
  0x12   :  { %4283 = vsyncadd [#allocation5], 4294962176  ;;  %v4287_v0 = vmov 0.0   ;;  %vm4288_vm0 = vmmov 0   ;;  %v37_v1 = vld [vmem:[#allocation4] sm:$0xff]  ;;  %vm48_vm1 = vcmask 1043456  }
  0x13   :  { %3721 = vmatprep.subr.bf16.mxu0 %v4287_v0  ;;  %3723 = vmatprep.mubr.msk.bf16.mxu0 %vm4288_vm0, %v4287_v0  ;;  %v34_v2 = vld [vmem:[%s4823_s0] sm:$0xff]  ;;  %v35_v3 = vld [vmem:[%s4823_s0 + $0x8] sm:$0xff]  ;;  %v38_v4 = vpack.c.bf16 %v37_v1, %v37_v1  ;;  %vm44_vm2 = vcmask 64512   ;;  %v108_v7 = vld [vmem:[#allocation4 + $0x10] sm:$0xff]  ;;  %vm125_vm3 = vcmask 1041408   ;;  %vm121_vm6 = vcmask 293888  }
  0x14   :  { %3727 = vmatprep.subr.bf16.mxu1 %v4287_v0  ;;  %3733 = vmatprep.mubr.msk.bf16.mxu1 %vm4288_vm0, %v4287_v0  ;;  %v36_v6 = vpack.c.bf16 %v35_v3, %v34_v2  ;;  %v109_v8 = vld [vmem:[#allocation4 + $0x18] sm:$0xff]  ;;  %v110_v10 = vld [vmem:[#allocation4 + $0x20] sm:$0xff]  ;;  %v111_v11 = vld [vmem:[#allocation4 + $0x28] sm:$0xff]  ;;  %v4289_v45 = vmov 0.0|0.0   ;;  %s4290_s0 = smov 80   ;;  %vm362_vm11 = vcmask 582656  }
  0x15   :  { %v50_v5 = vsel %vm48_vm1, %v38_v4, 0  ;;  %v113_v9 = vpack.c.bf16 %v109_v8, %v108_v7  ;;  %v114_v12 = vpack.c.bf16 %v111_v11, %v110_v10  ;;  %v112_v13 = vld [vmem:[#allocation4 + $0x30] sm:$0xf]  ;;  %v3529_v16 = vld [vmem:[#allocation4 + $0x8] ss:$0 sm:$0xff]  ;;  %v185_v36 = vld [vmem:[#allocation4 + $0x40] sm:$0xff] }
  0x16   :  { %3722 = vmatpush3.bf16.msra.mxu0 %v50_v5  ;;  %v115_v14 = vpack.c.bf16 %v112_v13, %v112_v13  ;;  %v186_v37 = vld [vmem:[#allocation4 + $0x48] sm:$0xff]  ;;  %v187_v39 = vld [vmem:[#allocation4 + $0x50] sm:$0xff]  ;;  %v188_v40 = vld [vmem:[#allocation4 + $0x58] sm:$0xff]  ;;  %s4292_s10 = smov 48   ;;  %s4293_s11 = smov 104   ;;  %vm480_vm12 = vcmask 189440  }
  0x17   :  { %3737 = vmatprep.subr.bf16.mxu0 %v4287_v0  ;;  %3728 = vmatpush3.bf16.msra.mxu1 %v113_v9  ;;  %v190_v38 = vpack.c.bf16 %v186_v37, %v185_v36  ;;  %v191_v41 = vpack.c.bf16 %v188_v40, %v187_v39  ;;  %v189_v42 = vld [vmem:[#allocation4 + $0x60] sm:$0xf]  ;;  %v3533_v46 = vld [vmem:[#allocation4 + $0x38] ss:$0 sm:$0xff]  ;;  %v264_v7 = vld [vmem:[#allocation4 + $0x70] sm:$0xff]  ;;  %v324_v36 = vlaneseq  ;;  %vm376_vm13 = vcmask 195584  }
  0x18   :  { %3729 = vmatprep.subr.bf16.mxu1 %v4287_v0  ;;  %v127_v15 = vsel %vm125_vm3, %v115_v14, 0  ;;  %v192_v43 = vpack.c.bf16 %v189_v42, %v189_v42  ;;  %v259_v62 = vld [vmem:[#allocation4 + $0x78] sm:$0xff]  ;;  %v260_v63 = vld [vmem:[#allocation4 + $0x80] sm:$0xff]  ;;  %v265_v8 = vpack.c.bf16 %v264_v7, %v264_v7  ;;  %v3537_v10 = vld [vmem:[#allocation4 + $0x68] ss:$0 sm:$0xff]  ;;  %vm3363_vm14 = vcmask 23552  }
  0x19   :  { %3724 = vmatmul.mubr.msk.bf16.vlgmr.msra.gmra.mrb[0].mxu0 %vm44_vm2, %v36_v6  ;;  %v4365_v4 = vpack.c.bf16 %v260_v63, %v259_v62  ;;  %v4372_v6 = vld [vmem:[#allocation4 + $0x88] sm:$0xff]  ;;  %v3541_v39 = vld [vmem:[#allocation4 + $0x90] ss:$0 sm:$0xff] }
  0x1a   :  { %3743 = vmatprep.mubr.msk.bf16.mxu0 %vm4288_vm0, %v4287_v0  ;;  %3738 = vmatpush3.bf16.msra.mxu0 %v190_v38  ;;  %v202_v44 = vsel %vm125_vm3, %v192_v43, 0  ;;  %v275_v9 = vsel %vm48_vm1, %v265_v8, 0  ;;  %v4397_v38 = vshrl.u32 %v324_v36, 7  ;;  %vm3501_vm3 = vcmask 16384  }
  0x1b   :  { %3730 = vmatpush3.bf16.msra.mxu1 %v114_v12  ;;  %3739 = vmatprep.subr.bf16.mxu0 %v4287_v0 }
  0x1c   :  { %3731 = vmatprep.subr.bf16.mxu1 %v4287_v0 }
  0x1e   :  { %3740 = vmatpush3.bf16.msra.mxu0 %v191_v41 }
  0x1f   :  { %3732 = vmatpush3.bf16.msra.mxu1 %v127_v15  ;;  %3741 = vmatprep.subr.bf16.mxu0 %v4287_v0 }
  0x20   :  { %3747 = vmatprep.subr.bf16.mxu1 %v4287_v0 }
  0x22   :  { %3742 = vmatpush3.bf16.msra.mxu0 %v202_v44 }
  0x23   :  { %3994 = vmatprep.subr.bf16.mxu0 %v4289_v45 }
  0xec   :  { %v86_v17 = vpop.f32.mrb[0].mxu0 }
  0xed   :  { %v87_v18 = vadd.f32 %v3529_v16, %v86_v17  ;;  %v3725_v19 = vpop.f32.mrb[1].mxu0 }
  0xee   :  { %v89_v20 = vpop.f32.mrb[2].mxu0  ;;  %v4385_v19 = vld [vmem:[#allocation4 + $0x98] ss:$0 sm:$0xff] }
  0xef   :  { %v95_v21 = vmul.f32 1.442695, %v87_v18  ;;  %v90_v22 = vadd.f32 %v3529_v16, %v89_v20  ;;  %v3726_v23 = vpop.f32.mrb[3].mxu0  ;;  %vm93_vm4 = vcmp.gt.f32.partialorder %v87_v18, 0.0 }
  0xf1   :  { %4088 = vpow2.f32 %v95_v21  ;;  %v97_v24 = vmul.f32 1.442695, %v90_v22  ;;  %vm94_vm5 = vcmp.gt.f32.partialorder %v90_v22, 0.0 }
  0xf3   :  { %4090 = vpow2.f32 %v97_v24 }
  0xfb   :  { %v4089_v25 = vpop.eup %4088 }
  0xfc   :  { %v3531_v26 = vadd.f32 -1.0, %v4089_v25 }
  0xfd   :  { %v4091_v27 = vpop.eup %4090 }
  0xfe   :  { %v101_v28 = vmul.f32 1.6732632, %v3531_v26  ;;  %v3532_v29 = vadd.f32 -1.0, %v4091_v27 }
 0x100   :  { %v103_v30 = vsel %vm93_vm4, %v87_v18, %v101_v28  ;;  %v102_v31 = vmul.f32 1.6732632, %v3532_v29 }
 0x101   :  { %v105_v33 = vmul.f32 1.050701, %v103_v30 }
 0x102   :  { %v104_v32 = vsel %vm94_vm5, %v90_v22, %v102_v31 }
 0x103   :  { %v106_v34 = vmul.f32 1.050701, %v104_v32 }
 0x105   :  { %v107_v35 = vpack.c.bf16 %v106_v34, %v105_v33  ;;  %v4291_v34 = vmov 1983009808  }
 0x107   :  { %3734 = vmatmul.mubr.msk.bf16.vlgmr.msra.gmra.mrb[0].mxu1 %vm121_vm6, %v107_v35  ;;  %v322_v35 = vunpack.c.l.s4 %v4291_v34 }
 0x108   :  { %3749 = vmatprep.mubr.msk.bf16.mxu1 %vm4288_vm0, %v4287_v0  ;;  %3748 = vmatpush3.bf16.msra.mxu1 %v275_v9 }
 0x109   :  { %3997 = vmatprep.subr.bf16.mxu1 %v4289_v45  ;;  %v323_v37 = vunpack.c.0.s8 %v322_v35 }
 0x10b   :  { %v4400_v40 = vsub.s32 %v323_v37, %v4397_v38 }
 0x1da   :  { %v163_v47 = vpop.f32.mrb[0].mxu1 }
 0x1db   :  { %v164_v48 = vadd.f32 %v3533_v46, %v163_v47  ;;  %v3735_v49 = vpop.f32.mrb[1].mxu1 }
 0x1dc   :  { %v166_v50 = vpop.f32.mrb[2].mxu1 }
 0x1dd   :  { %v172_v51 = vmul.f32 1.442695, %v164_v48  ;;  %v167_v52 = vadd.f32 %v3533_v46, %v166_v50  ;;  %v3736_v53 = vpop.f32.mrb[3].mxu1  ;;  %vm170_vm7 = vcmp.gt.f32.partialorder %v164_v48, 0.0 }
 0x1df   :  { %4092 = vpow2.f32 %v172_v51  ;;  %v174_v54 = vmul.f32 1.442695, %v167_v52  ;;  %vm171_vm8 = vcmp.gt.f32.partialorder %v167_v52, 0.0 }
 0x1e1   :  { %4094 = vpow2.f32 %v174_v54 }
 0x1e9   :  { %v4093_v55 = vpop.eup %4092 }
 0x1ea   :  { %v3535_v56 = vadd.f32 -1.0, %v4093_v55 }
 0x1eb   :  { %v4095_v57 = vpop.eup %4094 }
 0x1ec   :  { %v178_v58 = vmul.f32 1.6732632, %v3535_v56  ;;  %v3536_v59 = vadd.f32 -1.0, %v4095_v57 }
 0x1ee   :  { %v180_v60 = vsel %vm170_vm7, %v164_v48, %v178_v58  ;;  %v179_v61 = vmul.f32 1.6732632, %v3536_v59 }
 0x1ef   :  { %v182_v2 = vmul.f32 1.050701, %v180_v60 }
 0x1f0   :  { %v181_v1 = vsel %vm171_vm8, %v167_v52, %v179_v61 }
 0x1f1   :  { %v183_v3 = vmul.f32 1.050701, %v181_v1 }
 0x1f3   :  { %v184_v5 = vpack.c.bf16 %v183_v3, %v182_v2 }
 0x1f5   :  { %3744 = vmatmul.mubr.msk.bf16.vlgmr.msra.gmra.mrb[4].mxu0 %vm121_vm6, %v184_v5 }
 0x1f6   :  { %3996 = vmatpush3.bf16.msra.mxu0 %v4365_v4  ;;  %3759 = vmatprep.mubr.msk.f32.mxu0 %vm4288_vm0, %v4287_v0 }
 0x1f7   :  { %3757 = vmatprep.subr.mxu0 %v4287_v0 }
 0x1fa   :  { %3758 = vmatpush3.msra.mxu0 %v4372_v6 }
 0x1fb   :  { %4000 = vmatprep.subr.bf16.mxu0 %v4289_v45 }
 0x1fd   :  { %3760 = vmatmul.mubr.f32.vlgmr.msra.gmra.mrb[8].mxu0 %v4287_v0 }
 0x1fe   :  { %4002 = vmatpush3.bf16.msra.mxu0 %v4365_v4  ;;  %3777 = vmatprep.mubr.msk.f32.mxu0 %vm4288_vm0, %v4287_v0 }
 0x1ff   :  { %3775 = vmatprep.subr.mxu0 %v4287_v0 }
 0x202   :  { %3776 = vmatpush3.msra.mxu0 %v4372_v6 }
 0x203   :  { %4006 = vmatprep.subr.bf16.mxu0 %v4289_v45 }
 0x2c8   :  { %v238_v11 = vpop.f32.mrb[4].mxu0 }
 0x2c9   :  { %v239_v12 = vadd.f32 %v3537_v10, %v238_v11  ;;  %v3745_v13 = vpop.f32.mrb[5].mxu0 }
 0x2ca   :  { %v241_v14 = vpop.f32.mrb[6].mxu0 }
 0x2cb   :  { %v247_v15 = vmul.f32 1.442695, %v239_v12  ;;  %v242_v16 = vadd.f32 %v3537_v10, %v241_v14  ;;  %v3746_v17 = vpop.f32.mrb[7].mxu0  ;;  %vm245_vm9 = vcmp.gt.f32.partialorder %v239_v12, 0.0 }
 0x2cd   :  { %4096 = vpow2.f32 %v247_v15  ;;  %v249_v18 = vmul.f32 1.442695, %v242_v16  ;;  %vm246_vm10 = vcmp.gt.f32.partialorder %v242_v16, 0.0 }
 0x2cf   :  { %4098 = vpow2.f32 %v249_v18 }
 0x2d0   :  { %v446_v20 = vpop.f32.mrb[8].mxu0 }
 0x2d1   :  { %v447_v21 = vadd.f32 %v4385_v19, %v446_v20  ;;  %v3761_v22 = vpop.f32.mrb[9].mxu0 }
 0x2d3   :  { %458 = vrot.lane.b32.xlu0 %v447_v21, %s4290_s0 }
 0x2d7   :  { %v4097_v23 = vpop.eup %4096 }
 0x2d8   :  { %v3539_v24 = vadd.f32 -1.0, %v4097_v23 }
 0x2d9   :  { %v4099_v25 = vpop.eup %4098 }
 0x2da   :  { %v253_v26 = vmul.f32 1.6732632, %v3539_v24  ;;  %v3540_v27 = vadd.f32 -1.0, %v4099_v25 }
 0x2dc   :  { %v255_v28 = vsel %vm245_vm9, %v239_v12, %v253_v26  ;;  %v254_v29 = vmul.f32 1.6732632, %v3540_v27 }
 0x2dd   :  { %v257_v31 = vmul.f32 1.050701, %v255_v28 }
 0x2de   :  { %v256_v30 = vsel %vm246_vm10, %v242_v16, %v254_v29 }
 0x2df   :  { %v258_v32 = vmul.f32 1.050701, %v256_v30 }
 0x2e1   :  { %v263_v33 = vpack.c.bf16 %v258_v32, %v257_v31 }
 0x2e3   :  { %3750 = vmatmul.mubr.msk.bf16.vlgmr.msra.gmra.mrb[4].mxu1 %vm44_vm2, %v263_v33 }
 0x2e4   :  { %3999 = vmatpush3.bf16.msra.mxu1 %v4365_v4  ;;  %3768 = vmatprep.mubr.msk.f32.mxu1 %vm4288_vm0, %v4287_v0 }
 0x2e5   :  { %3766 = vmatprep.subr.mxu1 %v4287_v0 }
 0x2e8   :  { %3767 = vmatpush3.msra.mxu1 %v4372_v6 }
 0x2e9   :  { %4003 = vmatprep.subr.bf16.mxu1 %v4289_v45 }
 0x345   :  { %v459_v63 = vpop.permute.xlu0 %458 }
 0x3b6   :  { %v311_v41 = vpop.f32.mrb[4].mxu1 }
 0x3b7   :  { %v312_v42 = vadd.f32 %v3541_v39, %v311_v41  ;;  %v3751_v43 = vpop.f32.mrb[5].mxu1 }
 0x3b8   :  { %v314_v44 = vpop.f32.mrb[6].mxu1 }
 0x3b9   :  { %v320_v46 = vcombine.high %v312_v42, %v312_v42  ;;  %v327_v47 = vrot.slane %v312_v42, %v4400_v40  ;;  %v315_v48 = vadd.f32 %v3541_v39, %v314_v44  ;;  %v3752_v49 = vpop.f32.mrb[7].mxu1 }
 0x3bb   :  { %v334_v50 = vrot.slane %v320_v46, %v4400_v40  ;;  %v335_v51 = vcombine.high %v327_v47, %v327_v47  ;;  %363 = vst.msk [vmem:[#allocation2] sm:$0x3] %vm362_vm11, %v327_v47  ;;  %v337_v52 = vcombine.high %v315_v48, %v315_v48  ;;  %v344_v53 = vrot.slane %v315_v48, %v4400_v40 }
 0x3bd   :  { %v336_v54 = vcombine.high %v334_v50, %v334_v50  ;;  %364 = vst.msk [vmem:[#allocation2 + $0x2] sm:$0x3] %vm362_vm11, %v335_v51  ;;  %365 = vst.msk [vmem:[#allocation2 + $0x4] sm:$0x3] %vm362_vm11, %v334_v50  ;;  %v351_v55 = vrot.slane %v337_v52, %v4400_v40  ;;  %v352_v56 = vcombine.high %v344_v53, %v344_v53 }
 0x3be   :  { %367 = vst.msk [vmem:[#allocation2 + $0x8] sm:$0x3] %vm362_vm11, %v344_v53 }
 0x3bf   :  { %366 = vst.msk [vmem:[#allocation2 + $0x6] sm:$0x3] %vm362_vm11, %v336_v54  ;;  %v353_v57 = vcombine.high %v351_v55, %v351_v55  ;;  %368 = vst.msk [vmem:[#allocation2 + $0xa] sm:$0x3] %vm362_vm11, %v352_v56 }
 0x3c0   :  { %369 = vst.msk [vmem:[#allocation2 + $0xc] sm:$0x3] %vm362_vm11, %v351_v55 }
 0x3c1   :  { %370 = vst.msk [vmem:[#allocation2 + $0xe] sm:$0x3] %vm362_vm11, %v353_v57 }
 0x3c2   :  { %v371_v58 = vld [vmem:[#allocation2] sm:$0x3] }
 0x3c3   :  { %v450_v59 = vadd.f32 %v447_v21, %v371_v58 }
 0x3c4   :  { %v483_v17 = vld [vmem:[#allocation2 + $0x2] sm:$0x3]  ;;  %v589_v41 = vld [vmem:[#allocation2 + $0x4] sm:$0x3] }
 0x3c5   :  { %v3544_v60 = vmul.f32 -1.442695, %v450_v59 }
 0x3c7   :  { %4100 = vpow2.f32 %v3544_v60 }
 0x3d1   :  { %v4101_v61 = vpop.eup %4100 }
 0x3d2   :  { %v454_v62 = vadd.f32 1.0, %v4101_v61 }
 0x3d4   :  { %4102 = vrcp.f32 %v454_v62  ;;  %v695_v62 = vld [vmem:[#allocation2 + $0x6] sm:$0x3] }
 0x3de   :  { %v4103_v1 = vpop.eup %4102 }
 0x3df   :  { %v461_v2 = vmul.f32 %v4103_v1, %v459_v63  ;;  %v468_v8 = vsub.f32 1.0, %v4103_v1  ;;  %v474_v10 = vmul.f32 0.0, %v4103_v1 }
 0x3e1   :  { %463 = vrot.lane.b32.xlu0 %v461_v2, %s4292_s10 }
 0x453   :  { %v464_v3 = vpop.permute.xlu0 %463 }
 0x454   :  { %v466_v5 = vadd.f32 %v464_v3, %v371_v58 }
 0x456   :  { %4104 = vtanh.f32 %v466_v5 }
 0x460   :  { %v4105_v7 = vpop.eup %4104 }
 0x461   :  { %470 = vrot.lane.b32.xlu1 %v4105_v7, %s4293_s11 }
 0x4d3   :  { %v471_v9 = vpop.permute.xlu1 %470 }
 0x4d4   :  { %v473_v11 = vmul.f32 %v471_v9, %v468_v8 }
 0x4d6   :  { %v475_v12 = vadd.f32 %v474_v10, %v473_v11 }
 0x4d8   :  { %477 = vrot.lane.b32.xlu1 %v475_v12, %s4293_s11 }
 0x54a   :  { %v478_v13 = vpop.permute.xlu1 %477 }
 0x54b   :  { %481 = vst.msk [vmem:[#allocation3] sm:$0x3] %vm480_vm12, %v478_v13  ;;  %3769 = vmatmul.mubr.msk.f32.vlgmr.msra.gmra.mrb[8].mxu1 %vm376_vm13, %v478_v13 }
 0x54c   :  { %4005 = vmatpush3.bf16.msra.mxu1 %v4365_v4  ;;  %3786 = vmatprep.mubr.msk.f32.mxu1 %vm4288_vm0, %v4287_v0 }
 0x54d   :  { %3784 = vmatprep.subr.mxu1 %v4287_v0 }
 0x550   :  { %3785 = vmatpush3.msra.mxu1 %v4372_v6 }
 0x551   :  { %4009 = vmatprep.subr.bf16.mxu1 %v4289_v45 }
 0x61e   :  { %v552_v14 = vpop.f32.mrb[8].mxu1 }
 0x61f   :  { %v553_v15 = vadd.f32 %v4385_v19, %v552_v14  ;;  %v3770_v16 = vpop.f32.mrb[9].mxu1 }
 0x621   :  { %564 = vrot.lane.b32.xlu0 %v553_v15, %s4290_s0  ;;  %v556_v18 = vadd.f32 %v553_v15, %v483_v17 }
 0x623   :  { %v3546_v20 = vmul.f32 -1.442695, %v556_v18 }
 0x625   :  { %4106 = vpow2.f32 %v3546_v20 }
 0x62f   :  { %v4107_v21 = vpop.eup %4106 }
 0x630   :  { %v560_v22 = vadd.f32 1.0, %v4107_v21 }
 0x632   :  { %4108 = vrcp.f32 %v560_v22  ;;  %v801_v22 = vld [vmem:[#allocation2 + $0x8] sm:$0x3] }
 0x63c   :  { %v4109_v23 = vpop.eup %4108 }
 0x63d   :  { %v574_v29 = vsub.f32 1.0, %v4109_v23  ;;  %v580_v31 = vmul.f32 %v4109_v23, %v475_v12 }
 0x693   :  { %v565_v24 = vpop.permute.xlu0 %564 }
 0x694   :  { %v567_v25 = vmul.f32 %v4109_v23, %v565_v24 }
 0x696   :  { %569 = vrot.lane.b32.xlu1 %v567_v25, %s4292_s10 }
 0x708   :  { %v570_v26 = vpop.permute.xlu1 %569 }
 0x709   :  { %v572_v27 = vadd.f32 %v570_v26, %v483_v17 }
 0x70b   :  { %4110 = vtanh.f32 %v572_v27 }
 0x715   :  { %v4111_v28 = vpop.eup %4110 }
 0x716   :  { %576 = vrot.lane.b32.xlu0 %v4111_v28, %s4293_s11 }
 0x788   :  { %v577_v30 = vpop.permute.xlu0 %576 }
 0x789   :  { %v579_v32 = vmul.f32 %v577_v30, %v574_v29 }
 0x78b   :  { %v581_v33 = vadd.f32 %v580_v31, %v579_v32 }
 0x78d   :  { %583 = vrot.lane.b32.xlu1 %v581_v33, %s4293_s11 }
 0x7ff   :  { %v584_v34 = vpop.permute.xlu1 %583 }
 0x800   :  { %587 = vst.msk [vmem:[#allocation3 + $0x2] sm:$0x3] %vm480_vm12, %v584_v34  ;;  %3778 = vmatmul.mubr.msk.f32.vlgmr.msra.gmra.mrb[10].mxu0 %vm376_vm13, %v584_v34 }
 0x801   :  { %4008 = vmatpush3.bf16.msra.mxu0 %v4365_v4  ;;  %3795 = vmatprep.mubr.msk.f32.mxu0 %vm4288_vm0, %v4287_v0 }
 0x802   :  { %3793 = vmatprep.subr.mxu0 %v4287_v0 }
 0x805   :  { %3794 = vmatpush3.msra.mxu0 %v4372_v6 }
 0x806   :  { %4012 = vmatprep.subr.bf16.mxu0 %v4289_v45 }
 0x8d3   :  { %v658_v35 = vpop.f32.mrb[10].mxu0 }
 0x8d4   :  { %v659_v37 = vadd.f32 %v4385_v19, %v658_v35  ;;  %v3779_v39 = vpop.f32.mrb[11].mxu0 }
 0x8d6   :  { %670 = vrot.lane.b32.xlu0 %v659_v37, %s4290_s0  ;;  %v662_v42 = vadd.f32 %v659_v37, %v589_v41 }
 0x8d8   :  { %v3548_v43 = vmul.f32 -1.442695, %v662_v42 }
 0x8da   :  { %4112 = vpow2.f32 %v3548_v43 }
 0x8e4   :  { %v4113_v44 = vpop.eup %4112 }
 0x8e5   :  { %v666_v46 = vadd.f32 1.0, %v4113_v44 }
 0x8e7   :  { %4114 = vrcp.f32 %v666_v46  ;;  %v907_v46 = vld [vmem:[#allocation2 + $0xa] sm:$0x3] }
 0x8f1   :  { %v4115_v47 = vpop.eup %4114 }
 0x8f2   :  { %v680_v53 = vsub.f32 1.0, %v4115_v47  ;;  %v686_v55 = vmul.f32 %v4115_v47, %v581_v33 }
 0x948   :  { %v671_v48 = vpop.permute.xlu0 %670 }
 0x949   :  { %v673_v49 = vmul.f32 %v4115_v47, %v671_v48 }
 0x94b   :  { %675 = vrot.lane.b32.xlu1 %v673_v49, %s4292_s10 }
 0x9bd   :  { %v676_v50 = vpop.permute.xlu1 %675 }
 0x9be   :  { %v678_v51 = vadd.f32 %v676_v50, %v589_v41 }
 0x9c0   :  { %4116 = vtanh.f32 %v678_v51 }
 0x9ca   :  { %v4117_v52 = vpop.eup %4116 }
 0x9cb   :  { %682 = vrot.lane.b32.xlu0 %v4117_v52, %s4293_s11 }
 0xa3d   :  { %v683_v54 = vpop.permute.xlu0 %682 }
 0xa3e   :  { %v685_v56 = vmul.f32 %v683_v54, %v680_v53 }
 0xa40   :  { %v687_v57 = vadd.f32 %v686_v55, %v685_v56 }
 0xa42   :  { %689 = vrot.lane.b32.xlu1 %v687_v57, %s4293_s11 }
 0xab4   :  { %v690_v58 = vpop.permute.xlu1 %689 }
 0xab5   :  { %693 = vst.msk [vmem:[#allocation3 + $0x4] sm:$0x3] %vm480_vm12, %v690_v58  ;;  %3787 = vmatmul.mubr.msk.f32.vlgmr.msra.gmra.mrb[10].mxu1 %vm376_vm13, %v690_v58 }
 0xab6   :  { %4011 = vmatpush3.bf16.msra.mxu1 %v4365_v4  ;;  %3804 = vmatprep.mubr.msk.f32.mxu1 %vm4288_vm0, %v4287_v0 }
 0xab7   :  { %3802 = vmatprep.subr.mxu1 %v4287_v0 }
 0xaba   :  { %3803 = vmatpush3.msra.mxu1 %v4372_v6 }
 0xabb   :  { %4015 = vmatprep.subr.bf16.mxu1 %v4289_v45 }
 0xb88   :  { %v764_v59 = vpop.f32.mrb[10].mxu1 }
 0xb89   :  { %v765_v60 = vadd.f32 %v4385_v19, %v764_v59  ;;  %v3788_v61 = vpop.f32.mrb[11].mxu1 }
 0xb8b   :  { %776 = vrot.lane.b32.xlu0 %v765_v60, %s4290_s0  ;;  %v768_v63 = vadd.f32 %v765_v60, %v695_v62 }
 0xb8d   :  { %v3550_v1 = vmul.f32 -1.442695, %v768_v63 }
 0xb8f   :  { %4118 = vpow2.f32 %v3550_v1  ;;  %v1013_v1 = vld [vmem:[#allocation2 + $0xc] sm:$0x3] }
 0xb99   :  { %v4119_v2 = vpop.eup %4118 }
 0xb9a   :  { %v772_v3 = vadd.f32 1.0, %v4119_v2 }
 0xb9c   :  { %4120 = vrcp.f32 %v772_v3 }
 0xba6   :  { %v4121_v5 = vpop.eup %4120 }
 0xba7   :  { %v786_v12 = vsub.f32 1.0, %v4121_v5  ;;  %v792_v14 = vmul.f32 %v4121_v5, %v687_v57 }
 0xbfd   :  { %v777_v7 = vpop.permute.xlu0 %776 }
 0xbfe   :  { %v779_v8 = vmul.f32 %v4121_v5, %v777_v7 }
 0xc00   :  { %781 = vrot.lane.b32.xlu1 %v779_v8, %s4292_s10 }
 0xc72   :  { %v782_v9 = vpop.permute.xlu1 %781 }
 0xc73   :  { %v784_v10 = vadd.f32 %v782_v9, %v695_v62 }
 0xc75   :  { %4122 = vtanh.f32 %v784_v10 }
 0xc7f   :  { %v4123_v11 = vpop.eup %4122 }
 0xc80   :  { %788 = vrot.lane.b32.xlu0 %v4123_v11, %s4293_s11 }
 0xcf2   :  { %v789_v13 = vpop.permute.xlu0 %788 }
 0xcf3   :  { %v791_v15 = vmul.f32 %v789_v13, %v786_v12 }
 0xcf5   :  { %v793_v16 = vadd.f32 %v792_v14, %v791_v15 }
 0xcf7   :  { %795 = vrot.lane.b32.xlu1 %v793_v16, %s4293_s11 }
 0xd69   :  { %v796_v17 = vpop.permute.xlu1 %795 }
 0xd6a   :  { %799 = vst.msk [vmem:[#allocation3 + $0x6] sm:$0x3] %vm480_vm12, %v796_v17  ;;  %3796 = vmatmul.mubr.msk.f32.vlgmr.msra.gmra.mrb[12].mxu0 %vm376_vm13, %v796_v17 }
 0xd6b   :  { %4014 = vmatpush3.bf16.msra.mxu0 %v4365_v4  ;;  %3813 = vmatprep.mubr.msk.f32.mxu0 %vm4288_vm0, %v4287_v0 }
 0xd6c   :  { %3811 = vmatprep.subr.mxu0 %v4287_v0 }
 0xd6f   :  { %3812 = vmatpush3.msra.mxu0 %v4372_v6 }
 0xd70   :  { %3825 = vmatprep.subr.bf16.mxu0 %v4287_v0 }
 0xe3d   :  { %v870_v18 = vpop.f32.mrb[12].mxu0 }
 0xe3e   :  { %v871_v20 = vadd.f32 %v4385_v19, %v870_v18  ;;  %v3797_v21 = vpop.f32.mrb[13].mxu0 }
 0xe40   :  { %882 = vrot.lane.b32.xlu0 %v871_v20, %s4290_s0  ;;  %v874_v23 = vadd.f32 %v871_v20, %v801_v22 }
 0xe42   :  { %v3552_v24 = vmul.f32 -1.442695, %v874_v23 }
 0xe44   :  { %4124 = vpow2.f32 %v3552_v24  ;;  %v1119_v24 = vld [vmem:[#allocation2 + $0xe] sm:$0x3] }
 0xe4e   :  { %v4125_v25 = vpop.eup %4124 }
 0xe4f   :  { %v878_v26 = vadd.f32 1.0, %v4125_v25 }
 0xe51   :  { %4126 = vrcp.f32 %v878_v26 }
 0xe5b   :  { %v4127_v27 = vpop.eup %4126 }
 0xe5c   :  { %v892_v33 = vsub.f32 1.0, %v4127_v27  ;;  %v898_v35 = vmul.f32 %v4127_v27, %v793_v16 }
 0xeb2   :  { %v883_v28 = vpop.permute.xlu0 %882 }
 0xeb3   :  { %v885_v29 = vmul.f32 %v4127_v27, %v883_v28 }
 0xeb5   :  { %887 = vrot.lane.b32.xlu1 %v885_v29, %s4292_s10 }
 0xf27   :  { %v888_v30 = vpop.permute.xlu1 %887 }
 0xf28   :  { %v890_v31 = vadd.f32 %v888_v30, %v801_v22 }
 0xf2a   :  { %4128 = vtanh.f32 %v890_v31 }
 0xf34   :  { %v4129_v32 = vpop.eup %4128 }
 0xf35   :  { %894 = vrot.lane.b32.xlu0 %v4129_v32, %s4293_s11 }
 0xfa7   :  { %v895_v34 = vpop.permute.xlu0 %894 }
 0xfa8   :  { %v897_v37 = vmul.f32 %v895_v34, %v892_v33  ;;  %v1232_v34 = vld [vmem:[#allocation4 + $0xb8] sm:$0xff] }
 0xfaa   :  { %v899_v39 = vadd.f32 %v898_v35, %v897_v37  ;;  %v4502_v37 = vld [vmem:[#allocation4 + $0xc8] sm:$0xff] }
 0xfac   :  { %901 = vrot.lane.b32.xlu1 %v899_v39, %s4293_s11 }
0x101e   :  { %v902_v41 = vpop.permute.xlu1 %901 }
0x101f   :  { %905 = vst.msk [vmem:[#allocation3 + $0x8] sm:$0x3] %vm480_vm12, %v902_v41  ;;  %3805 = vmatmul.mubr.msk.f32.vlgmr.msra.gmra.mrb[12].mxu1 %vm376_vm13, %v902_v41  ;;  %v1281_v41 = vld [vmem:[#allocation4 + $0xa0] sm:$0xff] }
0x1020   :  { %4017 = vmatpush3.bf16.msra.mxu1 %v4365_v4  ;;  %3822 = vmatprep.mubr.msk.f32.mxu1 %vm4288_vm0, %v4287_v0 }
0x1021   :  { %3820 = vmatprep.subr.mxu1 %v4287_v0 }
0x1024   :  { %3821 = vmatpush3.msra.mxu1 %v4372_v6 }
0x1025   :  { %4018 = vmatprep.subr.bf16.mxu1 %v4289_v45 }
0x10f2   :  { %v976_v42 = vpop.f32.mrb[12].mxu1 }
0x10f3   :  { %v977_v43 = vadd.f32 %v4385_v19, %v976_v42  ;;  %v3806_v44 = vpop.f32.mrb[13].mxu1  ;;  %v1282_v42 = vld [vmem:[#allocation4 + $0xa8] sm:$0xff] }
0x10f4   :  { %v1284_v44 = vpack.c.bf16 %v1282_v42, %v1281_v41 }
0x10f5   :  { %988 = vrot.lane.b32.xlu0 %v977_v43, %s4290_s0  ;;  %v980_v47 = vadd.f32 %v977_v43, %v907_v46  ;;  %v1283_v43 = vld [vmem:[#allocation4 + $0xb0] sm:$0xff] }
0x10f7   :  { %v3554_v48 = vmul.f32 -1.442695, %v980_v47 }
0x10f9   :  { %4130 = vpow2.f32 %v3554_v48 }
0x1103   :  { %v4131_v4 = vpop.eup %4130 }
0x1104   :  { %v984_v49 = vadd.f32 1.0, %v4131_v4 }
0x1106   :  { %4132 = vrcp.f32 %v984_v49 }
0x1110   :  { %v4133_v50 = vpop.eup %4132 }
0x1111   :  { %v998_v55 = vsub.f32 1.0, %v4133_v50  ;;  %v1004_v57 = vmul.f32 %v4133_v50, %v899_v39 }
0x1167   :  { %v989_v51 = vpop.permute.xlu0 %988 }
0x1168   :  { %v991_v52 = vmul.f32 %v4133_v50, %v989_v51 }
0x116a   :  { %993 = vrot.lane.b32.xlu1 %v991_v52, %s4292_s10  ;;  %v4518_v52 = vld [vmem:[#allocation4 + $0xd8] ss:$0 sm:$0xff] }
0x11dc   :  { %v994_v6 = vpop.permute.xlu1 %993 }
0x11dd   :  { %v996_v53 = vadd.f32 %v994_v6, %v907_v46  ;;  %v1285_v46 = vpack.c.bf16 %v1283_v43, %v1283_v43 }
0x11df   :  { %4134 = vtanh.f32 %v996_v53  ;;  %v1295_v47 = vsel %vm48_vm1, %v1285_v46, 0 }
0x11e9   :  { %v4135_v54 = vpop.eup %4134 }
0x11ea   :  { %1000 = vrot.lane.b32.xlu0 %v4135_v54, %s4293_s11 }
0x125c   :  { %v1001_v56 = vpop.permute.xlu0 %1000 }
0x125d   :  { %v1003_v58 = vmul.f32 %v1001_v56, %v998_v55  ;;  %v1227_v56 = vld [vmem:[#allocation3 + $0x6] sm:$0x3] }
0x125f   :  { %v1005_v59 = vadd.f32 %v1004_v57, %v1003_v58  ;;  %v1225_v57 = vld [vmem:[#allocation3 + $0x2] sm:$0x3]  ;;  %v1226_v58 = vld [vmem:[#allocation3 + $0x4] sm:$0x3] }
0x1261   :  { %1007 = vrot.lane.b32.xlu1 %v1005_v59, %s4293_s11 }
0x12d3   :  { %v1008_v60 = vpop.permute.xlu1 %1007 }
0x12d4   :  { %1011 = vst.msk [vmem:[#allocation3 + $0xa] sm:$0x3] %vm480_vm12, %v1008_v60  ;;  %3814 = vmatmul.mubr.msk.f32.vlgmr.msra.gmra.mrb[14].mxu0 %vm376_vm13, %v1008_v60  ;;  %v1245_v60 = vcombine.low %v1226_v58, %v1227_v56 }
0x12d5   :  { %3829 = vmatprep.mubr.msk.bf16.mxu0 %vm4288_vm0, %v4287_v0  ;;  %3826 = vmatpush3.bf16.msra.mxu0 %v1284_v44 }
0x12d6   :  { %3827 = vmatprep.subr.bf16.mxu0 %v4287_v0 }
0x12d9   :  { %3828 = vmatpush3.bf16.msra.mxu0 %v1295_v47 }
0x12da   :  { %4021 = vmatprep.subr.bf16.mxu0 %v4289_v45 }
0x13a7   :  { %v1082_v61 = vpop.f32.mrb[14].mxu0 }
0x13a8   :  { %v1083_v62 = vadd.f32 %v4385_v19, %v1082_v61  ;;  %v3815_v63 = vpop.f32.mrb[15].mxu0  ;;  %v1224_v61 = vld [vmem:[#allocation3] sm:$0x3] }
0x13a9   :  { %v1244_v63 = vcombine.low %v1224_v61, %v1225_v57 }
0x13aa   :  { %1094 = vrot.lane.b32.xlu0 %v1083_v62, %s4290_s0  ;;  %v1086_v2 = vadd.f32 %v1083_v62, %v1013_v1  ;;  %v1228_v62 = vld [vmem:[#allocation3 + $0x8] sm:$0x3] }
0x13ac   :  { %v3556_v3 = vmul.f32 -1.442695, %v1086_v2 }
0x13ae   :  { %4136 = vpow2.f32 %v3556_v3 }
0x13b8   :  { %v4137_v5 = vpop.eup %4136 }
0x13b9   :  { %v1090_v7 = vadd.f32 1.0, %v4137_v5  ;;  %v1259_v5 = vrot.slane %v1245_v60, %v4400_v40 }
0x13bb   :  { %4138 = vrcp.f32 %v1090_v7 }
0x13c5   :  { %v4139_v8 = vpop.eup %4138 }
0x13c6   :  { %v1104_v14 = vsub.f32 1.0, %v4139_v8  ;;  %v1110_v16 = vmul.f32 %v4139_v8, %v1005_v59  ;;  %v1229_v59 = vld [vmem:[#allocation3 + $0xa] sm:$0x3] }
0x141c   :  { %v1095_v9 = vpop.permute.xlu0 %1094 }
0x141d   :  { %v1097_v10 = vmul.f32 %v4139_v8, %v1095_v9  ;;  %v1252_v8 = vrot.slane %v1244_v63, %v4400_v40 }
0x141f   :  { %1099 = vrot.lane.b32.xlu1 %v1097_v10, %s4292_s10 }
0x1491   :  { %v1100_v11 = vpop.permute.xlu1 %1099 }
0x1492   :  { %v1102_v12 = vadd.f32 %v1100_v11, %v1013_v1  ;;  %v1261_v1 = vcombine.low %v1228_v62, %v1229_v59  ;;  %v1260_v11 = vcombine.low %v1252_v8, %v1259_v5 }
0x1494   :  { %4140 = vtanh.f32 %v1102_v12  ;;  %v1269_v9 = vrot.slane %v1261_v1, %v4400_v40 }
0x149e   :  { %v4141_v13 = vpop.eup %4140 }
0x149f   :  { %1106 = vrot.lane.b32.xlu0 %v4141_v13, %s4293_s11 }
0x1511   :  { %v1107_v15 = vpop.permute.xlu0 %1106 }
0x1512   :  { %v1109_v17 = vmul.f32 %v1107_v15, %v1104_v14  ;;  %v3559_v14 = vld [vmem:[#allocation4 + $0xd0] ss:$0 sm:$0xff] }
0x1514   :  { %v1111_v18 = vadd.f32 %v1110_v16, %v1109_v17 }
0x1516   :  { %1113 = vrot.lane.b32.xlu1 %v1111_v18, %s4293_s11 }
0x1588   :  { %v1114_v20 = vpop.permute.xlu1 %1113 }
0x1589   :  { %1117 = vst.msk [vmem:[#allocation3 + $0xc] sm:$0x3] %vm480_vm12, %v1114_v20  ;;  %3823 = vmatmul.mubr.msk.f32.vlgmr.msra.gmra.mrb[14].mxu1 %vm376_vm13, %v1114_v20 }
0x158a   :  { %3839 = vmatprep.mubr.msk.f32.mxu1 %vm4288_vm0, %v4287_v0 }
0x1590   :  { %v1230_v2 = vld [vmem:[#allocation3 + $0xc] sm:$0x3] }
0x165c   :  { %v1188_v21 = vpop.f32.mrb[14].mxu1 }
0x165d   :  { %v1189_v22 = vadd.f32 %v4385_v19, %v1188_v21  ;;  %v3824_v23 = vpop.f32.mrb[15].mxu1  ;;  %v1233_v19 = vld [vmem:[#allocation4 + $0xc0] sm:$0xff] }
0x165e   :  { %v4498_v35 = vpack.c.bf16 %v1233_v19, %v1232_v34 }
0x165f   :  { %1200 = vrot.lane.b32.xlu0 %v1189_v22, %s4290_s0  ;;  %v1192_v25 = vadd.f32 %v1189_v22, %v1119_v24 }
0x1660   :  { %4020 = vmatpush3.bf16.msra.mxu1 %v4498_v35 }
0x1661   :  { %v3558_v26 = vmul.f32 -1.442695, %v1192_v25  ;;  %3837 = vmatprep.subr.mxu1 %v4287_v0 }
0x1663   :  { %4142 = vpow2.f32 %v3558_v26 }
0x1664   :  { %3838 = vmatpush3.msra.mxu1 %v4502_v37 }
0x1665   :  { %3840 = vmatmul.mubr.f32.vlgmr.msra.gmra.mrb[16].mxu1 %v4287_v0  ;;  %4024 = vmatprep.subr.bf16.mxu1 %v4289_v45 }
0x1666   :  { %4026 = vmatpush3.bf16.msra.mxu1 %v4498_v35  ;;  %3857 = vmatprep.mubr.msk.f32.mxu1 %vm4288_vm0, %v4287_v0 }
0x1667   :  { %3855 = vmatprep.subr.mxu1 %v4287_v0 }
0x166a   :  { %3856 = vmatpush3.msra.mxu1 %v4502_v37 }
0x166b   :  { %4030 = vmatprep.subr.bf16.mxu1 %v4289_v45 }
0x166d   :  { %v4143_v27 = vpop.eup %4142 }
0x166e   :  { %v1196_v28 = vadd.f32 1.0, %v4143_v27 }
0x1670   :  { %4144 = vrcp.f32 %v1196_v28 }
0x167a   :  { %v4145_v29 = vpop.eup %4144 }
0x167b   :  { %v1210_v48 = vsub.f32 1.0, %v4145_v29  ;;  %v1216_v49 = vmul.f32 %v4145_v29, %v1111_v18 }
0x16d1   :  { %v1201_v30 = vpop.permute.xlu0 %1200 }
0x16d2   :  { %v1203_v31 = vmul.f32 %v4145_v29, %v1201_v30 }
0x16d4   :  { %1205 = vrot.lane.b32.xlu1 %v1203_v31, %s4292_s10 }
0x1738   :  { %v1461_v6 = vpop.f32.mrb[16].mxu1 }
0x1739   :  { %v1462_v53 = vadd.f32 %v4518_v52, %v1461_v6  ;;  %v3841_v54 = vpop.f32.mrb[17].mxu1 }
0x1746   :  { %v1206_v32 = vpop.permute.xlu1 %1205 }
0x1747   :  { %v1208_v33 = vadd.f32 %v1206_v32, %v1119_v24 }
0x1749   :  { %4146 = vtanh.f32 %v1208_v33 }
0x1753   :  { %v4147_v39 = vpop.eup %4146 }
0x1754   :  { %1212 = vrot.lane.b32.xlu0 %v4147_v39, %s4293_s11 }
0x1758   :  { %1473 = vrot.lane.b32.xlu0 %v1462_v53, %s4290_s0 }
0x17c6   :  { %v1213_v4 = vpop.permute.xlu0 %1212 }
0x17c7   :  { %v1215_v50 = vmul.f32 %v1213_v4, %v1210_v48 }
0x17c9   :  { %v1217_v51 = vadd.f32 %v1216_v49, %v1215_v50 }
0x17ca   :  { %v1474_v41 = vpop.permute.xlu0 %1473 }
0x17cb   :  { %1219 = vrot.lane.b32.xlu1 %v1217_v51, %s4293_s11 }
0x183d   :  { %v1220_v55 = vpop.permute.xlu1 %1219 }
0x183e   :  { %1223 = vst.msk [vmem:[#allocation3 + $0xe] sm:$0x3] %vm480_vm12, %v1220_v55 }
0x1845   :  { %v1231_v3 = vld [vmem:[#allocation3 + $0xe] sm:$0x3] }
0x1846   :  { %v1262_v7 = vcombine.low %v1230_v2, %v1231_v3 }
0x1848   :  { %v1276_v10 = vrot.slane %v1262_v7, %v4400_v40 }
0x184a   :  { %v1277_v12 = vcombine.low %v1269_v9, %v1276_v10 }
0x184c   :  { %v1280_v13 = vpack.c.bf16 %v1277_v12, %v1260_v11 }
0x184e   :  { %3830 = vmatmul.mubr.msk.bf16.vlgmr.msra.gmra.mrb[16].mxu0 %vm376_vm13, %v1280_v13 }
0x184f   :  { %4023 = vmatpush3.bf16.msra.mxu0 %v4498_v35  ;;  %3848 = vmatprep.mubr.msk.f32.mxu0 %vm4288_vm0, %v4287_v0 }
0x1850   :  { %3846 = vmatprep.subr.mxu0 %v4287_v0 }
0x1853   :  { %3847 = vmatpush3.msra.mxu0 %v4502_v37 }
0x1854   :  { %4027 = vmatprep.subr.bf16.mxu0 %v4289_v45 }
0x1921   :  { %v1331_v15 = vpop.f32.mrb[16].mxu0 }
0x1922   :  { %v1332_v16 = vadd.f32 %v3559_v14, %v1331_v15  ;;  %v3831_v17 = vpop.f32.mrb[17].mxu0 }
0x1923   :  { %v1334_v18 = vpop.f32.mrb[18].mxu0 }
0x1924   :  { %v1340_v20 = vcombine.high %v1332_v16, %v1332_v16  ;;  %v1347_v21 = vrot.slane %v1332_v16, %v4400_v40  ;;  %v1335_v22 = vadd.f32 %v3559_v14, %v1334_v18  ;;  %v3832_v23 = vpop.f32.mrb[19].mxu0 }
0x1926   :  { %v1354_v24 = vrot.slane %v1340_v20, %v4400_v40  ;;  %v1355_v25 = vcombine.high %v1347_v21, %v1347_v21  ;;  %1382 = vst.msk [vmem:[#allocation2] sm:$0x3] %vm362_vm11, %v1347_v21  ;;  %v1357_v26 = vcombine.high %v1335_v22, %v1335_v22  ;;  %v1364_v27 = vrot.slane %v1335_v22, %v4400_v40 }
0x1928   :  { %v1356_v28 = vcombine.high %v1354_v24, %v1354_v24  ;;  %1383 = vst.msk [vmem:[#allocation2 + $0x2] sm:$0x3] %vm362_vm11, %v1355_v25  ;;  %1384 = vst.msk [vmem:[#allocation2 + $0x4] sm:$0x3] %vm362_vm11, %v1354_v24  ;;  %v1371_v29 = vrot.slane %v1357_v26, %v4400_v40  ;;  %v1372_v30 = vcombine.high %v1364_v27, %v1364_v27 }
0x1929   :  { %1386 = vst.msk [vmem:[#allocation2 + $0x8] sm:$0x3] %vm362_vm11, %v1364_v27 }
0x192a   :  { %1385 = vst.msk [vmem:[#allocation2 + $0x6] sm:$0x3] %vm362_vm11, %v1356_v28  ;;  %v1373_v31 = vcombine.high %v1371_v29, %v1371_v29  ;;  %1387 = vst.msk [vmem:[#allocation2 + $0xa] sm:$0x3] %vm362_vm11, %v1372_v30 }
0x192b   :  { %1388 = vst.msk [vmem:[#allocation2 + $0xc] sm:$0x3] %vm362_vm11, %v1371_v29 }
0x192c   :  { %1389 = vst.msk [vmem:[#allocation2 + $0xe] sm:$0x3] %vm362_vm11, %v1373_v31 }
0x192d   :  { %v1390_v32 = vld [vmem:[#allocation2] sm:$0x3] }
0x192e   :  { %v1465_v33 = vadd.f32 %v1462_v53, %v1390_v32 }
0x192f   :  { %v1496_v56 = vld [vmem:[#allocation2 + $0x2] sm:$0x3]  ;;  %v1600_v15 = vld [vmem:[#allocation2 + $0x4] sm:$0x3] }
0x1930   :  { %v3562_v34 = vmul.f32 -1.442695, %v1465_v33 }
0x1932   :  { %4148 = vpow2.f32 %v3562_v34 }
0x193c   :  { %v4149_v19 = vpop.eup %4148 }
0x193d   :  { %v1469_v39 = vadd.f32 1.0, %v4149_v19 }
0x193f   :  { %4150 = vrcp.f32 %v1469_v39  ;;  %v1704_v39 = vld [vmem:[#allocation2 + $0x6] sm:$0x3] }
0x1949   :  { %v4151_v42 = vpop.eup %4150 }
0x194a   :  { %v1476_v43 = vmul.f32 %v4151_v42, %v1474_v41  ;;  %v1483_v48 = vsub.f32 1.0, %v4151_v42  ;;  %v1489_v49 = vmul.f32 0.0, %v4151_v42 }
0x194c   :  { %1478 = vrot.lane.b32.xlu1 %v1476_v43, %s4292_s10 }
0x19be   :  { %v1479_v44 = vpop.permute.xlu1 %1478 }
0x19bf   :  { %v1481_v46 = vadd.f32 %v1479_v44, %v1390_v32 }
0x19c1   :  { %4152 = vtanh.f32 %v1481_v46 }
0x19cb   :  { %v4153_v47 = vpop.eup %4152 }
0x19cc   :  { %1485 = vrot.lane.b32.xlu0 %v4153_v47, %s4293_s11 }
0x1a3e   :  { %v1486_v4 = vpop.permute.xlu0 %1485 }
0x1a3f   :  { %v1488_v50 = vmul.f32 %v1486_v4, %v1483_v48 }
0x1a41   :  { %v1490_v51 = vadd.f32 %v1489_v49, %v1488_v50 }
0x1a43   :  { %1492 = vrot.lane.b32.xlu1 %v1490_v51, %s4293_s11 }
0x1ab5   :  { %v1493_v6 = vpop.permute.xlu1 %1492 }
0x1ab6   :  { %1495 = vst.msk [vmem:[#allocation3] sm:$0x3] %vm480_vm12, %v1493_v6  ;;  %3849 = vmatmul.mubr.msk.f32.vlgmr.msra.gmra.mrb[20].mxu0 %vm376_vm13, %v1493_v6 }
0x1ab7   :  { %4029 = vmatpush3.bf16.msra.mxu0 %v4498_v35  ;;  %3866 = vmatprep.mubr.msk.f32.mxu0 %vm4288_vm0, %v4287_v0 }
0x1ab8   :  { %3864 = vmatprep.subr.mxu0 %v4287_v0 }
0x1abb   :  { %3865 = vmatpush3.msra.mxu0 %v4502_v37 }
0x1abc   :  { %4033 = vmatprep.subr.bf16.mxu0 %v4289_v45 }
0x1b89   :  { %v1565_v53 = vpop.f32.mrb[20].mxu0 }
0x1b8a   :  { %v1566_v54 = vadd.f32 %v4518_v52, %v1565_v53  ;;  %v3850_v55 = vpop.f32.mrb[21].mxu0 }
0x1b8c   :  { %1577 = vrot.lane.b32.xlu0 %v1566_v54, %s4290_s0  ;;  %v1569_v57 = vadd.f32 %v1566_v54, %v1496_v56 }
0x1b8e   :  { %v3564_v58 = vmul.f32 -1.442695, %v1569_v57 }
0x1b90   :  { %4154 = vpow2.f32 %v3564_v58 }
0x1b9a   :  { %v4155_v59 = vpop.eup %4154 }
0x1b9b   :  { %v1573_v60 = vadd.f32 1.0, %v4155_v59 }
0x1b9d   :  { %4156 = vrcp.f32 %v1573_v60  ;;  %v1808_v60 = vld [vmem:[#allocation2 + $0x8] sm:$0x3] }
0x1ba7   :  { %v4157_v61 = vpop.eup %4156 }
0x1ba8   :  { %v1587_v5 = vsub.f32 1.0, %v4157_v61  ;;  %v1593_v8 = vmul.f32 %v4157_v61, %v1490_v51 }
0x1bfe   :  { %v1578_v62 = vpop.permute.xlu0 %1577 }
0x1bff   :  { %v1580_v63 = vmul.f32 %v4157_v61, %v1578_v62 }
0x1c01   :  { %1582 = vrot.lane.b32.xlu1 %v1580_v63, %s4292_s10 }
0x1c73   :  { %v1583_v1 = vpop.permute.xlu1 %1582 }
0x1c74   :  { %v1585_v2 = vadd.f32 %v1583_v1, %v1496_v56 }
0x1c76   :  { %4158 = vtanh.f32 %v1585_v2 }
0x1c80   :  { %v4159_v3 = vpop.eup %4158 }
0x1c81   :  { %1589 = vrot.lane.b32.xlu0 %v4159_v3, %s4293_s11 }
0x1cf3   :  { %v1590_v7 = vpop.permute.xlu0 %1589 }
0x1cf4   :  { %v1592_v9 = vmul.f32 %v1590_v7, %v1587_v5 }
0x1cf6   :  { %v1594_v10 = vadd.f32 %v1593_v8, %v1592_v9 }
0x1cf8   :  { %1596 = vrot.lane.b32.xlu1 %v1594_v10, %s4293_s11 }
0x1d6a   :  { %v1597_v11 = vpop.permute.xlu1 %1596 }
0x1d6b   :  { %1599 = vst.msk [vmem:[#allocation3 + $0x2] sm:$0x3] %vm480_vm12, %v1597_v11  ;;  %3858 = vmatmul.mubr.msk.f32.vlgmr.msra.gmra.mrb[18].mxu1 %vm376_vm13, %v1597_v11 }
0x1d6c   :  { %4032 = vmatpush3.bf16.msra.mxu1 %v4498_v35  ;;  %3875 = vmatprep.mubr.msk.f32.mxu1 %vm4288_vm0, %v4287_v0 }
0x1d6d   :  { %3873 = vmatprep.subr.mxu1 %v4287_v0 }
0x1d70   :  { %3874 = vmatpush3.msra.mxu1 %v4502_v37 }
0x1d71   :  { %4036 = vmatprep.subr.bf16.mxu1 %v4289_v45 }
0x1e3e   :  { %v1669_v12 = vpop.f32.mrb[18].mxu1 }
0x1e3f   :  { %v1670_v13 = vadd.f32 %v4518_v52, %v1669_v12  ;;  %v3859_v14 = vpop.f32.mrb[19].mxu1 }
0x1e41   :  { %1681 = vrot.lane.b32.xlu0 %v1670_v13, %s4290_s0  ;;  %v1673_v16 = vadd.f32 %v1670_v13, %v1600_v15 }
0x1e43   :  { %v3566_v17 = vmul.f32 -1.442695, %v1673_v16 }
0x1e45   :  { %4160 = vpow2.f32 %v3566_v17 }
0x1e4f   :  { %v4161_v18 = vpop.eup %4160 }
0x1e50   :  { %v1677_v20 = vadd.f32 1.0, %v4161_v18 }
0x1e52   :  { %4162 = vrcp.f32 %v1677_v20  ;;  %v1912_v20 = vld [vmem:[#allocation2 + $0xa] sm:$0x3] }
0x1e5c   :  { %v4163_v21 = vpop.eup %4162 }
0x1e5d   :  { %v1691_v27 = vsub.f32 1.0, %v4163_v21  ;;  %v1697_v29 = vmul.f32 %v4163_v21, %v1594_v10 }
0x1eb3   :  { %v1682_v22 = vpop.permute.xlu0 %1681 }
0x1eb4   :  { %v1684_v23 = vmul.f32 %v4163_v21, %v1682_v22 }
0x1eb6   :  { %1686 = vrot.lane.b32.xlu1 %v1684_v23, %s4292_s10 }
0x1f28   :  { %v1687_v24 = vpop.permute.xlu1 %1686 }
0x1f29   :  { %v1689_v25 = vadd.f32 %v1687_v24, %v1600_v15 }
0x1f2b   :  { %4164 = vtanh.f32 %v1689_v25 }
0x1f35   :  { %v4165_v26 = vpop.eup %4164 }
0x1f36   :  { %1693 = vrot.lane.b32.xlu0 %v4165_v26, %s4293_s11 }
0x1fa8   :  { %v1694_v28 = vpop.permute.xlu0 %1693 }
0x1fa9   :  { %v1696_v30 = vmul.f32 %v1694_v28, %v1691_v27 }
0x1fab   :  { %v1698_v31 = vadd.f32 %v1697_v29, %v1696_v30 }
0x1fad   :  { %1700 = vrot.lane.b32.xlu1 %v1698_v31, %s4293_s11 }
0x201f   :  { %v1701_v32 = vpop.permute.xlu1 %1700 }
0x2020   :  { %1703 = vst.msk [vmem:[#allocation3 + $0x4] sm:$0x3] %vm480_vm12, %v1701_v32  ;;  %3867 = vmatmul.mubr.msk.f32.vlgmr.msra.gmra.mrb[22].mxu0 %vm376_vm13, %v1701_v32 }
0x2021   :  { %4035 = vmatpush3.bf16.msra.mxu0 %v4498_v35  ;;  %3884 = vmatprep.mubr.msk.f32.mxu0 %vm4288_vm0, %v4287_v0 }
0x2022   :  { %3882 = vmatprep.subr.mxu0 %v4287_v0 }
0x2025   :  { %3883 = vmatpush3.msra.mxu0 %v4502_v37 }
0x2026   :  { %4039 = vmatprep.subr.bf16.mxu0 %v4289_v45 }
0x20f3   :  { %v1773_v33 = vpop.f32.mrb[22].mxu0 }
0x20f4   :  { %v1774_v34 = vadd.f32 %v4518_v52, %v1773_v33  ;;  %v3868_v19 = vpop.f32.mrb[23].mxu0 }
0x20f6   :  { %1785 = vrot.lane.b32.xlu0 %v1774_v34, %s4290_s0  ;;  %v1777_v41 = vadd.f32 %v1774_v34, %v1704_v39 }
0x20f8   :  { %v3568_v42 = vmul.f32 -1.442695, %v1777_v41 }
0x20fa   :  { %4166 = vpow2.f32 %v3568_v42  ;;  %v2016_v42 = vld [vmem:[#allocation2 + $0xc] sm:$0x3] }
0x2104   :  { %v4167_v43 = vpop.eup %4166 }
0x2105   :  { %v1781_v44 = vadd.f32 1.0, %v4167_v43 }
0x2107   :  { %4168 = vrcp.f32 %v1781_v44 }
0x2111   :  { %v4169_v46 = vpop.eup %4168 }
0x2112   :  { %v1795_v51 = vsub.f32 1.0, %v4169_v46  ;;  %v1801_v53 = vmul.f32 %v4169_v46, %v1698_v31 }
0x2168   :  { %v1786_v47 = vpop.permute.xlu0 %1785 }
0x2169   :  { %v1788_v48 = vmul.f32 %v4169_v46, %v1786_v47 }
0x216b   :  { %1790 = vrot.lane.b32.xlu1 %v1788_v48, %s4292_s10 }
0x21dd   :  { %v1791_v4 = vpop.permute.xlu1 %1790 }
0x21de   :  { %v1793_v49 = vadd.f32 %v1791_v4, %v1704_v39 }
0x21e0   :  { %4170 = vtanh.f32 %v1793_v49 }
0x21ea   :  { %v4171_v50 = vpop.eup %4170 }
0x21eb   :  { %1797 = vrot.lane.b32.xlu0 %v4171_v50, %s4293_s11 }
0x225d   :  { %v1798_v6 = vpop.permute.xlu0 %1797 }
0x225e   :  { %v1800_v54 = vmul.f32 %v1798_v6, %v1795_v51 }
0x2260   :  { %v1802_v55 = vadd.f32 %v1801_v53, %v1800_v54 }
0x2262   :  { %1804 = vrot.lane.b32.xlu1 %v1802_v55, %s4293_s11 }
0x22d4   :  { %v1805_v56 = vpop.permute.xlu1 %1804 }
0x22d5   :  { %1807 = vst.msk [vmem:[#allocation3 + $0x6] sm:$0x3] %vm480_vm12, %v1805_v56  ;;  %3876 = vmatmul.mubr.msk.f32.vlgmr.msra.gmra.mrb[20].mxu1 %vm376_vm13, %v1805_v56 }
0x22d6   :  { %4038 = vmatpush3.bf16.msra.mxu1 %v4498_v35  ;;  %3893 = vmatprep.mubr.msk.f32.mxu1 %vm4288_vm0, %v4287_v0 }
0x22d7   :  { %3891 = vmatprep.subr.mxu1 %v4287_v0 }
0x22da   :  { %3892 = vmatpush3.msra.mxu1 %v4502_v37 }
0x22db   :  { %3905 = vmatprep.subr.bf16.mxu1 %v4287_v0 }
0x23a8   :  { %v1877_v57 = vpop.f32.mrb[20].mxu1 }
0x23a9   :  { %v1878_v58 = vadd.f32 %v4518_v52, %v1877_v57  ;;  %v3877_v59 = vpop.f32.mrb[21].mxu1 }
0x23ab   :  { %1889 = vrot.lane.b32.xlu0 %v1878_v58, %s4290_s0  ;;  %v1881_v61 = vadd.f32 %v1878_v58, %v1808_v60 }
0x23ad   :  { %v3570_v62 = vmul.f32 -1.442695, %v1881_v61 }
0x23af   :  { %4172 = vpow2.f32 %v3570_v62  ;;  %v2120_v62 = vld [vmem:[#allocation2 + $0xe] sm:$0x3] }
0x23b9   :  { %v4173_v63 = vpop.eup %4172 }
0x23ba   :  { %v1885_v1 = vadd.f32 1.0, %v4173_v63 }
0x23bc   :  { %4174 = vrcp.f32 %v1885_v1 }
0x23c6   :  { %v4175_v2 = vpop.eup %4174 }
0x23c7   :  { %v1899_v10 = vsub.f32 1.0, %v4175_v2  ;;  %v1905_v12 = vmul.f32 %v4175_v2, %v1802_v55 }
0x241d   :  { %v1890_v3 = vpop.permute.xlu0 %1889 }
0x241e   :  { %v1892_v5 = vmul.f32 %v4175_v2, %v1890_v3 }
0x2420   :  { %1894 = vrot.lane.b32.xlu1 %v1892_v5, %s4292_s10 }
0x2492   :  { %v1895_v7 = vpop.permute.xlu1 %1894 }
0x2493   :  { %v1897_v8 = vadd.f32 %v1895_v7, %v1808_v60 }
0x2495   :  { %4176 = vtanh.f32 %v1897_v8 }
0x249f   :  { %v4177_v9 = vpop.eup %4176 }
0x24a0   :  { %1901 = vrot.lane.b32.xlu0 %v4177_v9, %s4293_s11 }
0x2512   :  { %v1902_v11 = vpop.permute.xlu0 %1901 }
0x2513   :  { %v1904_v13 = vmul.f32 %v1902_v11, %v1899_v10  ;;  %v2232_v11 = vld [vmem:[#allocation4 + $0xf8] sm:$0xff] }
0x2515   :  { %v1906_v14 = vadd.f32 %v1905_v12, %v1904_v13  ;;  %v4634_v13 = vld [vmem:[#allocation4 + $0x108] sm:$0xff] }
0x2517   :  { %1908 = vrot.lane.b32.xlu1 %v1906_v14, %s4293_s11 }
0x2589   :  { %v1909_v15 = vpop.permute.xlu1 %1908 }
0x258a   :  { %1911 = vst.msk [vmem:[#allocation3 + $0x8] sm:$0x3] %vm480_vm12, %v1909_v15  ;;  %3885 = vmatmul.mubr.msk.f32.vlgmr.msra.gmra.mrb[24].mxu0 %vm376_vm13, %v1909_v15  ;;  %v2281_v15 = vld [vmem:[#allocation4 + $0xe0] sm:$0xff] }
0x258b   :  { %4041 = vmatpush3.bf16.msra.mxu0 %v4498_v35  ;;  %3902 = vmatprep.mubr.msk.f32.mxu0 %vm4288_vm0, %v4287_v0 }
0x258c   :  { %3900 = vmatprep.subr.mxu0 %v4287_v0 }
0x258f   :  { %3901 = vmatpush3.msra.mxu0 %v4502_v37 }
0x2590   :  { %4042 = vmatprep.subr.bf16.mxu0 %v4289_v45 }
0x265d   :  { %v1981_v16 = vpop.f32.mrb[24].mxu0 }
0x265e   :  { %v1982_v17 = vadd.f32 %v4518_v52, %v1981_v16  ;;  %v3886_v18 = vpop.f32.mrb[25].mxu0  ;;  %v2282_v16 = vld [vmem:[#allocation4 + $0xe8] sm:$0xff] }
0x265f   :  { %v2284_v18 = vpack.c.bf16 %v2282_v16, %v2281_v15 }
0x2660   :  { %1993 = vrot.lane.b32.xlu0 %v1982_v17, %s4290_s0  ;;  %v1985_v21 = vadd.f32 %v1982_v17, %v1912_v20  ;;  %v2283_v17 = vld [vmem:[#allocation4 + $0xf0] sm:$0xff] }
0x2662   :  { %v3572_v22 = vmul.f32 -1.442695, %v1985_v21 }
0x2664   :  { %4178 = vpow2.f32 %v3572_v22 }
0x266e   :  { %v4179_v35 = vpop.eup %4178 }
0x266f   :  { %v1989_v23 = vadd.f32 1.0, %v4179_v35 }
0x2671   :  { %4180 = vrcp.f32 %v1989_v23 }
0x267b   :  { %v4181_v24 = vpop.eup %4180 }
0x267c   :  { %v2003_v29 = vsub.f32 1.0, %v4181_v24  ;;  %v2009_v31 = vmul.f32 %v4181_v24, %v1906_v14 }
0x26d2   :  { %v1994_v25 = vpop.permute.xlu0 %1993 }
0x26d3   :  { %v1996_v26 = vmul.f32 %v4181_v24, %v1994_v25 }
0x26d5   :  { %1998 = vrot.lane.b32.xlu1 %v1996_v26, %s4292_s10  ;;  %v4650_v26 = vld [vmem:[#allocation4 + $0x118] ss:$0 sm:$0xff] }
0x2747   :  { %v1999_v37 = vpop.permute.xlu1 %1998 }
0x2748   :  { %v2001_v27 = vadd.f32 %v1999_v37, %v1912_v20  ;;  %v2285_v20 = vpack.c.bf16 %v2283_v17, %v2283_v17 }
0x274a   :  { %4182 = vtanh.f32 %v2001_v27  ;;  %v2295_v21 = vsel %vm48_vm1, %v2285_v20, 0 }
0x2754   :  { %v4183_v28 = vpop.eup %4182 }
0x2755   :  { %2005 = vrot.lane.b32.xlu0 %v4183_v28, %s4293_s11 }
0x27c7   :  { %v2006_v30 = vpop.permute.xlu0 %2005 }
0x27c8   :  { %v2008_v32 = vmul.f32 %v2006_v30, %v2003_v29  ;;  %v2227_v30 = vld [vmem:[#allocation3 + $0x6] sm:$0x3] }
0x27ca   :  { %v2010_v33 = vadd.f32 %v2009_v31, %v2008_v32  ;;  %v2225_v31 = vld [vmem:[#allocation3 + $0x2] sm:$0x3]  ;;  %v2226_v32 = vld [vmem:[#allocation3 + $0x4] sm:$0x3] }
0x27cc   :  { %2012 = vrot.lane.b32.xlu1 %v2010_v33, %s4293_s11 }
0x283e   :  { %v2013_v34 = vpop.permute.xlu1 %2012 }
0x283f   :  { %2015 = vst.msk [vmem:[#allocation3 + $0xa] sm:$0x3] %vm480_vm12, %v2013_v34  ;;  %3894 = vmatmul.mubr.msk.f32.vlgmr.msra.gmra.mrb[22].mxu1 %vm376_vm13, %v2013_v34  ;;  %v2245_v34 = vcombine.low %v2226_v32, %v2227_v30 }
0x2840   :  { %3909 = vmatprep.mubr.msk.bf16.mxu1 %vm4288_vm0, %v4287_v0  ;;  %3906 = vmatpush3.bf16.msra.mxu1 %v2284_v18 }
0x2841   :  { %3907 = vmatprep.subr.bf16.mxu1 %v4287_v0 }
0x2844   :  { %3908 = vmatpush3.bf16.msra.mxu1 %v2295_v21 }
0x2845   :  { %4045 = vmatprep.subr.bf16.mxu1 %v4289_v45 }
0x2912   :  { %v2085_v19 = vpop.f32.mrb[22].mxu1 }
0x2913   :  { %v2086_v39 = vadd.f32 %v4518_v52, %v2085_v19  ;;  %v3895_v41 = vpop.f32.mrb[23].mxu1  ;;  %v2224_v19 = vld [vmem:[#allocation3] sm:$0x3] }
0x2914   :  { %v2244_v41 = vcombine.low %v2224_v19, %v2225_v31 }
0x2915   :  { %2097 = vrot.lane.b32.xlu0 %v2086_v39, %s4290_s0  ;;  %v2089_v43 = vadd.f32 %v2086_v39, %v2016_v42  ;;  %v2228_v39 = vld [vmem:[#allocation3 + $0x8] sm:$0x3] }
0x2917   :  { %v3574_v44 = vmul.f32 -1.442695, %v2089_v43 }
0x2919   :  { %4184 = vpow2.f32 %v3574_v44 }
0x2923   :  { %v4185_v46 = vpop.eup %4184 }
0x2924   :  { %v2093_v47 = vadd.f32 1.0, %v4185_v46  ;;  %v2259_v46 = vrot.slane %v2245_v34, %v4400_v40 }
0x2926   :  { %4186 = vrcp.f32 %v2093_v47 }
0x2930   :  { %v4187_v48 = vpop.eup %4186 }
0x2931   :  { %v2107_v53 = vsub.f32 1.0, %v4187_v48  ;;  %v2113_v55 = vmul.f32 %v4187_v48, %v2010_v33  ;;  %v2229_v33 = vld [vmem:[#allocation3 + $0xa] sm:$0x3] }
0x2987   :  { %v2098_v4 = vpop.permute.xlu0 %2097 }
0x2988   :  { %v2100_v49 = vmul.f32 %v4187_v48, %v2098_v4  ;;  %v2252_v48 = vrot.slane %v2244_v41, %v4400_v40 }
0x298a   :  { %2102 = vrot.lane.b32.xlu1 %v2100_v49, %s4292_s10 }
0x29fc   :  { %v2103_v50 = vpop.permute.xlu1 %2102 }
0x29fd   :  { %v2105_v51 = vadd.f32 %v2103_v50, %v2016_v42  ;;  %v2261_v42 = vcombine.low %v2228_v39, %v2229_v33  ;;  %v2260_v50 = vcombine.low %v2252_v48, %v2259_v46 }
0x29ff   :  { %4188 = vtanh.f32 %v2105_v51  ;;  %v2269_v4 = vrot.slane %v2261_v42, %v4400_v40 }
0x2a09   :  { %v4189_v6 = vpop.eup %4188 }
0x2a0a   :  { %2109 = vrot.lane.b32.xlu0 %v4189_v6, %s4293_s11 }
0x2a7c   :  { %v2110_v54 = vpop.permute.xlu0 %2109 }
0x2a7d   :  { %v2112_v56 = vmul.f32 %v2110_v54, %v2107_v53  ;;  %v3577_v53 = vld [vmem:[#allocation4 + $0x110] ss:$0 sm:$0xff] }
0x2a7f   :  { %v2114_v57 = vadd.f32 %v2113_v55, %v2112_v56 }
0x2a81   :  { %2116 = vrot.lane.b32.xlu1 %v2114_v57, %s4293_s11 }
0x2af3   :  { %v2117_v58 = vpop.permute.xlu1 %2116 }
0x2af4   :  { %2119 = vst.msk [vmem:[#allocation3 + $0xc] sm:$0x3] %vm480_vm12, %v2117_v58  ;;  %3903 = vmatmul.mubr.msk.f32.vlgmr.msra.gmra.mrb[26].mxu0 %vm376_vm13, %v2117_v58 }
0x2af5   :  { %3919 = vmatprep.mubr.msk.f32.mxu0 %vm4288_vm0, %v4287_v0 }
0x2afb   :  { %v2230_v43 = vld [vmem:[#allocation3 + $0xc] sm:$0x3] }
0x2bc7   :  { %v2189_v59 = vpop.f32.mrb[26].mxu0 }
0x2bc8   :  { %v2190_v60 = vadd.f32 %v4518_v52, %v2189_v59  ;;  %v3904_v61 = vpop.f32.mrb[27].mxu0  ;;  %v2233_v52 = vld [vmem:[#allocation4 + $0x100] sm:$0xff] }
0x2bc9   :  { %v4630_v12 = vpack.c.bf16 %v2233_v52, %v2232_v11 }
0x2bca   :  { %2201 = vrot.lane.b32.xlu0 %v2190_v60, %s4290_s0  ;;  %v2193_v63 = vadd.f32 %v2190_v60, %v2120_v62 }
0x2bcb   :  { %4044 = vmatpush3.bf16.msra.mxu0 %v4630_v12 }
0x2bcc   :  { %v3576_v1 = vmul.f32 -1.442695, %v2193_v63  ;;  %3917 = vmatprep.subr.mxu0 %v4287_v0 }
0x2bce   :  { %4190 = vpow2.f32 %v3576_v1 }
0x2bcf   :  { %3918 = vmatpush3.msra.mxu0 %v4634_v13 }
0x2bd0   :  { %3920 = vmatmul.mubr.f32.vlgmr.msra.gmra.mrb[28].mxu0 %v4287_v0  ;;  %4048 = vmatprep.subr.bf16.mxu0 %v4289_v45 }
0x2bd1   :  { %4050 = vmatpush3.bf16.msra.mxu0 %v4630_v12  ;;  %3937 = vmatprep.mubr.msk.f32.mxu0 %vm4288_vm0, %v4287_v0 }
0x2bd2   :  { %3935 = vmatprep.subr.mxu0 %v4287_v0 }
0x2bd5   :  { %3936 = vmatpush3.msra.mxu0 %v4634_v13 }
0x2bd6   :  { %4054 = vmatprep.subr.bf16.mxu0 %v4289_v45 }
0x2bd8   :  { %v4191_v2 = vpop.eup %4190 }
0x2bd9   :  { %v2197_v3 = vadd.f32 1.0, %v4191_v2 }
0x2bdb   :  { %4192 = vrcp.f32 %v2197_v3 }
0x2be5   :  { %v4193_v5 = vpop.eup %4192 }
0x2be6   :  { %v2211_v22 = vsub.f32 1.0, %v4193_v5  ;;  %v2217_v23 = vmul.f32 %v4193_v5, %v2114_v57 }
0x2c3c   :  { %v2202_v7 = vpop.permute.xlu0 %2201 }
0x2c3d   :  { %v2204_v8 = vmul.f32 %v4193_v5, %v2202_v7 }
0x2c3f   :  { %2206 = vrot.lane.b32.xlu1 %v2204_v8, %s4292_s10 }
0x2ca3   :  { %v2461_v37 = vpop.f32.mrb[28].mxu0 }
0x2ca4   :  { %v2462_v27 = vadd.f32 %v4650_v26, %v2461_v37  ;;  %v3921_v28 = vpop.f32.mrb[29].mxu0 }
0x2cb1   :  { %v2207_v9 = vpop.permute.xlu1 %2206 }
0x2cb2   :  { %v2209_v10 = vadd.f32 %v2207_v9, %v2120_v62 }
0x2cb4   :  { %4194 = vtanh.f32 %v2209_v10 }
0x2cbe   :  { %v4195_v14 = vpop.eup %4194 }
0x2cbf   :  { %2213 = vrot.lane.b32.xlu0 %v4195_v14, %s4293_s11 }
0x2cc3   :  { %2473 = vrot.lane.b32.xlu0 %v2462_v27, %s4290_s0 }
0x2d31   :  { %v2214_v35 = vpop.permute.xlu0 %2213 }
0x2d32   :  { %v2216_v24 = vmul.f32 %v2214_v35, %v2211_v22 }
0x2d34   :  { %v2218_v25 = vadd.f32 %v2217_v23, %v2216_v24 }
0x2d35   :  { %v2474_v15 = vpop.permute.xlu0 %2473 }
0x2d36   :  { %2220 = vrot.lane.b32.xlu1 %v2218_v25, %s4293_s11 }
0x2da8   :  { %v2221_v29 = vpop.permute.xlu1 %2220 }
0x2da9   :  { %2223 = vst.msk [vmem:[#allocation3 + $0xe] sm:$0x3] %vm480_vm12, %v2221_v29 }
0x2db0   :  { %v2231_v44 = vld [vmem:[#allocation3 + $0xe] sm:$0x3] }
0x2db1   :  { %v2262_v47 = vcombine.low %v2230_v43, %v2231_v44 }
0x2db3   :  { %v2276_v49 = vrot.slane %v2262_v47, %v4400_v40 }
0x2db5   :  { %v2277_v51 = vcombine.low %v2269_v4, %v2276_v49 }
0x2db7   :  { %v2280_v6 = vpack.c.bf16 %v2277_v51, %v2260_v50 }
0x2db9   :  { %3910 = vmatmul.mubr.msk.bf16.vlgmr.msra.gmra.mrb[24].mxu1 %vm376_vm13, %v2280_v6 }
0x2dba   :  { %4047 = vmatpush3.bf16.msra.mxu1 %v4630_v12  ;;  %3928 = vmatprep.mubr.msk.f32.mxu1 %vm4288_vm0, %v4287_v0 }
0x2dbb   :  { %3926 = vmatprep.subr.mxu1 %v4287_v0 }
0x2dbe   :  { %3927 = vmatpush3.msra.mxu1 %v4634_v13 }
0x2dbf   :  { %4051 = vmatprep.subr.bf16.mxu1 %v4289_v45 }
0x2e8c   :  { %v2331_v54 = vpop.f32.mrb[24].mxu1 }
0x2e8d   :  { %v2332_v55 = vadd.f32 %v3577_v53, %v2331_v54  ;;  %v3911_v56 = vpop.f32.mrb[25].mxu1 }
0x2e8e   :  { %v2334_v57 = vpop.f32.mrb[26].mxu1 }
0x2e8f   :  { %v2340_v58 = vcombine.high %v2332_v55, %v2332_v55  ;;  %v2347_v59 = vrot.slane %v2332_v55, %v4400_v40  ;;  %v2335_v60 = vadd.f32 %v3577_v53, %v2334_v57  ;;  %v3912_v61 = vpop.f32.mrb[27].mxu1 }
0x2e91   :  { %v2354_v62 = vrot.slane %v2340_v58, %v4400_v40  ;;  %v2355_v63 = vcombine.high %v2347_v59, %v2347_v59  ;;  %2382 = vst.msk [vmem:[#allocation2] sm:$0x3] %vm362_vm11, %v2347_v59  ;;  %v2357_v1 = vcombine.high %v2335_v60, %v2335_v60  ;;  %v2364_v2 = vrot.slane %v2335_v60, %v4400_v40 }
0x2e93   :  { %v2356_v3 = vcombine.high %v2354_v62, %v2354_v62  ;;  %2383 = vst.msk [vmem:[#allocation2 + $0x2] sm:$0x3] %vm362_vm11, %v2355_v63  ;;  %2384 = vst.msk [vmem:[#allocation2 + $0x4] sm:$0x3] %vm362_vm11, %v2354_v62  ;;  %v2371_v5 = vrot.slane %v2357_v1, %v4400_v40  ;;  %v2372_v7 = vcombine.high %v2364_v2, %v2364_v2 }
0x2e94   :  { %2386 = vst.msk [vmem:[#allocation2 + $0x8] sm:$0x3] %vm362_vm11, %v2364_v2 }
0x2e95   :  { %2385 = vst.msk [vmem:[#allocation2 + $0x6] sm:$0x3] %vm362_vm11, %v2356_v3  ;;  %v2373_v8 = vcombine.high %v2371_v5, %v2371_v5  ;;  %2387 = vst.msk [vmem:[#allocation2 + $0xa] sm:$0x3] %vm362_vm11, %v2372_v7 }
0x2e96   :  { %2388 = vst.msk [vmem:[#allocation2 + $0xc] sm:$0x3] %vm362_vm11, %v2371_v5 }
0x2e97   :  { %2389 = vst.msk [vmem:[#allocation2 + $0xe] sm:$0x3] %vm362_vm11, %v2373_v8 }
0x2e98   :  { %v2390_v9 = vld [vmem:[#allocation2] sm:$0x3] }
0x2e99   :  { %v2465_v10 = vadd.f32 %v2462_v27, %v2390_v9 }
0x2e9a   :  { %v2496_v30 = vld [vmem:[#allocation2 + $0x2] sm:$0x3]  ;;  %v2600_v54 = vld [vmem:[#allocation2 + $0x4] sm:$0x3] }
0x2e9b   :  { %v3580_v11 = vmul.f32 -1.442695, %v2465_v10 }
0x2e9d   :  { %4196 = vpow2.f32 %v3580_v11 }
0x2ea7   :  { %v4197_v52 = vpop.eup %4196 }
0x2ea8   :  { %v2469_v14 = vadd.f32 1.0, %v4197_v52 }
0x2eaa   :  { %4198 = vrcp.f32 %v2469_v14  ;;  %v2704_v14 = vld [vmem:[#allocation2 + $0x6] sm:$0x3] }
0x2eb4   :  { %v4199_v16 = vpop.eup %4198 }
0x2eb5   :  { %v2476_v17 = vmul.f32 %v4199_v16, %v2474_v15  ;;  %v2483_v22 = vsub.f32 1.0, %v4199_v16  ;;  %v2489_v23 = vmul.f32 0.0, %v4199_v16 }
0x2eb7   :  { %2478 = vrot.lane.b32.xlu1 %v2476_v17, %s4292_s10 }
0x2f29   :  { %v2479_v18 = vpop.permute.xlu1 %2478 }
0x2f2a   :  { %v2481_v20 = vadd.f32 %v2479_v18, %v2390_v9 }
0x2f2c   :  { %4200 = vtanh.f32 %v2481_v20 }
0x2f36   :  { %v4201_v21 = vpop.eup %4200 }
0x2f37   :  { %2485 = vrot.lane.b32.xlu0 %v4201_v21, %s4293_s11 }
0x2fa9   :  { %v2486_v35 = vpop.permute.xlu0 %2485 }
0x2faa   :  { %v2488_v24 = vmul.f32 %v2486_v35, %v2483_v22 }
0x2fac   :  { %v2490_v25 = vadd.f32 %v2489_v23, %v2488_v24 }
0x2fae   :  { %2492 = vrot.lane.b32.xlu1 %v2490_v25, %s4293_s11 }
0x3020   :  { %v2493_v37 = vpop.permute.xlu1 %2492 }
0x3021   :  { %2495 = vst.msk [vmem:[#allocation3] sm:$0x3] %vm480_vm12, %v2493_v37  ;;  %3929 = vmatmul.mubr.msk.f32.vlgmr.msra.gmra.mrb[28].mxu1 %vm376_vm13, %v2493_v37 }
0x3022   :  { %4053 = vmatpush3.bf16.msra.mxu1 %v4630_v12  ;;  %3946 = vmatprep.mubr.msk.f32.mxu1 %vm4288_vm0, %v4287_v0 }
0x3023   :  { %3944 = vmatprep.subr.mxu1 %v4287_v0 }
0x3026   :  { %3945 = vmatpush3.msra.mxu1 %v4634_v13 }
0x3027   :  { %4057 = vmatprep.subr.bf16.mxu1 %v4289_v45 }
0x30f4   :  { %v2565_v27 = vpop.f32.mrb[28].mxu1 }
0x30f5   :  { %v2566_v28 = vadd.f32 %v4650_v26, %v2565_v27  ;;  %v3930_v29 = vpop.f32.mrb[29].mxu1 }
0x30f7   :  { %2577 = vrot.lane.b32.xlu0 %v2566_v28, %s4290_s0  ;;  %v2569_v31 = vadd.f32 %v2566_v28, %v2496_v30 }
0x30f9   :  { %v3582_v32 = vmul.f32 -1.442695, %v2569_v31 }
0x30fb   :  { %4202 = vpow2.f32 %v3582_v32 }
0x3105   :  { %v4203_v33 = vpop.eup %4202 }
0x3106   :  { %v2573_v34 = vadd.f32 1.0, %v4203_v33  ;;  %v2808_v33 = vld [vmem:[#allocation2 + $0x8] sm:$0x3] }
0x3108   :  { %4204 = vrcp.f32 %v2573_v34 }
0x3112   :  { %v4205_v19 = vpop.eup %4204 }
0x3113   :  { %v2587_v46 = vsub.f32 1.0, %v4205_v19  ;;  %v2593_v48 = vmul.f32 %v4205_v19, %v2490_v25 }
0x3169   :  { %v2578_v39 = vpop.permute.xlu0 %2577 }
0x316a   :  { %v2580_v41 = vmul.f32 %v4205_v19, %v2578_v39 }
0x316c   :  { %2582 = vrot.lane.b32.xlu1 %v2580_v41, %s4292_s10 }
0x31de   :  { %v2583_v42 = vpop.permute.xlu1 %2582 }
0x31df   :  { %v2585_v43 = vadd.f32 %v2583_v42, %v2496_v30 }
0x31e1   :  { %4206 = vtanh.f32 %v2585_v43 }
0x31eb   :  { %v4207_v44 = vpop.eup %4206 }
0x31ec   :  { %2589 = vrot.lane.b32.xlu0 %v4207_v44, %s4293_s11 }
0x325e   :  { %v2590_v47 = vpop.permute.xlu0 %2589 }
0x325f   :  { %v2592_v4 = vmul.f32 %v2590_v47, %v2587_v46 }
0x3261   :  { %v2594_v49 = vadd.f32 %v2593_v48, %v2592_v4 }
0x3263   :  { %2596 = vrot.lane.b32.xlu1 %v2594_v49, %s4293_s11 }
0x32d5   :  { %v2597_v50 = vpop.permute.xlu1 %2596 }
0x32d6   :  { %2599 = vst.msk [vmem:[#allocation3 + $0x2] sm:$0x3] %vm480_vm12, %v2597_v50  ;;  %3938 = vmatmul.mubr.msk.f32.vlgmr.msra.gmra.mrb[30].mxu0 %vm376_vm13, %v2597_v50 }
0x32d7   :  { %4056 = vmatpush3.bf16.msra.mxu0 %v4630_v12  ;;  %3955 = vmatprep.mubr.msk.f32.mxu0 %vm4288_vm0, %v4287_v0 }
0x32d8   :  { %3953 = vmatprep.subr.mxu0 %v4287_v0 }
0x32db   :  { %3954 = vmatpush3.msra.mxu0 %v4634_v13 }
0x32dc   :  { %4060 = vmatprep.subr.bf16.mxu0 %v4289_v45 }
0x33a9   :  { %v2669_v51 = vpop.f32.mrb[30].mxu0 }
0x33aa   :  { %v2670_v6 = vadd.f32 %v4650_v26, %v2669_v51  ;;  %v3939_v53 = vpop.f32.mrb[31].mxu0 }
0x33ac   :  { %2681 = vrot.lane.b32.xlu0 %v2670_v6, %s4290_s0  ;;  %v2673_v55 = vadd.f32 %v2670_v6, %v2600_v54 }
0x33ae   :  { %v3584_v56 = vmul.f32 -1.442695, %v2673_v55 }
0x33b0   :  { %4208 = vpow2.f32 %v3584_v56 }
0x33ba   :  { %v4209_v57 = vpop.eup %4208 }
0x33bb   :  { %v2677_v58 = vadd.f32 1.0, %v4209_v57  ;;  %v2912_v57 = vld [vmem:[#allocation2 + $0xa] sm:$0x3] }
0x33bd   :  { %4210 = vrcp.f32 %v2677_v58 }
0x33c7   :  { %v4211_v59 = vpop.eup %4210 }
0x33c8   :  { %v2691_v2 = vsub.f32 1.0, %v4211_v59  ;;  %v2697_v5 = vmul.f32 %v4211_v59, %v2594_v49 }
0x341e   :  { %v2682_v60 = vpop.permute.xlu0 %2681 }
0x341f   :  { %v2684_v61 = vmul.f32 %v4211_v59, %v2682_v60 }
0x3421   :  { %2686 = vrot.lane.b32.xlu1 %v2684_v61, %s4292_s10 }
0x3493   :  { %v2687_v62 = vpop.permute.xlu1 %2686 }
0x3494   :  { %v2689_v63 = vadd.f32 %v2687_v62, %v2600_v54 }
0x3496   :  { %4212 = vtanh.f32 %v2689_v63 }
0x34a0   :  { %v4213_v1 = vpop.eup %4212 }
0x34a1   :  { %2693 = vrot.lane.b32.xlu0 %v4213_v1, %s4293_s11 }
0x3513   :  { %v2694_v3 = vpop.permute.xlu0 %2693 }
0x3514   :  { %v2696_v7 = vmul.f32 %v2694_v3, %v2691_v2 }
0x3516   :  { %v2698_v8 = vadd.f32 %v2697_v5, %v2696_v7 }
0x3518   :  { %2700 = vrot.lane.b32.xlu1 %v2698_v8, %s4293_s11 }
0x358a   :  { %v2701_v9 = vpop.permute.xlu1 %2700 }
0x358b   :  { %2703 = vst.msk [vmem:[#allocation3 + $0x4] sm:$0x3] %vm480_vm12, %v2701_v9  ;;  %3947 = vmatmul.mubr.msk.f32.vlgmr.msra.gmra.mrb[30].mxu1 %vm376_vm13, %v2701_v9 }
0x358c   :  { %4059 = vmatpush3.bf16.msra.mxu1 %v4630_v12  ;;  %3964 = vmatprep.mubr.msk.f32.mxu1 %vm4288_vm0, %v4287_v0 }
0x358d   :  { %3962 = vmatprep.subr.mxu1 %v4287_v0 }
0x3590   :  { %3963 = vmatpush3.msra.mxu1 %v4634_v13 }
0x3591   :  { %4063 = vmatprep.subr.bf16.mxu1 %v4289_v45 }
0x365e   :  { %v2773_v10 = vpop.f32.mrb[30].mxu1 }
0x365f   :  { %v2774_v11 = vadd.f32 %v4650_v26, %v2773_v10  ;;  %v3948_v52 = vpop.f32.mrb[31].mxu1 }
0x3660   :  { %v3226_v52 = vld [vmem:[#allocation3 + $0x4] sm:$0x3] }
0x3661   :  { %2785 = vrot.lane.b32.xlu0 %v2774_v11, %s4290_s0  ;;  %v2777_v15 = vadd.f32 %v2774_v11, %v2704_v14  ;;  %v3225_v11 = vld [vmem:[#allocation3 + $0x2] sm:$0x3] }
0x3663   :  { %v3586_v16 = vmul.f32 -1.442695, %v2777_v15  ;;  %v3224_v15 = vld [vmem:[#allocation3] sm:$0x3] }
0x3665   :  { %4214 = vpow2.f32 %v3586_v16  ;;  %v3248_v16 = vcombine.low %v3224_v15, %v3225_v11 }
0x366f   :  { %v4215_v17 = vpop.eup %4214 }
0x3670   :  { %v2781_v18 = vadd.f32 1.0, %v4215_v17 }
0x3672   :  { %4216 = vrcp.f32 %v2781_v18  ;;  %v3256_v18 = vrot.slane %v3248_v16, %v4400_v40 }
0x367c   :  { %v4217_v20 = vpop.eup %4216 }
0x367d   :  { %v2795_v24 = vsub.f32 1.0, %v4217_v20  ;;  %v2801_v37 = vmul.f32 %v4217_v20, %v2698_v8 }
0x36d3   :  { %v2786_v21 = vpop.permute.xlu0 %2785 }
0x36d4   :  { %v2788_v22 = vmul.f32 %v4217_v20, %v2786_v21 }
0x36d6   :  { %2790 = vrot.lane.b32.xlu1 %v2788_v22, %s4292_s10 }
0x3748   :  { %v2791_v35 = vpop.permute.xlu1 %2790 }
0x3749   :  { %v2793_v45 = vadd.f32 %v2791_v35, %v2704_v14 }
0x374b   :  { %4218 = vtanh.f32 %v2793_v45 }
0x3755   :  { %v4219_v23 = vpop.eup %4218 }
0x3756   :  { %2797 = vrot.lane.b32.xlu0 %v4219_v23, %s4293_s11  ;;  %v3016_v23 = vld [vmem:[#allocation2 + $0xc] sm:$0x3] }
0x37c8   :  { %v2798_v25 = vpop.permute.xlu0 %2797 }
0x37c9   :  { %v2800_v27 = vmul.f32 %v2798_v25, %v2795_v24 }
0x37cb   :  { %v2802_v28 = vadd.f32 %v2801_v37, %v2800_v27 }
0x37cd   :  { %2804 = vrot.lane.b32.xlu1 %v2802_v28, %s4293_s11 }
0x383f   :  { %v2805_v29 = vpop.permute.xlu1 %2804 }
0x3840   :  { %2807 = vst.msk [vmem:[#allocation3 + $0x6] sm:$0x3] %vm480_vm12, %v2805_v29  ;;  %3956 = vmatmul.mubr.msk.f32.vlgmr.msra.gmra.mrb[32].mxu0 %vm376_vm13, %v2805_v29 }
0x3841   :  { %4062 = vmatpush3.bf16.msra.mxu0 %v4630_v12  ;;  %3973 = vmatprep.mubr.msk.f32.mxu0 %vm4288_vm0, %v4287_v0 }
0x3842   :  { %3971 = vmatprep.subr.mxu0 %v4287_v0 }
0x3845   :  { %3972 = vmatpush3.msra.mxu0 %v4634_v13 }
0x3847   :  { %v3227_v10 = vld [vmem:[#allocation3 + $0x6] sm:$0x3] }
0x3848   :  { %v3249_v14 = vcombine.low %v3226_v52, %v3227_v10 }
0x384a   :  { %v3263_v17 = vrot.slane %v3249_v14, %v4400_v40  ;;  %v3595_v14 = vld [vmem:[#allocation4 + $0x138] ss:$0 sm:$0xff] }
0x384c   :  { %v3264_v21 = vcombine.low %v3256_v18, %v3263_v17 }
0x3913   :  { %v2877_v30 = vpop.f32.mrb[32].mxu0 }
0x3914   :  { %v2878_v31 = vadd.f32 %v4650_v26, %v2877_v30  ;;  %v3957_v32 = vpop.f32.mrb[33].mxu0 }
0x3916   :  { %2889 = vrot.lane.b32.xlu0 %v2878_v31, %s4290_s0  ;;  %v2881_v34 = vadd.f32 %v2878_v31, %v2808_v33 }
0x3918   :  { %v3588_v19 = vmul.f32 -1.442695, %v2881_v34 }
0x391a   :  { %4220 = vpow2.f32 %v3588_v19 }
0x3924   :  { %v4221_v39 = vpop.eup %4220 }
0x3925   :  { %v2885_v41 = vadd.f32 1.0, %v4221_v39 }
0x3927   :  { %4222 = vrcp.f32 %v2885_v41 }
0x3931   :  { %v4223_v42 = vpop.eup %4222 }
0x3932   :  { %v2899_v4 = vsub.f32 1.0, %v4223_v42  ;;  %v2905_v50 = vmul.f32 %v4223_v42, %v2802_v28 }
0x3988   :  { %v2890_v43 = vpop.permute.xlu0 %2889 }
0x3989   :  { %v2892_v44 = vmul.f32 %v4223_v42, %v2890_v43 }
0x398b   :  { %2894 = vrot.lane.b32.xlu1 %v2892_v44, %s4292_s10 }
0x39fd   :  { %v2895_v46 = vpop.permute.xlu1 %2894 }
0x39fe   :  { %v2897_v47 = vadd.f32 %v2895_v46, %v2808_v33 }
0x3a00   :  { %4224 = vtanh.f32 %v2897_v47 }
0x3a0a   :  { %v4225_v48 = vpop.eup %4224 }
0x3a0b   :  { %2901 = vrot.lane.b32.xlu0 %v4225_v48, %s4293_s11  ;;  %v3120_v48 = vld [vmem:[#allocation2 + $0xe] sm:$0x3] }
0x3a7d   :  { %v2902_v49 = vpop.permute.xlu0 %2901 }
0x3a7e   :  { %v2904_v51 = vmul.f32 %v2902_v49, %v2899_v4 }
0x3a80   :  { %v2906_v6 = vadd.f32 %v2905_v50, %v2904_v51 }
0x3a82   :  { %2908 = vrot.lane.b32.xlu1 %v2906_v6, %s4293_s11 }
0x3af4   :  { %v2909_v53 = vpop.permute.xlu1 %2908 }
0x3af5   :  { %2911 = vst.msk [vmem:[#allocation3 + $0x8] sm:$0x3] %vm480_vm12, %v2909_v53  ;;  %3965 = vmatmul.mubr.msk.f32.vlgmr.msra.gmra.mrb[32].mxu1 %vm376_vm13, %v2909_v53 }
0x3af6   :  { %4065 = vmatpush3.bf16.msra.mxu1 %v4630_v12  ;;  %3982 = vmatprep.mubr.msk.f32.mxu1 %vm4288_vm0, %v4287_v0 }
0x3af7   :  { %3980 = vmatprep.subr.mxu1 %v4287_v0 }
0x3afa   :  { %3981 = vmatpush3.msra.mxu1 %v4634_v13 }
0x3bc8   :  { %v2981_v54 = vpop.f32.mrb[32].mxu1 }
0x3bc9   :  { %v2982_v55 = vadd.f32 %v4650_v26, %v2981_v54  ;;  %v3966_v56 = vpop.f32.mrb[33].mxu1 }
0x3bcb   :  { %2993 = vrot.lane.b32.xlu0 %v2982_v55, %s4290_s0  ;;  %v2985_v58 = vadd.f32 %v2982_v55, %v2912_v57 }
0x3bcd   :  { %v3590_v59 = vmul.f32 -1.442695, %v2985_v58  ;;  %v3233_v58 = vld [vmem:[#allocation4 + $0x128] sm:$0xff] }
0x3bcf   :  { %4226 = vpow2.f32 %v3590_v59 }
0x3bd9   :  { %v4227_v60 = vpop.eup %4226 }
0x3bda   :  { %v2989_v61 = vadd.f32 1.0, %v4227_v60  ;;  %v3234_v60 = vld [vmem:[#allocation4 + $0x130] sm:$0xff] }
0x3bdc   :  { %4228 = vrcp.f32 %v2989_v61 }
0x3be6   :  { %v4229_v12 = vpop.eup %4228 }
0x3be7   :  { %v3003_v3 = vsub.f32 1.0, %v4229_v12  ;;  %v3009_v7 = vmul.f32 %v4229_v12, %v2906_v6 }
0x3c3d   :  { %v2994_v62 = vpop.permute.xlu0 %2993 }
0x3c3e   :  { %v2996_v63 = vmul.f32 %v4229_v12, %v2994_v62 }
0x3c40   :  { %2998 = vrot.lane.b32.xlu1 %v2996_v63, %s4292_s10 }
0x3cb2   :  { %v2999_v1 = vpop.permute.xlu1 %2998 }
0x3cb3   :  { %v3001_v13 = vadd.f32 %v2999_v1, %v2912_v57 }
0x3cb5   :  { %4230 = vtanh.f32 %v3001_v13 }
0x3cbf   :  { %v4231_v2 = vpop.eup %4230 }
0x3cc0   :  { %3005 = vrot.lane.b32.xlu0 %v4231_v2, %s4293_s11 }
0x3d32   :  { %v3006_v5 = vpop.permute.xlu0 %3005 }
0x3d33   :  { %v3008_v8 = vmul.f32 %v3006_v5, %v3003_v3  ;;  %v3228_v3 = vld [vmem:[#allocation3 + $0x8] sm:$0x3] }
0x3d35   :  { %v3010_v9 = vadd.f32 %v3009_v7, %v3008_v8 }
0x3d37   :  { %3012 = vrot.lane.b32.xlu1 %v3010_v9, %s4293_s11 }
0x3da9   :  { %v3013_v20 = vpop.permute.xlu1 %3012 }
0x3daa   :  { %3015 = vst.msk [vmem:[#allocation3 + $0xa] sm:$0x3] %vm480_vm12, %v3013_v20  ;;  %3974 = vmatmul.mubr.msk.f32.vlgmr.msra.gmra.mrb[34].mxu0 %vm376_vm13, %v3013_v20 }
0x3dab   :  { %3991 = vmatprep.mubr.msk.f32.mxu0 %vm376_vm13, %v3264_v21 }
0x3db1   :  { %v3229_v2 = vld [vmem:[#allocation3 + $0xa] sm:$0x3] }
0x3db2   :  { %v3265_v5 = vcombine.low %v3228_v3, %v3229_v2 }
0x3db4   :  { %v3273_v10 = vrot.slane %v3265_v5, %v4400_v40 }
0x3e7d   :  { %v3085_v22 = vpop.f32.mrb[34].mxu0 }
0x3e7e   :  { %v3086_v35 = vadd.f32 %v4650_v26, %v3085_v22  ;;  %v3975_v45 = vpop.f32.mrb[35].mxu0 }
0x3e7f   :  { %v3367_v45 = vld [vmem:[%s4824_s1 + $0x8] sm:$0xff] }
0x3e80   :  { %3097 = vrot.lane.b32.xlu0 %v3086_v35, %s4290_s0  ;;  %v3089_v24 = vadd.f32 %v3086_v35, %v3016_v23  ;;  %v3366_v35 = vld [vmem:[%s4824_s1] sm:$0xff]  ;;  %vm3412_vm0 = vcmp.ne.s32.totalorder %v3367_v45, 4294967295 }
0x3e81   :  { %vm3411_vm15 = vcmp.ne.s32.totalorder %v3366_v35, 4294967295 }
0x3e82   :  { %v3592_v25 = vmul.f32 -1.442695, %v3089_v24  ;;  %v3600_v24 = vsel %vm3411_vm15, 1.0, %v4287_v0 }
0x3e84   :  { %4232 = vpow2.f32 %v3592_v25  ;;  %v3601_v25 = vsel %vm3412_vm0, 1.0, %v4287_v0 }
0x3e8e   :  { %v4233_v37 = vpop.eup %4232 }
0x3e8f   :  { %v3093_v27 = vadd.f32 1.0, %v4233_v37  ;;  %v4083_v37 = vpack.i.bf16 %v3601_v25, %v3600_v24 }
0x3e91   :  { %4234 = vrcp.f32 %v3093_v27 }
0x3e9b   :  { %v4235_v28 = vpop.eup %4234 }
0x3e9c   :  { %v3107_v34 = vsub.f32 1.0, %v4235_v28  ;;  %v3113_v39 = vmul.f32 %v4235_v28, %v3010_v9 }
0x3ef2   :  { %v3098_v29 = vpop.permute.xlu0 %3097 }
0x3ef3   :  { %v3100_v30 = vmul.f32 %v4235_v28, %v3098_v29 }
0x3ef5   :  { %3102 = vrot.lane.b32.xlu1 %v3100_v30, %s4292_s10 }
0x3f67   :  { %v3103_v31 = vpop.permute.xlu1 %3102 }
0x3f68   :  { %v3105_v32 = vadd.f32 %v3103_v31, %v3016_v23  ;;  %v4294_v23 = vmov 0  }
0x3f69   :  { %4081 = vset.pattern.permute.xlu1 %v4294_v23  ;;  %4082 = vset.pattern.permute.xlu0 %v4294_v23 }
0x3f6a   :  { %4236 = vtanh.f32 %v3105_v32 }
0x3f74   :  { %v4237_v33 = vpop.eup %4236 }
0x3f75   :  { %3109 = vrot.lane.b32.xlu0 %v4237_v33, %s4293_s11 }
0x3fe7   :  { %v3110_v19 = vpop.permute.xlu0 %3109 }
0x3fe8   :  { %v3112_v41 = vmul.f32 %v3110_v19, %v3107_v34 }
0x3fea   :  { %v3114_v42 = vadd.f32 %v3113_v39, %v3112_v41 }
0x3fec   :  { %3116 = vrot.lane.b32.xlu1 %v3114_v42, %s4293_s11 }
0x405e   :  { %v3117_v43 = vpop.permute.xlu1 %3116 }
0x405f   :  { %3119 = vst.msk [vmem:[#allocation3 + $0xc] sm:$0x3] %vm480_vm12, %v3117_v43  ;;  %3983 = vmatmul.mubr.msk.f32.vlgmr.msra.gmra.mrb[34].mxu1 %vm376_vm13, %v3117_v43  ;;  %v3424_v43 = vsub.s32 0, %v4397_v38 }
0x4066   :  { %v3230_v7 = vld [vmem:[#allocation3 + $0xc] sm:$0x3] }
0x4132   :  { %v3189_v44 = vpop.f32.mrb[34].mxu1 }
0x4133   :  { %v3190_v46 = vadd.f32 %v4650_v26, %v3189_v44  ;;  %v3984_v47 = vpop.f32.mrb[35].mxu1  ;;  %v3232_v26 = vld [vmem:[#allocation4 + $0x120] sm:$0xff] }
0x4134   :  { %v4066_v59 = vpack.c.bf16 %v3233_v58, %v3232_v26  ;;  %v4792_v44 = vld [vmem:[%s4825_s2] sm:$0x1] }
0x4135   :  { %3201 = vrot.lane.b32.xlu0 %v3190_v46, %s4290_s0  ;;  %v3193_v4 = vadd.f32 %v3190_v46, %v3120_v48  ;;  %v4795_v46 = vrot.slane %v4792_v44, %v3424_v43 }
0x4136   :  { %4067 = vmatprep.subr.bf16.mxu0 %v4066_v59 }
0x4137   :  { %v3594_v49 = vmul.f32 -1.442695, %v3193_v4  ;;  %4069 = vmatpush3.bf16.msra.mxu0 %v4066_v59 }
0x4138   :  { %3989 = vmatprep.subr.mxu0 %v3234_v60 }
0x4139   :  { %4238 = vpow2.f32 %v3594_v49 }
0x413b   :  { %3990 = vmatpush3.msra.mxu0 %v3234_v60 }
0x4143   :  { %v4239_v50 = vpop.eup %4238 }
0x4144   :  { %v3197_v51 = vadd.f32 1.0, %v4239_v50 }
0x4146   :  { %4240 = vrcp.f32 %v3197_v51 }
0x4150   :  { %v4241_v6 = vpop.eup %4240 }
0x4151   :  { %v3211_v61 = vsub.f32 1.0, %v4241_v6  ;;  %v3217_v62 = vmul.f32 %v4241_v6, %v3114_v42  ;;  %v4786_v42 = vand.u32 127, %v324_v36 }
0x4153   :  { %vm3516_vm4 = vcmp.eq.s32.totalorder %v4786_v42, 1  ;;  %vm3514_vm5 = vcmp.eq.s32.totalorder %v4786_v42, 0 }
0x41a7   :  { %v3202_v53 = vpop.permute.xlu0 %3201 }
0x41a8   :  { %v3204_v54 = vmul.f32 %v4241_v6, %v3202_v53 }
0x41aa   :  { %3206 = vrot.lane.b32.xlu1 %v3204_v54, %s4292_s10 }
0x421c   :  { %v3207_v55 = vpop.permute.xlu1 %3206 }
0x421d   :  { %v3209_v56 = vadd.f32 %v3207_v55, %v3120_v48 }
0x421f   :  { %4242 = vtanh.f32 %v3209_v56 }
0x4229   :  { %v4243_v57 = vpop.eup %4242 }
0x422a   :  { %3213 = vrot.lane.b32.xlu0 %v4243_v57, %s4293_s11 }
0x429c   :  { %v3214_v12 = vpop.permute.xlu0 %3213 }
0x429d   :  { %v3216_v63 = vmul.f32 %v3214_v12, %v3211_v61 }
0x429f   :  { %v3218_v1 = vadd.f32 %v3217_v62, %v3216_v63 }
0x42a1   :  { %3220 = vrot.lane.b32.xlu1 %v3218_v1, %s4293_s11 }
0x4313   :  { %v3221_v13 = vpop.permute.xlu1 %3220 }
0x4314   :  { %3223 = vst.msk [vmem:[#allocation3 + $0xe] sm:$0x3] %vm480_vm12, %v3221_v13 }
0x431b   :  { %v3231_v8 = vld [vmem:[#allocation3 + $0xe] sm:$0x3] }
0x431c   :  { %v3266_v9 = vcombine.low %v3230_v7, %v3231_v8 }
0x431e   :  { %v3280_v11 = vrot.slane %v3266_v9, %v4400_v40 }
0x4320   :  { %v3281_v52 = vcombine.low %v3273_v10, %v3280_v11 }
0x4322   :  { %3992 = vmatmul.mubr.msk.f32.vlgmr.msra.gmra.mrb[36].mxu0 %vm376_vm13, %v3281_v52 }
0x43f5   :  { %v3993_v15 = vpop.f32.mrb[36].mxu0 }
0x43f6   :  { %v3358_v16 = vadd.f32 %v3993_v15, %v3595_v14  ;;  %v3352_v17 = vpop.f32.mrb[37].mxu0 }
0x43f7   :  { %v3353_v18 = vadd.f32 %v3595_v14, %v3352_v17 }
0x43f8   :  { %v3362_v20 = vadd.f32 1e-05, %v3358_v16 }
0x43f9   :  { %v3361_v21 = vadd.f32 1e-05, %v3353_v18 }
0x43fa   :  { %3365 = vst.msk [vmem:[%s4827_s4 + $0x8] sm:$0xff] %vm3363_vm14, %v3362_v20  ;;  %v3372_v22 = vsel %vm3363_vm14, %v3362_v20, -inf }
0x43fb   :  { %3364 = vst.msk [vmem:[%s4827_s4] sm:$0xff] %vm3363_vm14, %v3361_v21  ;;  %3373 = vmax.xlane.f32.xlu1 %v3372_v22  ;;  %v3369_v40 = vsel %vm3363_vm14, %v3361_v21, -inf }
0x43fc   :  { %3370 = vmax.xlane.f32.xlu0 %v3369_v40 }
0x440c   :  { %3400 = vperm.xlu1 %4081, %v3366_v35  }
0x4410   :  { %4084 = vperm.xlu1 %4081, %v4083_v37  }
0x4488   :  { %v3374_v27 = vpop.xlane.xlu1 %3373 }
0x4489   :  { %v3376_v28 = vsub.f32 %v3362_v20, %v3374_v27  ;;  %v3371_v29 = vpop.xlane.xlu0 %3370 }
0x448a   :  { %v3375_v30 = vsub.f32 %v3361_v21, %v3371_v29 }
0x448b   :  { %v3379_v31 = vmul.f32 1.442695, %v3376_v28 }
0x448c   :  { %v3377_v32 = vmul.f32 1.442695, %v3375_v30  ;;  %v3401_v41 = vpop.permute.xlu1 %3400 }
0x448d   :  { %vm3405_vm1 = vcmp.eq.s32.totalorder %v4786_v42, %v3401_v41 }
0x448e   :  { %4244 = vpow2.f32 %v3377_v32  ;;  %v3598_v47 = vsel %vm3405_vm1, 1.0, %v4287_v0 }
0x448f   :  { %4246 = vpow2.f32 %v3379_v31  ;;  %v3454_v4 = vmul.f32 %v3598_v47, %v4795_v46 }
0x4490   :  { %v4085_v48 = vpop.permute.xlu1 %4084 }
0x4491   :  { %v4086_v36 = vunpack.i.l.bf16 %v4085_v48  ;;  %v4087_v55 = vunpack.i.h.bf16 %v4085_v48 }
0x4493   :  { %v3456_v49 = vmul.f32 %v4086_v36, %v3454_v4  ;;  %v3487_v8 = vmul.f32 %v4086_v36, %v3598_v47 }
0x4495   :  { %v3458_v38 = vsel %vm3363_vm14, %v3456_v49, 0.0 }
0x4496   :  { %3459 = vadd.xlane.f32.xlu1 %v3458_v38 }
0x4498   :  { %v4245_v33 = vpop.eup %4244 }
0x4499   :  { %v3381_v34 = vsel %vm3363_vm14, %v4245_v33, 0.0  ;;  %v4247_v19 = vpop.eup %4246 }
0x449a   :  { %3382 = vadd.xlane.f32.xlu0 %v3381_v34  ;;  %v3384_v39 = vsel %vm3363_vm14, %v4247_v19, 0.0 }
0x449e   :  { %3385 = vadd.xlane.f32.xlu0 %v3384_v39 }
0x44b4   :  { %3403 = vperm.xlu0 %4082, %v3367_v45  }
0x4523   :  { %v3460_v49 = vpop.xlane.xlu1 %3459 }
0x4527   :  { %v3383_v50 = vpop.xlane.xlu0 %3382 }
0x4528   :  { %4248 = vlog2.f32 %v3383_v50 }
0x452b   :  { %v3386_v51 = vpop.xlane.xlu0 %3385 }
0x452c   :  { %4250 = vlog2.f32 %v3386_v51 }
0x4532   :  { %v4249_v6 = vpop.eup %4248 }
0x4533   :  { %v3388_v53 = vmul.f32 0.6931472, %v4249_v6  ;;  %v3404_v54 = vpop.permute.xlu0 %3403 }
0x4534   :  { %vm3406_vm2 = vcmp.eq.s32.totalorder %v4786_v42, %v3404_v54 }
0x4535   :  { %v3391_v56 = vsub.f32 %v3375_v30, %v3388_v53  ;;  %v3599_v57 = vsel %vm3406_vm2, 1.0, %v4287_v0 }
0x4536   :  { %v4251_v26 = vpop.eup %4250  ;;  %v3455_v58 = vmul.f32 %v3599_v57, %v4795_v46  ;;  %v3488_v14 = vmul.f32 %v4087_v55, %v3599_v57 }
0x4537   :  { %v3393_v59 = vmul.f32 1.442695, %v3391_v56  ;;  %v3390_v60 = vmul.f32 0.6931472, %v4251_v26  ;;  %v3417_v61 = vmul.f32 %v3598_v47, %v3391_v56 }
0x4538   :  { %v3457_v12 = vmul.f32 %v4087_v55, %v3455_v58 }
0x4539   :  { %4252 = vpow2.f32 %v3393_v59  ;;  %v3392_v62 = vsub.f32 %v3376_v28, %v3390_v60  ;;  %v3419_v63 = vsub.f32 0.0, %v3417_v61 }
0x453a   :  { %v3461_v1 = vsel %vm3363_vm14, %v3457_v12, 0.0 }
0x453b   :  { %v3395_v13 = vmul.f32 1.442695, %v3392_v62  ;;  %v3427_v2 = vmul.f32 %v4795_v46, %v3419_v63  ;;  %3462 = vadd.xlane.f32.xlu0 %v3461_v1  ;;  %v3418_v23 = vmul.f32 %v3599_v57, %v3392_v62 }
0x453d   :  { %4254 = vpow2.f32 %v3395_v13  ;;  %v3439_v3 = vmul.f32 %v4086_v36, %v3427_v2  ;;  %v3420_v28 = vsub.f32 0.0, %v3418_v23 }
0x453f   :  { %v3441_v0 = vsel %vm3363_vm14, %v3439_v3, 0.0  ;;  %v3428_v33 = vmul.f32 %v4795_v46, %v3420_v28 }
0x4540   :  { %3442 = vadd.xlane.f32.xlu1 %v3441_v0 }
0x4541   :  { %v3440_v41 = vmul.f32 %v4087_v55, %v3428_v33 }
0x4543   :  { %v4253_v5 = vpop.eup %4252 }
0x4544   :  { %v3474_v7 = vmul.f32 %v4253_v5, %v4086_v36 }
0x4546   :  { %v3489_v10 = vadd.f32 %v3487_v8, %v3474_v7  ;;  %v3476_v52 = vmul.f32 %v3598_v47, %v3474_v7  ;;  %v3444_v47 = vsel %vm3363_vm14, %v3440_v41, 0.0 }
0x4547   :  { %v4255_v9 = vpop.eup %4254 }
0x4548   :  { %v3475_v11 = vmul.f32 %v4255_v9, %v4087_v55  ;;  %v3478_v17 = vsel %vm3363_vm14, %v3476_v52, 0.0  ;;  %v3491_v18 = vsel %vm3363_vm14, %v3489_v10, 0.0 }
0x454a   :  { %v3477_v15 = vmul.f32 %v3599_v57, %v3475_v11  ;;  %v3490_v16 = vadd.f32 %v3488_v14, %v3475_v11 }
0x454c   :  { %v3479_v20 = vsel %vm3363_vm14, %v3477_v15, 0.0  ;;  %v3492_v21 = vsel %vm3363_vm14, %v3490_v16, 0.0 }
0x454d   :  { %v3480_v22 = vadd.f32 %v3479_v20, %v3478_v17  ;;  %v3493_v40 = vadd.f32 %v3492_v21, %v3491_v18 }
0x454f   :  { %v3481_v35 = vrot.slane %v3480_v22, 4  ;;  %v3494_v45 = vrot.slane %v3493_v40, 4 }
0x4551   :  { %v3495_v24 = vadd.f32 %v3494_v45, %v3493_v40  ;;  %v3482_v25 = vadd.f32 %v3481_v35, %v3480_v22 }
0x4553   :  { %v3496_v37 = vrot.slane %v3495_v24, 2  ;;  %v3483_v27 = vrot.slane %v3482_v25, 2 }
0x4555   :  { %v3497_v29 = vadd.f32 %v3496_v37, %v3495_v24  ;;  %v3484_v30 = vadd.f32 %v3483_v27, %v3482_v25 }
0x4557   :  { %v3498_v31 = vrot.slane %v3497_v29, 1  ;;  %v3485_v34 = vrot.slane %v3484_v30, 1 }
0x4559   :  { %v3499_v32 = vadd.f32 %v3498_v31, %v3497_v29  ;;  %v3486_v43 = vadd.f32 %v3485_v34, %v3484_v30 }
0x455b   :  { %v3505_v19 = vmul.f32 %v3499_v32, %v4792_v44  ;;  %v3500_v48 = vmul.f32 %v3486_v43, %v4792_v44 }
0x455d   :  { %v3506_v39 = vsel %vm3501_vm3, %v3505_v19, 0.0  ;;  %v3502_v4 = vsel %vm3501_vm3, %v3500_v48, 0.0 }
0x455e   :  { %3507 = vadd.xlane.f32.xlu1 %v3506_v39 }
0x4562   :  { %3445 = vadd.xlane.f32.xlu1 %v3444_v47 }
0x4566   :  { %3503 = vadd.xlane.f32.xlu1 %v3502_v4 }
0x45c8   :  { %v3463_v36 = vpop.xlane.xlu0 %3462 }
0x45c9   :  { %v3464_v46 = vadd.f32 %v3463_v36, %v3460_v49 }
0x45cb   :  { %v3465_v38 = vrot.slane %v3464_v46, 4 }
0x45cd   :  { %v3466_v50 = vadd.f32 %v3465_v38, %v3464_v46  ;;  %v3443_v53 = vpop.xlane.xlu1 %3442 }
0x45cf   :  { %v3467_v51 = vrot.slane %v3466_v50, 2 }
0x45d1   :  { %v3468_v6 = vadd.f32 %v3467_v51, %v3466_v50 }
0x45d3   :  { %v3469_v54 = vrot.slane %v3468_v6, 1 }
0x45d5   :  { %v3470_v55 = vadd.f32 %v3469_v54, %v3468_v6 }
0x45d7   :  { %v3471_v26 = vmax.f32 %v3470_v55, 1e-12 }
0x45eb   :  { %v3508_v56 = vpop.xlane.xlu1 %3507 }
0x45ec   :  { %v3510_v57 = vmax.f32 %v3508_v56, 1e-12 }
0x45ee   :  { %4256 = vrcp.f32 %v3510_v57 }
0x45ef   :  { %v3446_v58 = vpop.xlane.xlu1 %3445  ;;  %4258 = vrcp.f32 %v3471_v26 }
0x45f0   :  { %v3447_v44 = vadd.f32 %v3446_v58, %v3443_v53 }
0x45f2   :  { %v3448_v59 = vrot.slane %v3447_v44, 4 }
0x45f3   :  { %v3504_v61 = vpop.xlane.xlu1 %3503 }
0x45f4   :  { %v3449_v60 = vadd.f32 %v3448_v59, %v3447_v44  ;;  %v3509_v1 = vmul.f32 2.0, %v3504_v61 }
0x45f6   :  { %v3450_v12 = vrot.slane %v3449_v60, 2 }
0x45f8   :  { %v4257_v62 = vpop.eup %4256  ;;  %v3451_v63 = vadd.f32 %v3450_v12, %v3449_v60 }
0x45f9   :  { %v3512_v2 = vmul.f32 %v4257_v62, %v3509_v1  ;;  %v4259_v0 = vpop.eup %4258 }
0x45fa   :  { %v3452_v13 = vrot.slane %v3451_v63, 1 }
0x45fb   :  { %v3513_v7 = vsub.f32 1.0, %v3512_v2 }
0x45fc   :  { %v3453_v3 = vadd.f32 %v3452_v13, %v3451_v63 }
0x45fe   :  { %v3473_v5 = vmul.f32 %v4259_v0, %v3453_v3 }
0x4600   :  { %v3515_v8 = vadd.f32 %v3513_v7, %v3473_v5  ;;  %v3517_v9 = vsel %vm3516_vm4, %v3473_v5, %v3513_v7 }
0x4602   :  { %v3518_v10 = vsel %vm3514_vm5, %v3515_v8, %v3517_v9 }
0x4603   :  { %3519 = vst.msk [vmem:[%s4828_s5] sm:$0x1] %vm3501_vm3, %v3518_v10 }
0x4604   :  { %3528 = vsyncpa [#allocation5], 1 }

</bundles_post_ra>
